<compile_context>
chip_gen: v7x
topology: tpu7x:2x2x1
jax: 0.10.0
libtpu: 0.0.40
codegen_flags: <defaults>
</compile_context>

<pallas_src>
import jax
import jax.numpy as jnp
from jax.experimental import pallas as pl
from jax.experimental.pallas import tpu as pltpu


FC_INPUT_DIM = 64 * 7 * 7          # 3136, matches PyTorch _get_conv_output_dim()
FC_HIDDEN = 512
FUSED_HIDDEN = 2 * FC_HIDDEN       # value-stream | advantage-stream hidden


def _round_up(x, m):
    return ((x + m - 1) // m) * m


# ----------------------------- Pallas kernels ------------------------------ #

def _matmul_bias_relu_kernel(x_ref, w_ref, b_ref, o_ref):
    # o = relu(x @ w + b); bf16 operands, f32 accumulate on the MXU, bf16 store.
    y = jnp.dot(x_ref[...], w_ref[...], preferred_element_type=jnp.float32)
    o_ref[...] = jnp.maximum(y + b_ref[...], 0.0).astype(o_ref.dtype)


def _fc_dueling_kernel(x_ref, w1_ref, b1_ref, wh_ref, bh_ref, o_ref, acc_ref):
    """One hidden-column block of the fused FC streams + heads + dueling.

    Step j (fused hidden columns [j*tn, (j+1)*tn)):
        h_j  = relu(feats @ w1[:, cols] + b1[cols])           # f32
        acc += h_j(bf16) @ w_heads[cols, :]                   # block-diag heads
    Last step: add head bias, dueling combine, store q-values.
    """
    j = pl.program_id(0)

    @pl.when(j == 0)
    def _init():
        acc_ref[...] = jnp.zeros_like(acc_ref)

    h = jnp.dot(x_ref[...], w1_ref[...], preferred_element_type=jnp.float32)
    h = jnp.maximum(h + b1_ref[...], 0.0).astype(jnp.bfloat16)
    acc_ref[...] += jnp.dot(h, wh_ref[...], preferred_element_type=jnp.float32)

    @pl.when(j == pl.num_programs(0) - 1)
    def _finalize():
        heads = acc_ref[...] + bh_ref[...]          # (B, 1 + A), f32
        value = heads[:, 0:1]
        adv = heads[:, 1:]
        o_ref[...] = value + (adv - jnp.mean(adv, axis=1, keepdims=True))


# ------------------------------ kernel wrappers ----------------------------- #

def _choose_row_tile(m, max_tm=512):
    """Row tile: multiple of 16 (bf16 sublane tile), <= max_tm, and small
    enough to give >= 2 row blocks when possible (v7x dual-TC sharding)."""
    tm = _round_up(pl.cdiv(m, 2), 16)
    return max(16, min(max_tm, tm))


def pallas_conv_matmul(patches, w2d, bias, *, max_tm=512):
    """relu(patches @ w2d + bias), row-tiled with a parallel M grid (bf16)."""
    m, k = patches.shape
    k2, n = w2d.shape
    assert k == k2, (k, k2)

    tm = _choose_row_tile(m, max_tm)
    grid = (pl.cdiv(m, tm),)          # ragged last block; no pad / slice copies

    flops = 2 * m * k * n
    bytes_accessed = m * k * 2 + k * n * 2 + n * 4 + m * n * 2

    return pl.pallas_call(
        _matmul_bias_relu_kernel,
        out_shape=jax.ShapeDtypeStruct((m, n), jnp.bfloat16),
        grid=grid,
        in_specs=[
            pl.BlockSpec((tm, k), lambda i: (i, 0)),    # patches: streamed
            pl.BlockSpec((k, n), lambda i: (0, 0)),     # weight: resident
            pl.BlockSpec((1, n), lambda i: (0, 0)),     # bias (f32): resident
        ],
        out_specs=pl.BlockSpec((tm, n), lambda i: (i, 0)),
        compiler_params=pltpu.CompilerParams(
            dimension_semantics=("parallel",)),
        cost_estimate=pl.CostEstimate(
            flops=flops, transcendentals=0, bytes_accessed=bytes_accessed),
    )(patches, w2d, bias)


def pallas_fc_dueling(feats, w1, b1, w_heads, b_heads, nb_actions, *, tn=256):
    """Fused FC streams + block-diagonal heads + dueling combine -> (B, A)."""
    b, k = feats.shape
    n1 = w1.shape[1]                   # 1024 fused hidden columns
    assert n1 % tn == 0
    grid = (n1 // tn,)

    flops = 2 * b * (k * n1 + n1 * (1 + nb_actions))
    bytes_accessed = int(b * k * 2 + w1.size * 2 + n1 * 4 + w_heads.size * 2
                         + (1 + nb_actions) * 4 + b * nb_actions * 4)

    return pl.pallas_call(
        _fc_dueling_kernel,
        out_shape=jax.ShapeDtypeStruct((b, nb_actions), jnp.float32),
        grid=grid,
        in_specs=[
            pl.BlockSpec((b, k), lambda j: (0, 0)),                 # feats: resident
            pl.BlockSpec((k, tn), lambda j: (0, j)),                # fc1 w: streamed
            pl.BlockSpec((1, tn), lambda j: (0, j)),                # fc1 b (f32)
            pl.BlockSpec((tn, 1 + nb_actions), lambda j: (j, 0)),   # heads w
            pl.BlockSpec((1, 1 + nb_actions), lambda j: (0, 0)),    # heads b (f32)
        ],
        out_specs=pl.BlockSpec((b, nb_actions), lambda j: (0, 0)),
        scratch_shapes=[pltpu.VMEM((b, 1 + nb_actions), jnp.float32)],
        compiler_params=pltpu.CompilerParams(
            dimension_semantics=("arbitrary",)),   # sequential reduction over blocks
        cost_estimate=pl.CostEstimate(
            flops=flops, transcendentals=0, bytes_accessed=bytes_accessed),
    )(feats, w1, b1, w_heads, b_heads)


# ------------------------------- conv glue --------------------------------- #

def _im2col(x, kh, kw, stride):
    """Extract conv patches (XLA data movement only; the matmul is in Pallas).
    TODO(synk): replace with an in-kernel shifted-matmul conv (no patch HBM)."""
    b, h, w, c = x.shape
    ho = (h - kh) // stride + 1
    wo = (w - kw) // stride + 1
    cols = []
    for dh in range(kh):
        for dw in range(kw):
            cols.append(
                x[:,
                  dh:dh + stride * (ho - 1) + 1:stride,
                  dw:dw + stride * (wo - 1) + 1:stride,
                  :])
    patches = jnp.stack(cols, axis=3)                 # (B, Ho, Wo, KH*KW, C)
    return patches.reshape(b * ho * wo, kh * kw * c), (b, ho, wo)


def conv2d_relu(x, w_hwio, bias, stride):
    kh, kw, cin, cout = w_hwio.shape
    patches, (b, ho, wo) = _im2col(x, kh, kw, stride)   # bf16 patches
    w2d = w_hwio.reshape(kh * kw * cin, cout)
    out = pallas_conv_matmul(patches, w2d, bias)        # bf16 output
    return out.reshape(b, ho, wo, cout)


# ----------------------------- model definition ----------------------------- #

def init_raw_params(key, nb_actions):
    """PyTorch-default init U(-1/sqrt(fan_in), 1/sqrt(fan_in)), all f32."""
    def uniform(k, shape, fan_in):
        bound = 1.0 / float(fan_in) ** 0.5
        return jax.random.uniform(k, shape, jnp.float32, -bound, bound)

    ks = jax.random.split(key, 14)
    p = {}
    p["c1_w"] = uniform(ks[0], (8, 8, 4, 32), 8 * 8 * 4)
    p["c1_b"] = uniform(ks[1], (32,), 8 * 8 * 4)
    p["c2_w"] = uniform(ks[2], (4, 4, 32, 64), 4 * 4 * 32)
    p["c2_b"] = uniform(ks[3], (64,), 4 * 4 * 32)
    p["c3_w"] = uniform(ks[4], (3, 3, 64, 64), 3 * 3 * 64)
    p["c3_b"] = uniform(ks[5], (64,), 3 * 3 * 64)
    p["v1_w"] = uniform(ks[6], (FC_INPUT_DIM, FC_HIDDEN), FC_INPUT_DIM)
    p["v1_b"] = uniform(ks[7], (FC_HIDDEN,), FC_INPUT_DIM)
    p["v2_w"] = uniform(ks[8], (FC_HIDDEN, 1), FC_HIDDEN)
    p["v2_b"] = uniform(ks[9], (1,), FC_HIDDEN)
    p["a1_w"] = uniform(ks[10], (FC_INPUT_DIM, FC_HIDDEN), FC_INPUT_DIM)
    p["a1_b"] = uniform(ks[11], (FC_HIDDEN,), FC_INPUT_DIM)
    p["a2_w"] = uniform(ks[12], (FC_HIDDEN, nb_actions), FC_HIDDEN)
    p["a2_b"] = uniform(ks[13], (nb_actions,), FC_HIDDEN)
    return p


def prepare_params(raw, nb_actions):
    """One-time host-side transforms:
       * fold x/255 into conv1's weight,
       * bf16 matmul weights (biases stay f32),
       * permute fc1 rows so the NHWC flatten needs no NCHW transpose,
       * fuse the two 3136->512 FC layers into one (3136, 1024) weight,
       * fuse both heads into one block-diagonal (1024, 1 + A) weight."""
    p = {}
    # (x/255) @ W + b == x @ (W/255) + b
    p["c1_w"] = (raw["c1_w"] / 255.0).astype(jnp.bfloat16)
    p["c2_w"] = raw["c2_w"].astype(jnp.bfloat16)
    p["c3_w"] = raw["c3_w"].astype(jnp.bfloat16)
    p["c1_b"] = raw["c1_b"].reshape(1, -1)
    p["c2_b"] = raw["c2_b"].reshape(1, -1)
    p["c3_b"] = raw["c3_b"].reshape(1, -1)

    # PyTorch flattens NCHW: row r = c*49 + h*7 + w.  Our conv output flattens
    # NHWC: position p = (h*7 + w)*64 + c.  Permute the fc1 rows once here.
    h_i = jnp.arange(7).reshape(7, 1, 1)
    w_i = jnp.arange(7).reshape(1, 7, 1)
    c_i = jnp.arange(64).reshape(1, 1, 64)
    perm = (c_i * 49 + h_i * 7 + w_i).reshape(-1)          # (3136,)
    v1 = raw["v1_w"][perm, :]
    a1 = raw["a1_w"][perm, :]

    # Fused first FC: columns [0,512) = value hidden, [512,1024) = advantage.
    p["fc1_w"] = jnp.concatenate([v1, a1], axis=1).astype(jnp.bfloat16)
    p["fc1_b"] = jnp.concatenate([raw["v1_b"], raw["a1_b"]]).reshape(1, FUSED_HIDDEN)

    # Block-diagonal heads: rows [0,512) feed the value column (col 0),
    # rows [512,1024) feed the advantage columns (cols 1..A).
    wh = jnp.zeros((FUSED_HIDDEN, 1 + nb_actions), jnp.float32)
    wh = wh.at[:FC_HIDDEN, 0:1].set(raw["v2_w"])
    wh = wh.at[FC_HIDDEN:, 1:].set(raw["a2_w"])
    p["heads_w"] = wh.astype(jnp.bfloat16)
    p["heads_b"] = jnp.concatenate([raw["v2_b"], raw["a2_b"]]).reshape(1, 1 + nb_actions)
    return p


def dueling_dqn_forward(params, x):
    """x: (B, 84, 84, 4) NHWC float32 in [0, 255]. Returns (B, nb_actions) f32."""
    b = x.shape[0]
    nb_actions = params["heads_b"].shape[1] - 1
    x = x.astype(jnp.bfloat16)                          # /255 folded into c1_w
    h = conv2d_relu(x, params["c1_w"], params["c1_b"], stride=4)   # (B,20,20,32)
    h = conv2d_relu(h, params["c2_w"], params["c2_b"], stride=2)   # (B, 9, 9,64)
    h = conv2d_relu(h, params["c3_w"], params["c3_b"], stride=1)   # (B, 7, 7,64)
    # NHWC flatten; fc1 rows were pre-permuted so no transpose is needed here.
    feats = h.reshape(b, FC_INPUT_DIM)                  # bf16
    return pallas_fc_dueling(feats,
                             params["fc1_w"], params["fc1_b"],
                             params["heads_w"], params["heads_b"],
                             nb_actions)


# ----------------------------------- main ----------------------------------- #

if __name__ == "__main__":
    nb_actions = 6
    key = jax.random.PRNGKey(0)
    pkey, xkey = jax.random.split(key)

    raw_params = init_raw_params(pkey, nb_actions)
    params = prepare_params(raw_params, nb_actions)

    # Spatial must be 84x84 / 4 channels to match the module's fc_input_dim=3136.
    x = jax.random.uniform(xkey, (2, 84, 84, 4), jnp.float32, 0.0, 255.0)

    q_vals = jax.jit(dueling_dqn_forward)(params, x)
    jax.block_until_ready(q_vals)
    assert q_vals.shape == (2, nb_actions), q_vals.shape
    assert q_vals.dtype == jnp.float32
    assert bool(jnp.all(jnp.isfinite(q_vals)))
    print("KERNEL_OK")
</pallas_src>

<mosaic_0001>
module attributes {stable_mosaic.version = 11 : i64} {
  func.func @_matmul_bias_relu_kernel(%arg0: i32, %arg1: memref<400x256xbf16, #tpu.memory_space<vmem>>, %arg2: memref<256x32xbf16, #tpu.memory_space<vmem>>, %arg3: memref<1x32xf32, #tpu.memory_space<vmem>>, %arg4: memref<400x32xbf16, #tpu.memory_space<vmem>>) attributes {dimension_semantics = [#tpu.dimension_semantics<parallel>], iteration_bounds = array<i64: 2>, scalar_prefetch = 0 : i64, scratch_operands = 0 : i64, tpu.core_type = #tpu.core_type<tc>, window_params = [{transform_indices = @transform_0, window_bounds = array<i64: 400, 256>}, {pipeline_mode = #tpu.pipeline_mode<synchronous>, transform_indices = @transform_1, window_bounds = array<i64: 256, 32>}, {pipeline_mode = #tpu.pipeline_mode<synchronous>, transform_indices = @transform_2, window_bounds = array<i64: 1, 32>}, {transform_indices = @transform_3, window_bounds = array<i64: 400, 32>}]} {
    %c0 = arith.constant 0 : index
    %c0_0 = arith.constant 0 : index
    %0 = vector.load %arg1[%c0, %c0_0] : memref<400x256xbf16, #tpu.memory_space<vmem>>, vector<400x256xbf16>
    %c0_1 = arith.constant 0 : index
    %c0_2 = arith.constant 0 : index
    %1 = vector.load %arg2[%c0_1, %c0_2] : memref<256x32xbf16, #tpu.memory_space<vmem>>, vector<256x32xbf16>
    %cst = arith.constant dense<0.000000e+00> : vector<400x32xf32>
    %2 = tpu.matmul %0, %1, %cst {dimension_numbers = #tpu.dot_dimension_numbers<[1], [0], [0], [1], [0, 0, 1, 1], [], []>} : vector<400x256xbf16>, vector<256x32xbf16>, vector<400x32xf32> -> vector<400x32xf32>
    %c0_3 = arith.constant 0 : index
    %c0_4 = arith.constant 0 : index
    %3 = vector.load %arg3[%c0_3, %c0_4] : memref<1x32xf32, #tpu.memory_space<vmem>>, vector<1x32xf32>
    %4 = vector.broadcast %3 : vector<1x32xf32> to vector<400x32xf32>
    %5 = arith.addf %2, %4 : vector<400x32xf32>
    %cst_5 = arith.constant 0.000000e+00 : f32
    %6 = vector.broadcast %cst_5 : f32 to vector<400x32xf32>
    %7 = arith.maximumf %5, %6 : vector<400x32xf32>
    %8 = arith.truncf %7 : vector<400x32xf32> to vector<400x32xbf16>
    %c0_6 = arith.constant 0 : index
    %c0_7 = arith.constant 0 : index
    %9 = vector.load %arg4[%c0_6, %c0_7] : memref<400x32xbf16, #tpu.memory_space<vmem>>, vector<400x32xbf16>
    tpu.vector_store %arg4[%c0_6, %c0_7], %8 {strides = array<i32>} : memref<400x32xbf16, #tpu.memory_space<vmem>>, vector<400x32xbf16>,
    return
  }
  func.func @transform_0(%arg0: i32) -> (i32, i32) {
    %c0_i32 = arith.constant 0 : i32
    %c0_i32_0 = arith.constant 0 : i32
    return %arg0, %c0_i32 : i32, i32
  }
  func.func @transform_1(%arg0: i32) -> (i32, i32) {
    %c0_i32 = arith.constant 0 : i32
    %c0_i32_0 = arith.constant 0 : i32
    %c0_i32_1 = arith.constant 0 : i32
    return %c0_i32, %c0_i32_0 : i32, i32
  }
  func.func @transform_2(%arg0: i32) -> (i32, i32) {
    %c0_i32 = arith.constant 0 : i32
    %c0_i32_0 = arith.constant 0 : i32
    %c0_i32_1 = arith.constant 0 : i32
    return %c0_i32, %c0_i32_0 : i32, i32
  }
  func.func @transform_3(%arg0: i32) -> (i32, i32) {
    %c0_i32 = arith.constant 0 : i32
    %c0_i32_0 = arith.constant 0 : i32
    return %arg0, %c0_i32 : i32, i32
  }
}

module attributes {stable_mosaic.version = 11 : i64} {
  func.func @_matmul_bias_relu_kernel(%arg0: i32, %arg1: memref<96x512xbf16, #tpu.memory_space<vmem>>, %arg2: memref<512x64xbf16, #tpu.memory_space<vmem>>, %arg3: memref<1x64xf32, #tpu.memory_space<vmem>>, %arg4: memref<96x64xbf16, #tpu.memory_space<vmem>>) attributes {dimension_semantics = [#tpu.dimension_semantics<parallel>], iteration_bounds = array<i64: 2>, scalar_prefetch = 0 : i64, scratch_operands = 0 : i64, tpu.core_type = #tpu.core_type<tc>, window_params = [{transform_indices = @transform_0, window_bounds = array<i64: 96, 512>}, {pipeline_mode = #tpu.pipeline_mode<synchronous>, transform_indices = @transform_1, window_bounds = array<i64: 512, 64>}, {pipeline_mode = #tpu.pipeline_mode<synchronous>, transform_indices = @transform_2, window_bounds = array<i64: 1, 64>}, {transform_indices = @transform_3, window_bounds = array<i64: 96, 64>}]} {
    %c0 = arith.constant 0 : index
    %c0_0 = arith.constant 0 : index
    %0 = vector.load %arg1[%c0, %c0_0] : memref<96x512xbf16, #tpu.memory_space<vmem>>, vector<96x512xbf16>
    %c0_1 = arith.constant 0 : index
    %c0_2 = arith.constant 0 : index
    %1 = vector.load %arg2[%c0_1, %c0_2] : memref<512x64xbf16, #tpu.memory_space<vmem>>, vector<512x64xbf16>
    %cst = arith.constant dense<0.000000e+00> : vector<96x64xf32>
    %2 = tpu.matmul %0, %1, %cst {dimension_numbers = #tpu.dot_dimension_numbers<[1], [0], [0], [1], [0, 0, 1, 1], [], []>} : vector<96x512xbf16>, vector<512x64xbf16>, vector<96x64xf32> -> vector<96x64xf32>
    %c0_3 = arith.constant 0 : index
    %c0_4 = arith.constant 0 : index
    %3 = vector.load %arg3[%c0_3, %c0_4] : memref<1x64xf32, #tpu.memory_space<vmem>>, vector<1x64xf32>
    %4 = vector.broadcast %3 : vector<1x64xf32> to vector<96x64xf32>
    %5 = arith.addf %2, %4 : vector<96x64xf32>
    %cst_5 = arith.constant 0.000000e+00 : f32
    %6 = vector.broadcast %cst_5 : f32 to vector<96x64xf32>
    %7 = arith.maximumf %5, %6 : vector<96x64xf32>
    %8 = arith.truncf %7 : vector<96x64xf32> to vector<96x64xbf16>
    %c0_6 = arith.constant 0 : index
    %c0_7 = arith.constant 0 : index
    %9 = vector.load %arg4[%c0_6, %c0_7] : memref<96x64xbf16, #tpu.memory_space<vmem>>, vector<96x64xbf16>
    tpu.vector_store %arg4[%c0_6, %c0_7], %8 {strides = array<i32>} : memref<96x64xbf16, #tpu.memory_space<vmem>>, vector<96x64xbf16>,
    return
  }
  func.func @transform_0(%arg0: i32) -> (i32, i32) {
    %c0_i32 = arith.constant 0 : i32
    %c0_i32_0 = arith.constant 0 : i32
    return %arg0, %c0_i32 : i32, i32
  }
  func.func @transform_1(%arg0: i32) -> (i32, i32) {
    %c0_i32 = arith.constant 0 : i32
    %c0_i32_0 = arith.constant 0 : i32
    %c0_i32_1 = arith.constant 0 : i32
    return %c0_i32, %c0_i32_0 : i32, i32
  }
  func.func @transform_2(%arg0: i32) -> (i32, i32) {
    %c0_i32 = arith.constant 0 : i32
    %c0_i32_0 = arith.constant 0 : i32
    %c0_i32_1 = arith.constant 0 : i32
    return %c0_i32, %c0_i32_0 : i32, i32
  }
  func.func @transform_3(%arg0: i32) -> (i32, i32) {
    %c0_i32 = arith.constant 0 : i32
    %c0_i32_0 = arith.constant 0 : i32
    return %arg0, %c0_i32 : i32, i32
  }
}

module attributes {stable_mosaic.version = 11 : i64} {
  func.func @_matmul_bias_relu_kernel(%arg0: i32, %arg1: memref<64x576xbf16, #tpu.memory_space<vmem>>, %arg2: memref<576x64xbf16, #tpu.memory_space<vmem>>, %arg3: memref<1x64xf32, #tpu.memory_space<vmem>>, %arg4: memref<64x64xbf16, #tpu.memory_space<vmem>>) attributes {dimension_semantics = [#tpu.dimension_semantics<parallel>], iteration_bounds = array<i64: 2>, scalar_prefetch = 0 : i64, scratch_operands = 0 : i64, tpu.core_type = #tpu.core_type<tc>, window_params = [{transform_indices = @transform_0, window_bounds = array<i64: 64, 576>}, {pipeline_mode = #tpu.pipeline_mode<synchronous>, transform_indices = @transform_1, window_bounds = array<i64: 576, 64>}, {pipeline_mode = #tpu.pipeline_mode<synchronous>, transform_indices = @transform_2, window_bounds = array<i64: 1, 64>}, {transform_indices = @transform_3, window_bounds = array<i64: 64, 64>}]} {
    %c0 = arith.constant 0 : index
    %c0_0 = arith.constant 0 : index
    %0 = vector.load %arg1[%c0, %c0_0] : memref<64x576xbf16, #tpu.memory_space<vmem>>, vector<64x576xbf16>
    %c0_1 = arith.constant 0 : index
    %c0_2 = arith.constant 0 : index
    %1 = vector.load %arg2[%c0_1, %c0_2] : memref<576x64xbf16, #tpu.memory_space<vmem>>, vector<576x64xbf16>
    %cst = arith.constant dense<0.000000e+00> : vector<64x64xf32>
    %2 = tpu.matmul %0, %1, %cst {dimension_numbers = #tpu.dot_dimension_numbers<[1], [0], [0], [1], [0, 0, 1, 1], [], []>} : vector<64x576xbf16>, vector<576x64xbf16>, vector<64x64xf32> -> vector<64x64xf32>
    %c0_3 = arith.constant 0 : index
    %c0_4 = arith.constant 0 : index
    %3 = vector.load %arg3[%c0_3, %c0_4] : memref<1x64xf32, #tpu.memory_space<vmem>>, vector<1x64xf32>
    %4 = vector.broadcast %3 : vector<1x64xf32> to vector<64x64xf32>
    %5 = arith.addf %2, %4 : vector<64x64xf32>
    %cst_5 = arith.constant 0.000000e+00 : f32
    %6 = vector.broadcast %cst_5 : f32 to vector<64x64xf32>
    %7 = arith.maximumf %5, %6 : vector<64x64xf32>
    %8 = arith.truncf %7 : vector<64x64xf32> to vector<64x64xbf16>
    %c0_6 = arith.constant 0 : index
    %c0_7 = arith.constant 0 : index
    %9 = vector.load %arg4[%c0_6, %c0_7] : memref<64x64xbf16, #tpu.memory_space<vmem>>, vector<64x64xbf16>
    tpu.vector_store %arg4[%c0_6, %c0_7], %8 {strides = array<i32>} : memref<64x64xbf16, #tpu.memory_space<vmem>>, vector<64x64xbf16>,
    return
  }
  func.func @transform_0(%arg0: i32) -> (i32, i32) {
    %c0_i32 = arith.constant 0 : i32
    %c0_i32_0 = arith.constant 0 : i32
    return %arg0, %c0_i32 : i32, i32
  }
  func.func @transform_1(%arg0: i32) -> (i32, i32) {
    %c0_i32 = arith.constant 0 : i32
    %c0_i32_0 = arith.constant 0 : i32
    %c0_i32_1 = arith.constant 0 : i32
    return %c0_i32, %c0_i32_0 : i32, i32
  }
  func.func @transform_2(%arg0: i32) -> (i32, i32) {
    %c0_i32 = arith.constant 0 : i32
    %c0_i32_0 = arith.constant 0 : i32
    %c0_i32_1 = arith.constant 0 : i32
    return %c0_i32, %c0_i32_0 : i32, i32
  }
  func.func @transform_3(%arg0: i32) -> (i32, i32) {
    %c0_i32 = arith.constant 0 : i32
    %c0_i32_0 = arith.constant 0 : i32
    return %arg0, %c0_i32 : i32, i32
  }
}

module attributes {stable_mosaic.version = 11 : i64} {
  func.func @_fc_dueling_kernel(%arg0: i32, %arg1: memref<2x3136xbf16, #tpu.memory_space<vmem>>, %arg2: memref<3136x256xbf16, #tpu.memory_space<vmem>>, %arg3: memref<1x256xf32, #tpu.memory_space<vmem>>, %arg4: memref<256x7xbf16, #tpu.memory_space<vmem>>, %arg5: memref<1x7xf32, #tpu.memory_space<vmem>>, %arg6: memref<2x6xf32, #tpu.memory_space<vmem>>, %arg7: memref<2x7xf32, #tpu.memory_space<vmem>>) attributes {dimension_semantics = [#tpu.dimension_semantics<arbitrary>], iteration_bounds = array<i64: 4>, scalar_prefetch = 0 : i64, scratch_operands = 1 : i64, tpu.core_type = #tpu.core_type<tc>, window_params = [{pipeline_mode = #tpu.pipeline_mode<synchronous>, transform_indices = @transform_0, window_bounds = array<i64: 2, 3136>}, {transform_indices = @transform_1, window_bounds = array<i64: 3136, 256>}, {transform_indices = @transform_2, window_bounds = array<i64: 1, 256>}, {transform_indices = @transform_3, window_bounds = array<i64: 256, 7>}, {pipeline_mode = #tpu.pipeline_mode<synchronous>, transform_indices = @transform_4, window_bounds = array<i64: 1, 7>}, {pipeline_mode = #tpu.pipeline_mode<synchronous>, transform_indices = @transform_5, window_bounds = array<i64: 2, 6>}]} {
    %c0_i32 = arith.constant 0 : i32
    %0 = arith.cmpi eq, %arg0, %c0_i32 : i32
    %1 = arith.extui %0 : i1 to i32
    %c0_i32_0 = arith.constant 0 : i32
    %2 = arith.cmpi ne, %1, %c0_i32_0 : i32
    scf.if %2 {
      %cst_15 = arith.constant 0.000000e+00 : f32
      %20 = vector.broadcast %cst_15 : f32 to vector<2x7xf32>
      %c0_16 = arith.constant 0 : index
      %c0_17 = arith.constant 0 : index
      %21 = vector.load %arg7[%c0_16, %c0_17] : memref<2x7xf32, #tpu.memory_space<vmem>>, vector<2x7xf32>
      tpu.vector_store %arg7[%c0_16, %c0_17], %20 {strides = array<i32>} : memref<2x7xf32, #tpu.memory_space<vmem>>, vector<2x7xf32>,
    } else {
    }
    %c0 = arith.constant 0 : index
    %c0_1 = arith.constant 0 : index
    %3 = vector.load %arg1[%c0, %c0_1] : memref<2x3136xbf16, #tpu.memory_space<vmem>>, vector<2x3136xbf16>
    %c0_2 = arith.constant 0 : index
    %c0_3 = arith.constant 0 : index
    %4 = vector.load %arg2[%c0_2, %c0_3] : memref<3136x256xbf16, #tpu.memory_space<vmem>>, vector<3136x256xbf16>
    %cst = arith.constant dense<0.000000e+00> : vector<2x256xf32>
    %5 = tpu.matmul %3, %4, %cst {dimension_numbers = #tpu.dot_dimension_numbers<[1], [0], [0], [1], [0, 0, 1, 1], [], []>} : vector<2x3136xbf16>, vector<3136x256xbf16>, vector<2x256xf32> -> vector<2x256xf32>
    %c0_4 = arith.constant 0 : index
    %c0_5 = arith.constant 0 : index
    %6 = vector.load %arg3[%c0_4, %c0_5] : memref<1x256xf32, #tpu.memory_space<vmem>>, vector<1x256xf32>
    %7 = vector.broadcast %6 : vector<1x256xf32> to vector<2x256xf32>
    %8 = arith.addf %5, %7 : vector<2x256xf32>
    %cst_6 = arith.constant 0.000000e+00 : f32
    %9 = vector.broadcast %cst_6 : f32 to vector<2x256xf32>
    %10 = arith.maximumf %8, %9 : vector<2x256xf32>
    %11 = arith.truncf %10 : vector<2x256xf32> to vector<2x256xbf16>
    %c0_7 = arith.constant 0 : index
    %c0_8 = arith.constant 0 : index
    %12 = vector.load %arg7[%c0_7, %c0_8] : memref<2x7xf32, #tpu.memory_space<vmem>>, vector<2x7xf32>
    %c0_9 = arith.constant 0 : index
    %c0_10 = arith.constant 0 : index
    %13 = vector.load %arg4[%c0_9, %c0_10] : memref<256x7xbf16, #tpu.memory_space<vmem>>, vector<256x7xbf16>
    %cst_11 = arith.constant dense<0.000000e+00> : vector<2x7xf32>
    %14 = tpu.matmul %11, %13, %cst_11 {dimension_numbers = #tpu.dot_dimension_numbers<[1], [0], [0], [1], [0, 0, 1, 1], [], []>} : vector<2x256xbf16>, vector<256x7xbf16>, vector<2x7xf32> -> vector<2x7xf32>
    %15 = arith.addf %12, %14 : vector<2x7xf32>
    %c0_12 = arith.constant 0 : index
    %c0_13 = arith.constant 0 : index
    %16 = vector.load %arg7[%c0_12, %c0_13] : memref<2x7xf32, #tpu.memory_space<vmem>>, vector<2x7xf32>
    tpu.vector_store %arg7[%c0_12, %c0_13], %15 {strides = array<i32>} : memref<2x7xf32, #tpu.memory_space<vmem>>, vector<2x7xf32>,
    %c3_i32 = arith.constant 3 : i32
    %17 = arith.cmpi eq, %arg0, %c3_i32 : i32
    %18 = arith.extui %17 : i1 to i32
    %c0_i32_14 = arith.constant 0 : i32
    %19 = arith.cmpi ne, %18, %c0_i32_14 : i32
    scf.if %19 {
      %c0_15 = arith.constant 0 : index
      %c0_16 = arith.constant 0 : index
      %20 = vector.load %arg7[%c0_15, %c0_16] : memref<2x7xf32, #tpu.memory_space<vmem>>, vector<2x7xf32>
      %c0_17 = arith.constant 0 : index
      %c0_18 = arith.constant 0 : index
      %21 = vector.load %arg5[%c0_17, %c0_18] : memref<1x7xf32, #tpu.memory_space<vmem>>, vector<1x7xf32>
      %22 = vector.broadcast %21 : vector<1x7xf32> to vector<2x7xf32>
      %23 = arith.addf %20, %22 : vector<2x7xf32>
      %24 = vector.extract_strided_slice %23 {offsets = [0, 0], sizes = [2, 1], strides = [1, 1]} : vector<2x7xf32> to vector<2x1xf32>
      %25 = vector.extract_strided_slice %23 {offsets = [0, 1], sizes = [2, 6], strides = [1, 1]} : vector<2x7xf32> to vector<2x6xf32>
      %cst_19 = arith.constant dense<0.000000e+00> : vector<2xf32>
      %26 = vector.multi_reduction <add>, %25, %cst_19 [1] : vector<2x6xf32> to vector<2xf32>
      %27 = vector.shape_cast %26 : vector<2xf32> to vector<2x1xf32>
      %cst_20 = arith.constant 6.000000e+00 : f32
      %28 = vector.broadcast %cst_20 : f32 to vector<2x1xf32>
      %29 = arith.divf %27, %28 : vector<2x1xf32>
      %30 = vector.broadcast %29 : vector<2x1xf32> to vector<2x6xf32>
      %31 = arith.subf %25, %30 : vector<2x6xf32>
      %32 = vector.broadcast %24 : vector<2x1xf32> to vector<2x6xf32>
      %33 = arith.addf %32, %31 : vector<2x6xf32>
      %c0_21 = arith.constant 0 : index
      %c0_22 = arith.constant 0 : index
      %34 = vector.load %arg6[%c0_21, %c0_22] : memref<2x6xf32, #tpu.memory_space<vmem>>, vector<2x6xf32>
      tpu.vector_store %arg6[%c0_21, %c0_22], %33 {strides = array<i32>} : memref<2x6xf32, #tpu.memory_space<vmem>>, vector<2x6xf32>,
    } else {
    }
    return
  }
  func.func @transform_0(%arg0: i32) -> (i32, i32) {
    %c0_i32 = arith.constant 0 : i32
    %c0_i32_0 = arith.constant 0 : i32
    %c0_i32_1 = arith.constant 0 : i32
    return %c0_i32, %c0_i32_0 : i32, i32
  }
  func.func @transform_1(%arg0: i32) -> (i32, i32) {
    %c0_i32 = arith.constant 0 : i32
    %c0_i32_0 = arith.constant 0 : i32
    return %c0_i32, %arg0 : i32, i32
  }
  func.func @transform_2(%arg0: i32) -> (i32, i32) {
    %c0_i32 = arith.constant 0 : i32
    %c0_i32_0 = arith.constant 0 : i32
    return %c0_i32, %arg0 : i32, i32
  }
  func.func @transform_3(%arg0: i32) -> (i32, i32) {
    %c0_i32 = arith.constant 0 : i32
    %c0_i32_0 = arith.constant 0 : i32
    return %arg0, %c0_i32 : i32, i32
  }
  func.func @transform_4(%arg0: i32) -> (i32, i32) {
    %c0_i32 = arith.constant 0 : i32
    %c0_i32_0 = arith.constant 0 : i32
    %c0_i32_1 = arith.constant 0 : i32
    return %c0_i32, %c0_i32_0 : i32, i32
  }
  func.func @transform_5(%arg0: i32) -> (i32, i32) {
    %c0_i32 = arith.constant 0 : i32
    %c0_i32_0 = arith.constant 0 : i32
    %c0_i32_1 = arith.constant 0 : i32
    return %c0_i32, %c0_i32_0 : i32, i32
  }
}

</mosaic_0001>

<bundles_post_ra>
// kernel: dueling_dqn_forward.4
= control target key start
LH: loop header
LB: loop body
LE: loop exit
PB: predicated region body
PF: predicated region fallthrough
CT: control target
= control target key end

     0   :  { %s1542_s12 = smov 0   ;;  %s1852_s0 = inlined_call_operand.vmem [shape: bf16[800,256], index: 0, kind: input, shape index: {}]   ;;  %s1853_s1 = inlined_call_operand.vmem [shape: bf16[256,32], index: 1, kind: input, shape index: {}]   ;;  %s1854_s2 = inlined_call_operand.vmem [shape: f32[1,32], index: 2, kind: input, shape index: {}]   ;;  %s1855_s3 = inlined_call_operand.vmem [shape: bf16[800,32], index: 3, kind: output, shape index: {}]  }
   0x1 LB: > { %s1203_s13 = sadd.s32 4294967295, %s1519_s12   ;;  %p1207_p0 = scmp.ge.s32.totalorder %s1519_s12, 1  ;;  %s1519_s12 = sphi %s1542_s12, %s13_s12  }
   0x2   : > { %p139_p1 = scmp.lt.s32.totalorder %s1519_s12, 3 }
   0x4   : > { %p140_p2 = pnand %p1207_p0, %p139_p1 }
   0x5   : > { %v1422_v0 = vld [vmem:[%s1853_s1] sm:$0xff] (!%p140_p2)   ;;  %v1521_v1 = vmov (!%p140_p2), 0   ;;  %s164_s16 = smul.u32 (!%p140_p2), 50, %s1203_s13  ;;  %v1423_v2 = vld [vmem:[%s1853_s1 + $0x8] sm:$0xff] (!%p140_p2)   ;;  %v1424_v3 = vld [vmem:[%s1853_s1 + $0x10] sm:$0xff] (!%p140_p2)   ;;  %vm1096_vm0 = vcmask (!%p140_p2), 257024  }
   0x6   : > { %143 = sbr.rel (%p140_p2) target bundleno = 387 (0x183), region = 32  ;;  %613 = vmatprep.subr.bf16.mxu0 (!%p140_p2), %v1521_v1  ;;  %1381 = vmatprep.subr.bf16.mxu1 (!%p140_p2), %v1521_v1  ;;  %v1425_v4 = vld [vmem:[%s1853_s1 + $0x18] sm:$0xff] (!%p140_p2)   ;;  %v1426_v5 = vld [vmem:[%s1853_s1 + $0x20] sm:$0xff] (!%p140_p2)   ;;  %v1427_v7 = vld [vmem:[%s1853_s1 + $0x28] sm:$0xff] (!%p140_p2)  }
   0x7   : > { %614 = vmatpush1.bf16.msra.mxu0 (!%p140_p2), %v1422_v0  ;;  %1397 = vmatpush1.bf16.msra.mxu1 (!%p140_p2), %v1422_v0  ;;  %p165_p3 = scmp.lt.s32.totalorder (!%p140_p2), %s164_s16, 99  ;;  %v1428_v9 = vld [vmem:[%s1853_s1 + $0x30] sm:$0xff] (!%p140_p2)   ;;  %v1429_v10 = vld [vmem:[%s1853_s1 + $0x38] sm:$0xff] (!%p140_p2)   ;;  %v1430_v11 = vld [vmem:[%s1853_s1 + $0x40] sm:$0xff] (!%p140_p2)  }
   0x8   : > { %615 = vmatprep.subr.bf16.mxu0 (!%p140_p2), %v1521_v1  ;;  %1382 = vmatprep.subr.bf16.mxu1 (!%p140_p2), %v1521_v1  ;;  %v1431_v12 = vld [vmem:[%s1853_s1 + $0x48] sm:$0xff] (!%p140_p2)   ;;  %v1432_v13 = vld [vmem:[%s1853_s1 + $0x50] sm:$0xff] (!%p140_p2)   ;;  %v1433_v14 = vld [vmem:[%s1853_s1 + $0x58] sm:$0xff] (!%p140_p2)  }
   0x9   : > { %v1434_v15 = vld [vmem:[%s1853_s1 + $0x60] sm:$0xff] (!%p140_p2)   ;;  %v1435_v16 = vld [vmem:[%s1853_s1 + $0x68] sm:$0xff] (!%p140_p2)   ;;  %v1436_v17 = vld [vmem:[%s1853_s1 + $0x70] sm:$0xff] (!%p140_p2)  }
   0xa   : > { %v1437_v18 = vld [vmem:[%s1853_s1 + $0x78] sm:$0xff] (!%p140_p2)  }
   0xb   : > { %616 = vmatpush1.bf16.msra.mxu0 (!%p140_p2), %v1423_v2  ;;  %1398 = vmatpush1.bf16.msra.mxu1 (!%p140_p2), %v1423_v2 }
   0xc   : > { %617 = vmatprep.subr.bf16.mxu0 (!%p140_p2), %v1521_v1  ;;  %1383 = vmatprep.subr.bf16.mxu1 (!%p140_p2), %v1521_v1 }
   0xd   : > { %s1857_s16 = smov (!%p165_p3, %s164_s16), 99 }
   0xe   : > { %s1330_s23 = sshll.u32 %s1857_s16, 3  ;;  %s1210_s29 = sshll.u32 %s1857_s16, 2 }
   0xf   : > { %618 = vmatpush1.bf16.msra.mxu0 %v1424_v3  ;;  %1399 = vmatpush1.bf16.msra.mxu1 %v1424_v3  ;;  %s1579_s28 = scalar_lea.vmem %s1852_s0, %s1330_s23  ;;  %v1691_v3 = vld [vmem:[%s1854_s2] ss:$0 sm:$0xff]  ;;  %s1701_s16 = scalar_lea.vmem %s1855_s3, %s1210_s29 }
  0x10   : > { %619 = vmatprep.subr.bf16.mxu0 %v1521_v1  ;;  %1384 = vmatprep.subr.bf16.mxu1 %v1521_v1  ;;  %v1440_v6 = vld [vmem:[%s1579_s28 + $0x4] ss:$8 sps:$4 sm:$0xff]   ;;  %v1443_v8 = vld [vmem:[%s1579_s28 + $0xd4] ss:$8 sps:$4 sm:$0xff]   ;;  %v1438_v19 = vld [vmem:[%s1579_s28] ss:$8 sps:$4 sm:$0xff]  }
  0x11   : > { %645 = vmatprep.mubr.bf16.mxu0 %v1440_v6  ;;  %749 = vmatprep.mubr.bf16.mxu1 %v1443_v8  ;;  %v1441_v20 = vld [vmem:[%s1579_s28 + $0xd0] ss:$8 sps:$4 sm:$0xff]   ;;  %v1444_v21 = vld [vmem:[%s1579_s28 + $0x14] ss:$8 sps:$4 sm:$0xff]   ;;  %v1447_v22 = vld [vmem:[%s1579_s28 + $0xe4] ss:$8 sps:$4 sm:$0xff]  }
  0x12   : > { %v1446_v23 = vld [vmem:[%s1579_s28 + $0x10] ss:$8 sps:$4 sm:$0xff]   ;;  %v1449_v24 = vld [vmem:[%s1579_s28 + $0xe0] ss:$8 sps:$4 sm:$0xff]   ;;  %v1450_v25 = vld [vmem:[%s1579_s28 + $0x24] ss:$8 sps:$4 sm:$0xff]  }
  0x13   : > { %620 = vmatpush1.bf16.msra.mxu0 %v1425_v4  ;;  %1400 = vmatpush1.bf16.msra.mxu1 %v1425_v4  ;;  %v1453_v26 = vld [vmem:[%s1579_s28 + $0xf4] ss:$8 sps:$4 sm:$0xff]   ;;  %v1452_v27 = vld [vmem:[%s1579_s28 + $0x20] ss:$8 sps:$4 sm:$0xff]   ;;  %v1455_v28 = vld [vmem:[%s1579_s28 + $0xf0] ss:$8 sps:$4 sm:$0xff]  }
  0x14   : > { %621 = vmatprep.subr.bf16.mxu0 %v1521_v1  ;;  %1385 = vmatprep.subr.bf16.mxu1 %v1521_v1  ;;  %v1456_v29 = vld [vmem:[%s1579_s28 + $0x34] ss:$8 sps:$4 sm:$0xff]   ;;  %v1459_v30 = vld [vmem:[%s1579_s28 + $0x104] ss:$8 sps:$4 sm:$0xff]   ;;  %v1458_v31 = vld [vmem:[%s1579_s28 + $0x30] ss:$8 sps:$4 sm:$0xff]  }
  0x15   : > { %v1461_v32 = vld [vmem:[%s1579_s28 + $0x100] ss:$8 sps:$4 sm:$0xff]   ;;  %v1462_v33 = vld [vmem:[%s1579_s28 + $0x44] ss:$8 sps:$4 sm:$0xff]   ;;  %v1465_v34 = vld [vmem:[%s1579_s28 + $0x114] ss:$8 sps:$4 sm:$0xff]  }
  0x16   : > { %v1464_v35 = vld [vmem:[%s1579_s28 + $0x40] ss:$8 sps:$4 sm:$0xff]   ;;  %v1467_v36 = vld [vmem:[%s1579_s28 + $0x110] ss:$8 sps:$4 sm:$0xff]   ;;  %v1468_v37 = vld [vmem:[%s1579_s28 + $0x54] ss:$8 sps:$4 sm:$0xff]  }
  0x17   : > { %622 = vmatpush1.bf16.msra.mxu0 %v1426_v5  ;;  %1401 = vmatpush1.bf16.msra.mxu1 %v1426_v5  ;;  %v1471_v38 = vld [vmem:[%s1579_s28 + $0x124] ss:$8 sps:$4 sm:$0xff]   ;;  %v1470_v39 = vld [vmem:[%s1579_s28 + $0x50] ss:$8 sps:$4 sm:$0xff]   ;;  %v1473_v40 = vld [vmem:[%s1579_s28 + $0x120] ss:$8 sps:$4 sm:$0xff]  }
  0x18   : > { %623 = vmatprep.subr.bf16.mxu0 %v1521_v1  ;;  %1386 = vmatprep.subr.bf16.mxu1 %v1521_v1  ;;  %v1474_v41 = vld [vmem:[%s1579_s28 + $0x64] ss:$8 sps:$4 sm:$0xff]   ;;  %v1477_v42 = vld [vmem:[%s1579_s28 + $0x134] ss:$8 sps:$4 sm:$0xff]   ;;  %v1476_v43 = vld [vmem:[%s1579_s28 + $0x60] ss:$8 sps:$4 sm:$0xff]  }
  0x19   : > { %v1479_v44 = vld [vmem:[%s1579_s28 + $0x130] ss:$8 sps:$4 sm:$0xff]   ;;  %v1480_v45 = vld [vmem:[%s1579_s28 + $0x74] ss:$8 sps:$4 sm:$0xff]   ;;  %v1483_v46 = vld [vmem:[%s1579_s28 + $0x144] ss:$8 sps:$4 sm:$0xff]  }
  0x1a   : > { %v1482_v47 = vld [vmem:[%s1579_s28 + $0x70] ss:$8 sps:$4 sm:$0xff]   ;;  %v1485_v48 = vld [vmem:[%s1579_s28 + $0x140] ss:$8 sps:$4 sm:$0xff]   ;;  %v1486_v49 = vld [vmem:[%s1579_s28 + $0x84] ss:$8 sps:$4 sm:$0xff]  }
  0x1b   : > { %624 = vmatpush1.bf16.msra.mxu0 %v1427_v7  ;;  %1402 = vmatpush1.bf16.msra.mxu1 %v1427_v7  ;;  %v1489_v50 = vld [vmem:[%s1579_s28 + $0x154] ss:$8 sps:$4 sm:$0xff]   ;;  %v1488_v51 = vld [vmem:[%s1579_s28 + $0x80] ss:$8 sps:$4 sm:$0xff]   ;;  %v1491_v52 = vld [vmem:[%s1579_s28 + $0x150] ss:$8 sps:$4 sm:$0xff]  }
  0x1c   : > { %625 = vmatprep.subr.bf16.mxu0 %v1521_v1  ;;  %1387 = vmatprep.subr.bf16.mxu1 %v1521_v1  ;;  %v1492_v53 = vld [vmem:[%s1579_s28 + $0x94] ss:$8 sps:$4 sm:$0xff]   ;;  %v1495_v54 = vld [vmem:[%s1579_s28 + $0x164] ss:$8 sps:$4 sm:$0xff]   ;;  %v1494_v55 = vld [vmem:[%s1579_s28 + $0x90] ss:$8 sps:$4 sm:$0xff]  }
  0x1d   : > { %v1497_v56 = vld [vmem:[%s1579_s28 + $0x160] ss:$8 sps:$4 sm:$0xff]   ;;  %v1498_v57 = vld [vmem:[%s1579_s28 + $0xa4] ss:$8 sps:$4 sm:$0xff]   ;;  %v1501_v58 = vld [vmem:[%s1579_s28 + $0x174] ss:$8 sps:$4 sm:$0xff]  }
  0x1e   : > { %v1500_v59 = vld [vmem:[%s1579_s28 + $0xa0] ss:$8 sps:$4 sm:$0xff]   ;;  %v1503_v60 = vld [vmem:[%s1579_s28 + $0x170] ss:$8 sps:$4 sm:$0xff]   ;;  %v1504_v61 = vld [vmem:[%s1579_s28 + $0xb4] ss:$8 sps:$4 sm:$0xff]  }
  0x1f   : > { %626 = vmatpush1.bf16.msra.mxu0 %v1428_v9  ;;  %1403 = vmatpush1.bf16.msra.mxu1 %v1428_v9  ;;  %v1507_v62 = vld [vmem:[%s1579_s28 + $0x184] ss:$8 sps:$4 sm:$0xff]   ;;  %v1506_v63 = vld [vmem:[%s1579_s28 + $0xb0] ss:$8 sps:$4 sm:$0xff]   ;;  %v1509_v0 = vld [vmem:[%s1579_s28 + $0x180] ss:$8 sps:$4 sm:$0xff]  }
  0x20   : > { %627 = vmatprep.subr.bf16.mxu0 %v1521_v1  ;;  %1388 = vmatprep.subr.bf16.mxu1 %v1521_v1  ;;  %v1512_v2 = vld [vmem:[%s1579_s28 + $0xc0] ss:$8 sps:$4 sm:$0xff]  }
  0x23   : > { %628 = vmatpush1.bf16.msra.mxu0 %v1429_v10  ;;  %1404 = vmatpush1.bf16.msra.mxu1 %v1429_v10 }
  0x24   : > { %629 = vmatprep.subr.bf16.mxu0 %v1521_v1  ;;  %1389 = vmatprep.subr.bf16.mxu1 %v1521_v1 }
  0x27   : > { %630 = vmatpush1.bf16.msra.mxu0 %v1430_v11  ;;  %1405 = vmatpush1.bf16.msra.mxu1 %v1430_v11 }
  0x28   : > { %631 = vmatprep.subr.bf16.mxu0 %v1521_v1  ;;  %1390 = vmatprep.subr.bf16.mxu1 %v1521_v1 }
  0x2b   : > { %632 = vmatpush1.bf16.msra.mxu0 %v1431_v12  ;;  %1406 = vmatpush1.bf16.msra.mxu1 %v1431_v12 }
  0x2c   : > { %633 = vmatprep.subr.bf16.mxu0 %v1521_v1  ;;  %1391 = vmatprep.subr.bf16.mxu1 %v1521_v1 }
  0x2f   : > { %634 = vmatpush1.bf16.msra.mxu0 %v1432_v13  ;;  %1407 = vmatpush1.bf16.msra.mxu1 %v1432_v13 }
  0x30   : > { %635 = vmatprep.subr.bf16.mxu0 %v1521_v1  ;;  %1392 = vmatprep.subr.bf16.mxu1 %v1521_v1 }
  0x33   : > { %636 = vmatpush1.bf16.msra.mxu0 %v1433_v14  ;;  %1408 = vmatpush1.bf16.msra.mxu1 %v1433_v14 }
  0x34   : > { %637 = vmatprep.subr.bf16.mxu0 %v1521_v1  ;;  %1393 = vmatprep.subr.bf16.mxu1 %v1521_v1 }
  0x37   : > { %638 = vmatpush1.bf16.msra.mxu0 %v1434_v15  ;;  %1409 = vmatpush1.bf16.msra.mxu1 %v1434_v15 }
  0x38   : > { %639 = vmatprep.subr.bf16.mxu0 %v1521_v1  ;;  %1394 = vmatprep.subr.bf16.mxu1 %v1521_v1 }
  0x3b   : > { %640 = vmatpush1.bf16.msra.mxu0 %v1435_v16  ;;  %1410 = vmatpush1.bf16.msra.mxu1 %v1435_v16 }
  0x3c   : > { %641 = vmatprep.subr.bf16.mxu0 %v1521_v1  ;;  %1395 = vmatprep.subr.bf16.mxu1 %v1521_v1 }
  0x3f   : > { %642 = vmatpush1.bf16.msra.mxu0 %v1436_v17  ;;  %1411 = vmatpush1.bf16.msra.mxu1 %v1436_v17 }
  0x40   : > { %643 = vmatprep.subr.bf16.mxu0 %v1521_v1  ;;  %1396 = vmatprep.subr.bf16.mxu1 %v1521_v1  ;;  %v1510_v1 = vld [vmem:[%s1579_s28 + $0xc4] ss:$8 sps:$4 sm:$0xff]  }
  0x43   : > { %644 = vmatpush1.bf16.msra.mxu0 %v1437_v18  ;;  %1412 = vmatpush1.bf16.msra.mxu1 %v1437_v18 }
  0x46   : > { %646 = vmatmul.mubr.bf16.vlgmr.msra.gmra.mrb[0].mxu0 %v1438_v19  ;;  %750 = vmatmul.mubr.bf16.vlgmr.msra.gmra.mrb[0].mxu1 %v1441_v20 }
  0x47   : > { %653 = vmatprep.mubr.bf16.mxu0 %v1444_v21  ;;  %757 = vmatprep.mubr.bf16.mxu1 %v1447_v22 }
  0x4e   : > { %654 = vmatmul.mubr.bf16.gmra.mrb[4].mxu0 %v1446_v23  ;;  %758 = vmatmul.mubr.bf16.gmra.mrb[4].mxu1 %v1449_v24 }
  0x4f   : > { %661 = vmatprep.mubr.bf16.mxu0 %v1450_v25  ;;  %765 = vmatprep.mubr.bf16.mxu1 %v1453_v26 }
  0x56   : > { %662 = vmatmul.mubr.bf16.gmra.mrb[8].mxu0 %v1452_v27  ;;  %766 = vmatmul.mubr.bf16.gmra.mrb[8].mxu1 %v1455_v28 }
  0x57   : > { %669 = vmatprep.mubr.bf16.mxu0 %v1456_v29  ;;  %773 = vmatprep.mubr.bf16.mxu1 %v1459_v30 }
  0x5e   : > { %670 = vmatmul.mubr.bf16.gmra.mrb[12].mxu0 %v1458_v31  ;;  %774 = vmatmul.mubr.bf16.gmra.mrb[12].mxu1 %v1461_v32 }
  0x5f   : > { %677 = vmatprep.mubr.bf16.mxu0 %v1462_v33  ;;  %781 = vmatprep.mubr.bf16.mxu1 %v1465_v34 }
  0x66   : > { %678 = vmatmul.mubr.bf16.gmra.mrb[16].mxu0 %v1464_v35  ;;  %782 = vmatmul.mubr.bf16.gmra.mrb[16].mxu1 %v1467_v36 }
  0x67   : > { %685 = vmatprep.mubr.bf16.mxu0 %v1468_v37  ;;  %789 = vmatprep.mubr.bf16.mxu1 %v1471_v38 }
  0x6e   : > { %686 = vmatmul.mubr.bf16.gmra.mrb[20].mxu0 %v1470_v39  ;;  %790 = vmatmul.mubr.bf16.gmra.mrb[20].mxu1 %v1473_v40 }
  0x6f   : > { %693 = vmatprep.mubr.bf16.mxu0 %v1474_v41  ;;  %797 = vmatprep.mubr.bf16.mxu1 %v1477_v42 }
  0x76   : > { %694 = vmatmul.mubr.bf16.gmra.mrb[24].mxu0 %v1476_v43  ;;  %798 = vmatmul.mubr.bf16.gmra.mrb[24].mxu1 %v1479_v44 }
  0x77   : > { %701 = vmatprep.mubr.bf16.mxu0 %v1480_v45  ;;  %805 = vmatprep.mubr.bf16.mxu1 %v1483_v46 }
  0x7e   : > { %702 = vmatmul.mubr.bf16.gmra.mrb[28].mxu0 %v1482_v47  ;;  %806 = vmatmul.mubr.bf16.gmra.mrb[28].mxu1 %v1485_v48 }
  0x7f   : > { %709 = vmatprep.mubr.bf16.mxu0 %v1486_v49  ;;  %813 = vmatprep.mubr.bf16.mxu1 %v1489_v50 }
  0x86   : > { %710 = vmatmul.mubr.bf16.gmra.mrb[32].mxu0 %v1488_v51  ;;  %814 = vmatmul.mubr.bf16.gmra.mrb[32].mxu1 %v1491_v52 }
  0x87   : > { %717 = vmatprep.mubr.bf16.mxu0 %v1492_v53  ;;  %821 = vmatprep.mubr.bf16.mxu1 %v1495_v54 }
  0x8e   : > { %718 = vmatmul.mubr.bf16.gmra.mrb[36].mxu0 %v1494_v55  ;;  %822 = vmatmul.mubr.bf16.gmra.mrb[36].mxu1 %v1497_v56 }
  0x8f   : > { %725 = vmatprep.mubr.bf16.mxu0 %v1498_v57  ;;  %829 = vmatprep.mubr.bf16.mxu1 %v1501_v58 }
  0x96   : > { %726 = vmatmul.mubr.bf16.gmra.mrb[40].mxu0 %v1500_v59  ;;  %830 = vmatmul.mubr.bf16.gmra.mrb[40].mxu1 %v1503_v60 }
  0x97   : > { %733 = vmatprep.mubr.bf16.mxu0 %v1504_v61  ;;  %837 = vmatprep.mubr.bf16.mxu1 %v1507_v62 }
  0x9e   : > { %734 = vmatmul.mubr.bf16.gmra.mrb[44].mxu0 %v1506_v63  ;;  %838 = vmatmul.mubr.bf16.gmra.mrb[44].mxu1 %v1509_v0 }
  0x9f   : > { %741 = vmatprep.mubr.bf16.mxu0 %v1510_v1 }
  0xa6   : > { %742 = vmatmul.mubr.bf16.gmra.mrb[48].mxu0 %v1512_v2 }
 0x119   : > { %v647_v4 = vpop.f32.mrb[0].mxu0  ;;  %v751_v5 = vpop.f32.mrb[0].mxu1 }
 0x11a   : > { %v648_v6 = vadd.f32 %v1691_v3, %v647_v4  ;;  %v649_v7 = vpop.f32.mrb[1].mxu0  ;;  %v752_v8 = vadd.f32 %v1691_v3, %v751_v5  ;;  %v753_v9 = vpop.f32.mrb[1].mxu1 }
 0x11b   : > { %v650_v10 = vpop.f32.mrb[2].mxu0  ;;  %v754_v11 = vpop.f32.mrb[2].mxu1 }
 0x11c   : > { %v846_v12 = vmax.f32 %v648_v6, 0.0  ;;  %v651_v13 = vadd.f32 %v1691_v3, %v650_v10  ;;  %v652_v14 = vpop.f32.mrb[3].mxu0  ;;  %v872_v15 = vmax.f32 %v752_v8, 0.0  ;;  %v755_v16 = vadd.f32 %v1691_v3, %v754_v11  ;;  %v756_v17 = vpop.f32.mrb[3].mxu1 }
 0x11e   : > { %v1331_v18 = vpack.c.bf16 %v846_v12, %v846_v12  ;;  %v847_v19 = vmax.f32 %v651_v13, 0.0  ;;  %v1357_v20 = vpack.c.bf16 %v872_v15, %v872_v15  ;;  %v873_v21 = vmax.f32 %v755_v16, 0.0 }
 0x120   : > { %1097 = vst.msk [vmem:[%s1701_s16] sm:$0xf] %vm1096_vm0, %v1331_v18  ;;  %v1332_v22 = vpack.c.bf16 %v847_v19, %v847_v19  ;;  %1123 = vst.msk [vmem:[%s1701_s16 + $0x68] sm:$0xf] %vm1096_vm0, %v1357_v20  ;;  %v1358_v23 = vpack.c.bf16 %v873_v21, %v873_v21 }
 0x121   : > { %v655_v24 = vpop.f32.mrb[4].mxu0  ;;  %v759_v25 = vpop.f32.mrb[4].mxu1 }
 0x122   : > { %1098 = vst.msk [vmem:[%s1701_s16 + $0x4] sm:$0xf] %vm1096_vm0, %v1332_v22  ;;  %1124 = vst.msk [vmem:[%s1701_s16 + $0x6c] sm:$0xf] %vm1096_vm0, %v1358_v23  ;;  %v656_v26 = vadd.f32 %v1691_v3, %v655_v24  ;;  %v657_v27 = vpop.f32.mrb[5].mxu0  ;;  %v760_v28 = vadd.f32 %v1691_v3, %v759_v25  ;;  %v761_v29 = vpop.f32.mrb[5].mxu1 }
 0x123   : > { %v658_v30 = vpop.f32.mrb[6].mxu0  ;;  %v762_v31 = vpop.f32.mrb[6].mxu1 }
 0x124   : > { %v848_v32 = vmax.f32 %v656_v26, 0.0  ;;  %v659_v33 = vadd.f32 %v1691_v3, %v658_v30  ;;  %v660_v34 = vpop.f32.mrb[7].mxu0  ;;  %v874_v35 = vmax.f32 %v760_v28, 0.0  ;;  %v763_v36 = vadd.f32 %v1691_v3, %v762_v31  ;;  %v764_v37 = vpop.f32.mrb[7].mxu1 }
 0x126   : > { %v1333_v38 = vpack.c.bf16 %v848_v32, %v848_v32  ;;  %v849_v39 = vmax.f32 %v659_v33, 0.0  ;;  %v1359_v40 = vpack.c.bf16 %v874_v35, %v874_v35  ;;  %v875_v41 = vmax.f32 %v763_v36, 0.0 }
 0x128   : > { %1099 = vst.msk [vmem:[%s1701_s16 + $0x8] sm:$0xf] %vm1096_vm0, %v1333_v38  ;;  %v1334_v42 = vpack.c.bf16 %v849_v39, %v849_v39  ;;  %1125 = vst.msk [vmem:[%s1701_s16 + $0x70] sm:$0xf] %vm1096_vm0, %v1359_v40  ;;  %v1360_v43 = vpack.c.bf16 %v875_v41, %v875_v41 }
 0x129   : > { %v663_v44 = vpop.f32.mrb[8].mxu0  ;;  %v767_v45 = vpop.f32.mrb[8].mxu1 }
 0x12a   : > { %1100 = vst.msk [vmem:[%s1701_s16 + $0xc] sm:$0xf] %vm1096_vm0, %v1334_v42  ;;  %1126 = vst.msk [vmem:[%s1701_s16 + $0x74] sm:$0xf] %vm1096_vm0, %v1360_v43  ;;  %v664_v46 = vadd.f32 %v1691_v3, %v663_v44  ;;  %v665_v47 = vpop.f32.mrb[9].mxu0  ;;  %v768_v48 = vadd.f32 %v1691_v3, %v767_v45  ;;  %v769_v49 = vpop.f32.mrb[9].mxu1 }
 0x12b   : > { %v666_v50 = vpop.f32.mrb[10].mxu0  ;;  %v770_v51 = vpop.f32.mrb[10].mxu1 }
 0x12c   : > { %v850_v52 = vmax.f32 %v664_v46, 0.0  ;;  %v667_v53 = vadd.f32 %v1691_v3, %v666_v50  ;;  %v668_v54 = vpop.f32.mrb[11].mxu0  ;;  %v876_v55 = vmax.f32 %v768_v48, 0.0  ;;  %v771_v56 = vadd.f32 %v1691_v3, %v770_v51  ;;  %v772_v57 = vpop.f32.mrb[11].mxu1 }
 0x12e   : > { %v1335_v58 = vpack.c.bf16 %v850_v52, %v850_v52  ;;  %v851_v59 = vmax.f32 %v667_v53, 0.0  ;;  %v1361_v60 = vpack.c.bf16 %v876_v55, %v876_v55  ;;  %v877_v61 = vmax.f32 %v771_v56, 0.0 }
 0x130   : > { %1101 = vst.msk [vmem:[%s1701_s16 + $0x10] sm:$0xf] %vm1096_vm0, %v1335_v58  ;;  %v1336_v62 = vpack.c.bf16 %v851_v59, %v851_v59  ;;  %1127 = vst.msk [vmem:[%s1701_s16 + $0x78] sm:$0xf] %vm1096_vm0, %v1361_v60  ;;  %v1362_v63 = vpack.c.bf16 %v877_v61, %v877_v61 }
 0x131   : > { %v671_v0 = vpop.f32.mrb[12].mxu0  ;;  %v775_v1 = vpop.f32.mrb[12].mxu1 }
 0x132   : > { %1102 = vst.msk [vmem:[%s1701_s16 + $0x14] sm:$0xf] %vm1096_vm0, %v1336_v62  ;;  %1128 = vst.msk [vmem:[%s1701_s16 + $0x7c] sm:$0xf] %vm1096_vm0, %v1362_v63  ;;  %v672_v2 = vadd.f32 %v1691_v3, %v671_v0  ;;  %v673_v4 = vpop.f32.mrb[13].mxu0  ;;  %v776_v5 = vadd.f32 %v1691_v3, %v775_v1  ;;  %v777_v6 = vpop.f32.mrb[13].mxu1 }
 0x133   : > { %v674_v7 = vpop.f32.mrb[14].mxu0  ;;  %v778_v8 = vpop.f32.mrb[14].mxu1 }
 0x134   : > { %v852_v9 = vmax.f32 %v672_v2, 0.0  ;;  %v675_v10 = vadd.f32 %v1691_v3, %v674_v7  ;;  %v676_v11 = vpop.f32.mrb[15].mxu0  ;;  %v878_v12 = vmax.f32 %v776_v5, 0.0  ;;  %v779_v13 = vadd.f32 %v1691_v3, %v778_v8  ;;  %v780_v14 = vpop.f32.mrb[15].mxu1 }
 0x136   : > { %v1337_v15 = vpack.c.bf16 %v852_v9, %v852_v9  ;;  %v853_v16 = vmax.f32 %v675_v10, 0.0  ;;  %v1363_v17 = vpack.c.bf16 %v878_v12, %v878_v12  ;;  %v879_v18 = vmax.f32 %v779_v13, 0.0 }
 0x138   : > { %1103 = vst.msk [vmem:[%s1701_s16 + $0x18] sm:$0xf] %vm1096_vm0, %v1337_v15  ;;  %v1338_v19 = vpack.c.bf16 %v853_v16, %v853_v16  ;;  %1129 = vst.msk [vmem:[%s1701_s16 + $0x80] sm:$0xf] %vm1096_vm0, %v1363_v17  ;;  %v1364_v20 = vpack.c.bf16 %v879_v18, %v879_v18 }
 0x139   : > { %v679_v21 = vpop.f32.mrb[16].mxu0  ;;  %v783_v22 = vpop.f32.mrb[16].mxu1 }
 0x13a   : > { %1104 = vst.msk [vmem:[%s1701_s16 + $0x1c] sm:$0xf] %vm1096_vm0, %v1338_v19  ;;  %1130 = vst.msk [vmem:[%s1701_s16 + $0x84] sm:$0xf] %vm1096_vm0, %v1364_v20  ;;  %v680_v23 = vadd.f32 %v1691_v3, %v679_v21  ;;  %v681_v24 = vpop.f32.mrb[17].mxu0  ;;  %v784_v25 = vadd.f32 %v1691_v3, %v783_v22  ;;  %v785_v26 = vpop.f32.mrb[17].mxu1 }
 0x13b   : > { %v682_v27 = vpop.f32.mrb[18].mxu0  ;;  %v786_v28 = vpop.f32.mrb[18].mxu1 }
 0x13c   : > { %v854_v29 = vmax.f32 %v680_v23, 0.0  ;;  %v683_v30 = vadd.f32 %v1691_v3, %v682_v27  ;;  %v684_v31 = vpop.f32.mrb[19].mxu0  ;;  %v880_v32 = vmax.f32 %v784_v25, 0.0  ;;  %v787_v33 = vadd.f32 %v1691_v3, %v786_v28  ;;  %v788_v34 = vpop.f32.mrb[19].mxu1 }
 0x13e   : > { %v1339_v35 = vpack.c.bf16 %v854_v29, %v854_v29  ;;  %v855_v36 = vmax.f32 %v683_v30, 0.0  ;;  %v1365_v37 = vpack.c.bf16 %v880_v32, %v880_v32  ;;  %v881_v38 = vmax.f32 %v787_v33, 0.0 }
 0x140   : > { %1105 = vst.msk [vmem:[%s1701_s16 + $0x20] sm:$0xf] %vm1096_vm0, %v1339_v35  ;;  %v1340_v39 = vpack.c.bf16 %v855_v36, %v855_v36  ;;  %1131 = vst.msk [vmem:[%s1701_s16 + $0x88] sm:$0xf] %vm1096_vm0, %v1365_v37  ;;  %v1366_v40 = vpack.c.bf16 %v881_v38, %v881_v38 }
 0x141   : > { %v687_v41 = vpop.f32.mrb[20].mxu0  ;;  %v791_v42 = vpop.f32.mrb[20].mxu1 }
 0x142   : > { %1106 = vst.msk [vmem:[%s1701_s16 + $0x24] sm:$0xf] %vm1096_vm0, %v1340_v39  ;;  %1132 = vst.msk [vmem:[%s1701_s16 + $0x8c] sm:$0xf] %vm1096_vm0, %v1366_v40  ;;  %v688_v43 = vadd.f32 %v1691_v3, %v687_v41  ;;  %v689_v44 = vpop.f32.mrb[21].mxu0  ;;  %v792_v45 = vadd.f32 %v1691_v3, %v791_v42  ;;  %v793_v46 = vpop.f32.mrb[21].mxu1 }
 0x143   : > { %v690_v47 = vpop.f32.mrb[22].mxu0  ;;  %v794_v48 = vpop.f32.mrb[22].mxu1 }
 0x144   : > { %v856_v49 = vmax.f32 %v688_v43, 0.0  ;;  %v691_v50 = vadd.f32 %v1691_v3, %v690_v47  ;;  %v692_v51 = vpop.f32.mrb[23].mxu0  ;;  %v882_v52 = vmax.f32 %v792_v45, 0.0  ;;  %v795_v53 = vadd.f32 %v1691_v3, %v794_v48  ;;  %v796_v54 = vpop.f32.mrb[23].mxu1 }
 0x146   : > { %v1341_v55 = vpack.c.bf16 %v856_v49, %v856_v49  ;;  %v857_v56 = vmax.f32 %v691_v50, 0.0  ;;  %v1367_v57 = vpack.c.bf16 %v882_v52, %v882_v52  ;;  %v883_v58 = vmax.f32 %v795_v53, 0.0 }
 0x148   : > { %1107 = vst.msk [vmem:[%s1701_s16 + $0x28] sm:$0xf] %vm1096_vm0, %v1341_v55  ;;  %v1342_v59 = vpack.c.bf16 %v857_v56, %v857_v56  ;;  %1133 = vst.msk [vmem:[%s1701_s16 + $0x90] sm:$0xf] %vm1096_vm0, %v1367_v57  ;;  %v1368_v60 = vpack.c.bf16 %v883_v58, %v883_v58 }
 0x149   : > { %v695_v61 = vpop.f32.mrb[24].mxu0  ;;  %v799_v62 = vpop.f32.mrb[24].mxu1 }
 0x14a   : > { %1108 = vst.msk [vmem:[%s1701_s16 + $0x2c] sm:$0xf] %vm1096_vm0, %v1342_v59  ;;  %1134 = vst.msk [vmem:[%s1701_s16 + $0x94] sm:$0xf] %vm1096_vm0, %v1368_v60  ;;  %v696_v63 = vadd.f32 %v1691_v3, %v695_v61  ;;  %v697_v0 = vpop.f32.mrb[25].mxu0  ;;  %v800_v1 = vadd.f32 %v1691_v3, %v799_v62  ;;  %v801_v2 = vpop.f32.mrb[25].mxu1 }
 0x14b   : > { %v698_v4 = vpop.f32.mrb[26].mxu0  ;;  %v802_v5 = vpop.f32.mrb[26].mxu1 }
 0x14c   : > { %v858_v6 = vmax.f32 %v696_v63, 0.0  ;;  %v699_v7 = vadd.f32 %v1691_v3, %v698_v4  ;;  %v700_v8 = vpop.f32.mrb[27].mxu0  ;;  %v884_v9 = vmax.f32 %v800_v1, 0.0  ;;  %v803_v10 = vadd.f32 %v1691_v3, %v802_v5  ;;  %v804_v11 = vpop.f32.mrb[27].mxu1 }
 0x14e   : > { %v1343_v12 = vpack.c.bf16 %v858_v6, %v858_v6  ;;  %v859_v13 = vmax.f32 %v699_v7, 0.0  ;;  %v1369_v14 = vpack.c.bf16 %v884_v9, %v884_v9  ;;  %v885_v15 = vmax.f32 %v803_v10, 0.0 }
 0x150   : > { %1109 = vst.msk [vmem:[%s1701_s16 + $0x30] sm:$0xf] %vm1096_vm0, %v1343_v12  ;;  %v1344_v16 = vpack.c.bf16 %v859_v13, %v859_v13  ;;  %1135 = vst.msk [vmem:[%s1701_s16 + $0x98] sm:$0xf] %vm1096_vm0, %v1369_v14  ;;  %v1370_v17 = vpack.c.bf16 %v885_v15, %v885_v15 }
 0x151   : > { %v703_v18 = vpop.f32.mrb[28].mxu0  ;;  %v807_v19 = vpop.f32.mrb[28].mxu1 }
 0x152   : > { %1110 = vst.msk [vmem:[%s1701_s16 + $0x34] sm:$0xf] %vm1096_vm0, %v1344_v16  ;;  %1136 = vst.msk [vmem:[%s1701_s16 + $0x9c] sm:$0xf] %vm1096_vm0, %v1370_v17  ;;  %v704_v20 = vadd.f32 %v1691_v3, %v703_v18  ;;  %v705_v21 = vpop.f32.mrb[29].mxu0  ;;  %v808_v22 = vadd.f32 %v1691_v3, %v807_v19  ;;  %v809_v23 = vpop.f32.mrb[29].mxu1 }
 0x153   : > { %v706_v24 = vpop.f32.mrb[30].mxu0  ;;  %v810_v25 = vpop.f32.mrb[30].mxu1 }
 0x154   : > { %v860_v26 = vmax.f32 %v704_v20, 0.0  ;;  %v707_v27 = vadd.f32 %v1691_v3, %v706_v24  ;;  %v708_v28 = vpop.f32.mrb[31].mxu0  ;;  %v886_v29 = vmax.f32 %v808_v22, 0.0  ;;  %v811_v30 = vadd.f32 %v1691_v3, %v810_v25  ;;  %v812_v31 = vpop.f32.mrb[31].mxu1 }
 0x156   : > { %v1345_v32 = vpack.c.bf16 %v860_v26, %v860_v26  ;;  %v861_v33 = vmax.f32 %v707_v27, 0.0  ;;  %v1371_v34 = vpack.c.bf16 %v886_v29, %v886_v29  ;;  %v887_v35 = vmax.f32 %v811_v30, 0.0 }
 0x158   : > { %1111 = vst.msk [vmem:[%s1701_s16 + $0x38] sm:$0xf] %vm1096_vm0, %v1345_v32  ;;  %v1346_v36 = vpack.c.bf16 %v861_v33, %v861_v33  ;;  %1137 = vst.msk [vmem:[%s1701_s16 + $0xa0] sm:$0xf] %vm1096_vm0, %v1371_v34  ;;  %v1372_v37 = vpack.c.bf16 %v887_v35, %v887_v35 }
 0x159   : > { %v711_v38 = vpop.f32.mrb[32].mxu0  ;;  %v815_v39 = vpop.f32.mrb[32].mxu1 }
 0x15a   : > { %1112 = vst.msk [vmem:[%s1701_s16 + $0x3c] sm:$0xf] %vm1096_vm0, %v1346_v36  ;;  %1138 = vst.msk [vmem:[%s1701_s16 + $0xa4] sm:$0xf] %vm1096_vm0, %v1372_v37  ;;  %v712_v40 = vadd.f32 %v1691_v3, %v711_v38  ;;  %v713_v41 = vpop.f32.mrb[33].mxu0  ;;  %v816_v42 = vadd.f32 %v1691_v3, %v815_v39  ;;  %v817_v43 = vpop.f32.mrb[33].mxu1 }
 0x15b   : > { %v714_v44 = vpop.f32.mrb[34].mxu0  ;;  %v818_v45 = vpop.f32.mrb[34].mxu1 }
 0x15c   : > { %v862_v46 = vmax.f32 %v712_v40, 0.0  ;;  %v715_v47 = vadd.f32 %v1691_v3, %v714_v44  ;;  %v716_v48 = vpop.f32.mrb[35].mxu0  ;;  %v888_v49 = vmax.f32 %v816_v42, 0.0  ;;  %v819_v50 = vadd.f32 %v1691_v3, %v818_v45  ;;  %v820_v51 = vpop.f32.mrb[35].mxu1 }
 0x15e   : > { %v1347_v52 = vpack.c.bf16 %v862_v46, %v862_v46  ;;  %v863_v53 = vmax.f32 %v715_v47, 0.0  ;;  %v1373_v54 = vpack.c.bf16 %v888_v49, %v888_v49  ;;  %v889_v55 = vmax.f32 %v819_v50, 0.0 }
 0x160   : > { %1113 = vst.msk [vmem:[%s1701_s16 + $0x40] sm:$0xf] %vm1096_vm0, %v1347_v52  ;;  %v1348_v56 = vpack.c.bf16 %v863_v53, %v863_v53  ;;  %1139 = vst.msk [vmem:[%s1701_s16 + $0xa8] sm:$0xf] %vm1096_vm0, %v1373_v54  ;;  %v1374_v57 = vpack.c.bf16 %v889_v55, %v889_v55 }
 0x161   : > { %v719_v58 = vpop.f32.mrb[36].mxu0  ;;  %v823_v59 = vpop.f32.mrb[36].mxu1 }
 0x162   : > { %1114 = vst.msk [vmem:[%s1701_s16 + $0x44] sm:$0xf] %vm1096_vm0, %v1348_v56  ;;  %1140 = vst.msk [vmem:[%s1701_s16 + $0xac] sm:$0xf] %vm1096_vm0, %v1374_v57  ;;  %v720_v60 = vadd.f32 %v1691_v3, %v719_v58  ;;  %v721_v61 = vpop.f32.mrb[37].mxu0  ;;  %v824_v62 = vadd.f32 %v1691_v3, %v823_v59  ;;  %v825_v63 = vpop.f32.mrb[37].mxu1 }
 0x163   : > { %v722_v0 = vpop.f32.mrb[38].mxu0  ;;  %v826_v1 = vpop.f32.mrb[38].mxu1 }
 0x164   : > { %v864_v2 = vmax.f32 %v720_v60, 0.0  ;;  %v723_v4 = vadd.f32 %v1691_v3, %v722_v0  ;;  %v724_v5 = vpop.f32.mrb[39].mxu0  ;;  %v890_v6 = vmax.f32 %v824_v62, 0.0  ;;  %v827_v7 = vadd.f32 %v1691_v3, %v826_v1  ;;  %v828_v8 = vpop.f32.mrb[39].mxu1 }
 0x166   : > { %v1349_v9 = vpack.c.bf16 %v864_v2, %v864_v2  ;;  %v865_v10 = vmax.f32 %v723_v4, 0.0  ;;  %v1375_v11 = vpack.c.bf16 %v890_v6, %v890_v6  ;;  %v891_v12 = vmax.f32 %v827_v7, 0.0 }
 0x168   : > { %1115 = vst.msk [vmem:[%s1701_s16 + $0x48] sm:$0xf] %vm1096_vm0, %v1349_v9  ;;  %v1350_v13 = vpack.c.bf16 %v865_v10, %v865_v10  ;;  %1141 = vst.msk [vmem:[%s1701_s16 + $0xb0] sm:$0xf] %vm1096_vm0, %v1375_v11  ;;  %v1376_v14 = vpack.c.bf16 %v891_v12, %v891_v12 }
 0x169   : > { %v727_v15 = vpop.f32.mrb[40].mxu0  ;;  %v831_v16 = vpop.f32.mrb[40].mxu1 }
 0x16a   : > { %1116 = vst.msk [vmem:[%s1701_s16 + $0x4c] sm:$0xf] %vm1096_vm0, %v1350_v13  ;;  %1142 = vst.msk [vmem:[%s1701_s16 + $0xb4] sm:$0xf] %vm1096_vm0, %v1376_v14  ;;  %v728_v17 = vadd.f32 %v1691_v3, %v727_v15  ;;  %v729_v18 = vpop.f32.mrb[41].mxu0  ;;  %v832_v19 = vadd.f32 %v1691_v3, %v831_v16  ;;  %v833_v20 = vpop.f32.mrb[41].mxu1 }
 0x16b   : > { %v730_v21 = vpop.f32.mrb[42].mxu0  ;;  %v834_v22 = vpop.f32.mrb[42].mxu1 }
 0x16c   : > { %v866_v23 = vmax.f32 %v728_v17, 0.0  ;;  %v731_v24 = vadd.f32 %v1691_v3, %v730_v21  ;;  %v732_v25 = vpop.f32.mrb[43].mxu0  ;;  %v892_v26 = vmax.f32 %v832_v19, 0.0  ;;  %v835_v27 = vadd.f32 %v1691_v3, %v834_v22  ;;  %v836_v28 = vpop.f32.mrb[43].mxu1 }
 0x16e   : > { %v1351_v29 = vpack.c.bf16 %v866_v23, %v866_v23  ;;  %v867_v30 = vmax.f32 %v731_v24, 0.0  ;;  %v1377_v31 = vpack.c.bf16 %v892_v26, %v892_v26  ;;  %v893_v32 = vmax.f32 %v835_v27, 0.0 }
 0x170   : > { %1117 = vst.msk [vmem:[%s1701_s16 + $0x50] sm:$0xf] %vm1096_vm0, %v1351_v29  ;;  %v1352_v33 = vpack.c.bf16 %v867_v30, %v867_v30  ;;  %1143 = vst.msk [vmem:[%s1701_s16 + $0xb8] sm:$0xf] %vm1096_vm0, %v1377_v31  ;;  %v1378_v34 = vpack.c.bf16 %v893_v32, %v893_v32 }
 0x171   : > { %v735_v35 = vpop.f32.mrb[44].mxu0  ;;  %v839_v36 = vpop.f32.mrb[44].mxu1 }
 0x172   : > { %1118 = vst.msk [vmem:[%s1701_s16 + $0x54] sm:$0xf] %vm1096_vm0, %v1352_v33  ;;  %1144 = vst.msk [vmem:[%s1701_s16 + $0xbc] sm:$0xf] %vm1096_vm0, %v1378_v34  ;;  %v736_v37 = vadd.f32 %v1691_v3, %v735_v35  ;;  %v737_v38 = vpop.f32.mrb[45].mxu0  ;;  %v840_v39 = vadd.f32 %v1691_v3, %v839_v36  ;;  %v841_v40 = vpop.f32.mrb[45].mxu1 }
 0x173   : > { %v738_v41 = vpop.f32.mrb[46].mxu0  ;;  %v842_v42 = vpop.f32.mrb[46].mxu1 }
 0x174   : > { %v868_v43 = vmax.f32 %v736_v37, 0.0  ;;  %v739_v44 = vadd.f32 %v1691_v3, %v738_v41  ;;  %v740_v45 = vpop.f32.mrb[47].mxu0  ;;  %v894_v46 = vmax.f32 %v840_v39, 0.0  ;;  %v843_v47 = vadd.f32 %v1691_v3, %v842_v42  ;;  %v844_v48 = vpop.f32.mrb[47].mxu1 }
 0x176   : > { %v1353_v49 = vpack.c.bf16 %v868_v43, %v868_v43  ;;  %v869_v50 = vmax.f32 %v739_v44, 0.0  ;;  %v1379_v51 = vpack.c.bf16 %v894_v46, %v894_v46  ;;  %v895_v52 = vmax.f32 %v843_v47, 0.0 }
 0x178   : > { %1119 = vst.msk [vmem:[%s1701_s16 + $0x58] sm:$0xf] %vm1096_vm0, %v1353_v49  ;;  %v1354_v53 = vpack.c.bf16 %v869_v50, %v869_v50  ;;  %1145 = vst.msk [vmem:[%s1701_s16 + $0xc0] sm:$0xf] %vm1096_vm0, %v1379_v51  ;;  %v1380_v54 = vpack.c.bf16 %v895_v52, %v895_v52 }
 0x179   : > { %v743_v55 = vpop.f32.mrb[48].mxu0 }
 0x17a   : > { %1120 = vst.msk [vmem:[%s1701_s16 + $0x5c] sm:$0xf] %vm1096_vm0, %v1354_v53  ;;  %1146 = vst.msk [vmem:[%s1701_s16 + $0xc4] sm:$0xf] %vm1096_vm0, %v1380_v54  ;;  %v744_v56 = vadd.f32 %v1691_v3, %v743_v55  ;;  %v745_v57 = vpop.f32.mrb[49].mxu0 }
 0x17b   : > { %v746_v58 = vpop.f32.mrb[50].mxu0 }
 0x17c   : > { %v870_v59 = vmax.f32 %v744_v56, 0.0  ;;  %v747_v60 = vadd.f32 %v1691_v3, %v746_v58  ;;  %v748_v61 = vpop.f32.mrb[51].mxu0 }
 0x17e   : > { %v1355_v62 = vpack.c.bf16 %v870_v59, %v870_v59  ;;  %v871_v63 = vmax.f32 %v747_v60, 0.0 }
 0x180   : > { %1121 = vst.msk [vmem:[%s1701_s16 + $0x60] sm:$0xf] %vm1096_vm0, %v1355_v62  ;;  %v1356_v0 = vpack.c.bf16 %v871_v63, %v871_v63 }
 0x182   : > { %1122 = vst.msk [vmem:[%s1701_s16 + $0x64] sm:$0xf] %vm1096_vm0, %v1356_v0 }
 0x183 PF: > { %s13_s12 = sadd.s32 1, %s1519_s12  }
 0x184   : > { %p10_p4 = scmp.ge.s32.totalorder %s13_s12, 4  }
 0x186   :  { %12 = sbr.rel (!%p10_p4) target bundleno = 1 (0x1), region = 62 }

// kernel: dueling_dqn_forward.5
= control target key start
LH: loop header
LB: loop body
LE: loop exit
PB: predicated region body
PF: predicated region fallthrough
CT: control target
= control target key end

     0   :  { %s1578_s12 = smov 0   ;;  %s1580_s13 = smov 0   ;;  %s1840_s0 = inlined_call_operand.vmem [shape: bf16[162,512], index: 0, kind: input, shape index: {}]   ;;  %s1841_s1 = inlined_call_operand.vmem [shape: bf16[512,64], index: 1, kind: input, shape index: {}]   ;;  %s1842_s2 = inlined_call_operand.vmem [shape: f32[1,64], index: 2, kind: input, shape index: {}]   ;;  %s1843_s3 = inlined_call_operand.vmem [shape: bf16[162,64], index: 3, kind: output, shape index: {}]  }
   0x1   :  { %s1582_s14 = smov 0  }
   0x2 LB: > { %s1591_s15 = sadd.s32 4294967295, %s1524_s14   ;;  %s1593_s16 = sadd.s32 1, %s1524_s14   ;;  %s1524_s14 = sphi %s1582_s14, %s1850_s14   ;;  %s1520_s13 = sphi %s1580_s13, %s1849_s13   ;;  %s1516_s12 = sphi %s1578_s12, %s1848_s12  }
   0x3   : > { %s85_s17 = ssub.s32 %s1524_s14, %s1593_s16  ;;  %s88_s18 = sadd.s32 1, %s1520_s13 }
   0x4   : > { %p86_p0 = scmp.eq.s32.totalorder %s85_s17, 0  ;;  %p98_p1 = scmp.ne.s32.totalorder %s1520_s13, %s1516_s12 }
   0x5   : > { %p99_p2 = scmp.eq.s32.totalorder %s1591_s15, 1  ;;  %p1106_p3 = scmp.ge.s32.totalorder %s1524_s14, 1 }
   0x6   : > { %s1601_s19 = scalar_select %p86_p0, %s1520_s13, %s88_s18  }
   0x7   : > { %p1603_p4 = por %p99_p2, %p98_p1  ;;  %p149_p5 = scmp.lt.s32.totalorder %s1524_s14, 3 }
   0x9   : > { %p150_p6 = pnand %p1106_p3, %p149_p5 }
   0xa   : > { %v1398_v0 = vld [vmem:[%s1841_s1 + $0x40] sm:$0xff] (!%p150_p6)   ;;  %v1402_v4 = vld [vmem:[%s1841_s1 + $0x48] sm:$0xff] (!%p150_p6)   ;;  %v1406_v8 = vld [vmem:[%s1841_s1 + $0x50] sm:$0xff] (!%p150_p6)   ;;  %s1653_s30 = smul.u32 (!%p150_p6), 12, %s1591_s15  ;;  %s175_s5 = sand.u32 (!%p150_p6), 1, %s1516_s12   ;;  %vm830_vm0 = vcmask (!%p150_p6), 519168  }
   0xb   : > { %153 = sbr.rel (%p150_p6) target bundleno = 379 (0x17b), region = 32  ;;  %v1399_v1 = vld [vmem:[%s1841_s1 + $0xc0] sm:$0xff] (!%p150_p6)   ;;  %1204 = vmatprep.subr.bf16.mxu0 (!%p150_p6), %v1398_v0  ;;  %v1403_v5 = vld [vmem:[%s1841_s1 + $0xc8] sm:$0xff] (!%p150_p6)   ;;  %v1407_v9 = vld [vmem:[%s1841_s1 + $0xd0] sm:$0xff] (!%p150_p6)  }
   0xc   : > { %v1400_v2 = vld [vmem:[%s1841_s1] sm:$0xff] (!%p150_p6)   ;;  %1256 = vmatprep.subr.bf16.mxu1 (!%p150_p6), %v1399_v1  ;;  %v1404_v6 = vld [vmem:[%s1841_s1 + $0x8] sm:$0xff] (!%p150_p6)   ;;  %v1408_v10 = vld [vmem:[%s1841_s1 + $0x10] sm:$0xff] (!%p150_p6)   ;;  %p184_p7 = scmp.lt.s32.totalorder (!%p150_p6), %s1653_s30, 20  ;;  %s1308_s6 = smul.u32 (!%p150_p6), 48, %s175_s5 }
   0xd   : > { %v1401_v3 = vld [vmem:[%s1841_s1 + $0x80] sm:$0xff] (!%p150_p6)   ;;  %1205 = vmatpush3.bf16.msra.mxu0 (!%p150_p6), %v1400_v2  ;;  %v1405_v7 = vld [vmem:[%s1841_s1 + $0x88] sm:$0xff] (!%p150_p6)   ;;  %v1409_v11 = vld [vmem:[%s1841_s1 + $0x90] sm:$0xff] (!%p150_p6)  }
   0xe   : > { %1257 = vmatpush3.bf16.msra.mxu1 (!%p150_p6), %v1401_v3  ;;  %1206 = vmatprep.subr.bf16.mxu0 (!%p150_p6), %v1402_v4  ;;  %v1410_v12 = vld [vmem:[%s1841_s1 + $0x58] sm:$0xff] (!%p150_p6)   ;;  %v1414_v16 = vld [vmem:[%s1841_s1 + $0x60] sm:$0xff] (!%p150_p6)   ;;  %v1418_v20 = vld [vmem:[%s1841_s1 + $0x68] sm:$0xff] (!%p150_p6)   ;;  %s1745_s12 = scalar_lea.vmem (!%p150_p6), [#allocation2], %s1308_s6  }
   0xf   : > { %1258 = vmatprep.subr.bf16.mxu1 (!%p150_p6), %v1403_v5  ;;  %v1411_v13 = vld [vmem:[%s1841_s1 + $0xd8] sm:$0xff] (!%p150_p6)   ;;  %v1415_v17 = vld [vmem:[%s1841_s1 + $0xe0] sm:$0xff] (!%p150_p6)   ;;  %v1419_v21 = vld [vmem:[%s1841_s1 + $0xe8] sm:$0xff] (!%p150_p6)  }
  0x10   : > { %v1412_v14 = vld [vmem:[%s1841_s1 + $0x18] sm:$0xff] (!%p150_p6)   ;;  %v1416_v18 = vld [vmem:[%s1841_s1 + $0x20] sm:$0xff] (!%p150_p6)   ;;  %v1420_v22 = vld [vmem:[%s1841_s1 + $0x28] sm:$0xff] (!%p150_p6)  }
  0x11   : > { %1207 = vmatpush3.bf16.msra.mxu0 (!%p150_p6), %v1404_v6  ;;  %v1413_v15 = vld [vmem:[%s1841_s1 + $0x98] sm:$0xff] (!%p150_p6)   ;;  %v1417_v19 = vld [vmem:[%s1841_s1 + $0xa0] sm:$0xff] (!%p150_p6)   ;;  %v1421_v23 = vld [vmem:[%s1841_s1 + $0xa8] sm:$0xff] (!%p150_p6)  }
  0x12   : > { %1259 = vmatpush3.bf16.msra.mxu1 %v1405_v7  ;;  %1208 = vmatprep.subr.bf16.mxu0 %v1406_v8  ;;  %s185_s26 = scalar_select %p184_p7, %s1653_s30, 20  ;;  %v1422_v24 = vld [vmem:[%s1841_s1 + $0x70] sm:$0xff]   ;;  %v1426_v28 = vld [vmem:[%s1841_s1 + $0x78] sm:$0xff]   ;;  %v1740_v58 = vld [vmem:[%s1842_s2] ss:$0 sm:$0xff] }
  0x13   : > { %1260 = vmatprep.subr.bf16.mxu1 %v1407_v9  ;;  %v1423_v25 = vld [vmem:[%s1841_s1 + $0xf0] sm:$0xff]   ;;  %v1427_v29 = vld [vmem:[%s1841_s1 + $0xf8] sm:$0xff]   ;;  %s851_s7 = ssub.s32 (%p1603_p4), 21, %s1653_s30  ;;  %s1203_s8 = smul.u32 (%p1603_p4), 48, %s1591_s15 }
  0x14   : > { %v1424_v26 = vld [vmem:[%s1841_s1 + $0x30] sm:$0xff]   ;;  %s1190_s9 = sshll.u32 %s185_s26, 4  ;;  %v1428_v30 = vld [vmem:[%s1841_s1 + $0x38] sm:$0xff]   ;;  %p852_p8 = scmp.lt.s32.totalorder (%p1603_p4), %s851_s7, 12 }
  0x15   : > { %1209 = vmatpush3.bf16.msra.mxu0 %v1408_v10  ;;  %v1425_v27 = vld [vmem:[%s1841_s1 + $0xb0] sm:$0xff]   ;;  %s1705_s24 = scalar_lea.vmem %s1840_s0, %s1190_s9  ;;  %v1429_v31 = vld [vmem:[%s1841_s1 + $0xb8] sm:$0xff]   ;;  %s1788_s11 = scalar_lea.vmem (%p1603_p4), %s1843_s3, %s1203_s8  }
  0x16   : > { %1261 = vmatpush3.bf16.msra.mxu1 %v1409_v11  ;;  %1210 = vmatprep.subr.bf16.mxu0 %v1410_v12  ;;  %v1430_v32 = vld [vmem:[%s1705_s24] ss:$16 sps:$4 sm:$0xff]   ;;  %v1432_v33 = vld [vmem:[%s1705_s24 + $0x4] ss:$16 sps:$4 sm:$0xff]   ;;  %v1433_v34 = vld [vmem:[%s1705_s24 + $0x8] ss:$16 sps:$4 sm:$0xff]  }
  0x17   : > { %1262 = vmatprep.subr.bf16.mxu1 %v1411_v13  ;;  %v1435_v35 = vld [vmem:[%s1705_s24 + $0xc] ss:$16 sps:$4 sm:$0xff]   ;;  %640 = vmatprep.mubr.bf16.mxu0 %v1432_v33  ;;  %v1436_v36 = vld [vmem:[%s1705_s24 + $0x24] ss:$16 sps:$4 sm:$0xff]   ;;  %v1440_v38 = vld [vmem:[%s1705_s24 + $0x20] ss:$16 sps:$4 sm:$0xff]  }
  0x18   : > { %721 = vmatprep.mubr.bf16.mxu1 %v1435_v35  ;;  %v1438_v37 = vld [vmem:[%s1705_s24 + $0x2c] ss:$16 sps:$4 sm:$0xff]   ;;  %v1441_v39 = vld [vmem:[%s1705_s24 + $0x28] ss:$16 sps:$4 sm:$0xff]   ;;  %v1442_v40 = vld [vmem:[%s1705_s24 + $0x44] ss:$16 sps:$4 sm:$0xff]  }
  0x19   : > { %1211 = vmatpush3.bf16.msra.mxu0 %v1412_v14  ;;  %v1444_v41 = vld [vmem:[%s1705_s24 + $0x4c] ss:$16 sps:$4 sm:$0xff]   ;;  %v1446_v42 = vld [vmem:[%s1705_s24 + $0x40] ss:$16 sps:$4 sm:$0xff]   ;;  %v1447_v43 = vld [vmem:[%s1705_s24 + $0x48] ss:$16 sps:$4 sm:$0xff]  }
  0x1a   : > { %1263 = vmatpush3.bf16.msra.mxu1 %v1413_v15  ;;  %1212 = vmatprep.subr.bf16.mxu0 %v1414_v16  ;;  %v1448_v44 = vld [vmem:[%s1705_s24 + $0x64] ss:$16 sps:$4 sm:$0xff]   ;;  %v1450_v45 = vld [vmem:[%s1705_s24 + $0x6c] ss:$16 sps:$4 sm:$0xff]   ;;  %v1452_v46 = vld [vmem:[%s1705_s24 + $0x60] ss:$16 sps:$4 sm:$0xff]  }
  0x1b   : > { %1264 = vmatprep.subr.bf16.mxu1 %v1415_v17  ;;  %v1453_v47 = vld [vmem:[%s1705_s24 + $0x68] ss:$16 sps:$4 sm:$0xff]   ;;  %v1454_v48 = vld [vmem:[%s1705_s24 + $0x84] ss:$16 sps:$4 sm:$0xff]   ;;  %v1456_v49 = vld [vmem:[%s1705_s24 + $0x8c] ss:$16 sps:$4 sm:$0xff]  }
  0x1c   : > { %v1458_v50 = vld [vmem:[%s1705_s24 + $0x80] ss:$16 sps:$4 sm:$0xff]   ;;  %v1459_v51 = vld [vmem:[%s1705_s24 + $0x88] ss:$16 sps:$4 sm:$0xff]   ;;  %v1460_v52 = vld [vmem:[%s1705_s24 + $0xa4] ss:$16 sps:$4 sm:$0xff]  }
  0x1d   : > { %1213 = vmatpush3.bf16.msra.mxu0 %v1416_v18  ;;  %v1462_v53 = vld [vmem:[%s1705_s24 + $0xac] ss:$16 sps:$4 sm:$0xff]   ;;  %v1464_v54 = vld [vmem:[%s1705_s24 + $0xa0] ss:$16 sps:$4 sm:$0xff]   ;;  %v1465_v55 = vld [vmem:[%s1705_s24 + $0xa8] ss:$16 sps:$4 sm:$0xff]  }
  0x1e   : > { %1265 = vmatpush3.bf16.msra.mxu1 %v1417_v19  ;;  %1214 = vmatprep.subr.bf16.mxu0 %v1418_v20 }
  0x1f   : > { %1266 = vmatprep.subr.bf16.mxu1 %v1419_v21 }
  0x21   : > { %1215 = vmatpush3.bf16.msra.mxu0 %v1420_v22 }
  0x22   : > { %1267 = vmatpush3.bf16.msra.mxu1 %v1421_v23  ;;  %1216 = vmatprep.subr.bf16.mxu0 %v1422_v24 }
  0x23   : > { %1268 = vmatprep.subr.bf16.mxu1 %v1423_v25 }
  0x25   : > { %1217 = vmatpush3.bf16.msra.mxu0 %v1424_v26 }
  0x26   : > { %1269 = vmatpush3.bf16.msra.mxu1 %v1425_v27  ;;  %1218 = vmatprep.subr.bf16.mxu0 %v1426_v28 }
  0x27   : > { %1270 = vmatprep.subr.bf16.mxu1 %v1427_v29 }
  0x29   : > { %1219 = vmatpush3.bf16.msra.mxu0 %v1428_v30 }
  0x2a   : > { %1271 = vmatpush3.bf16.msra.mxu1 %v1429_v31 }
  0x2c   : > { %641 = vmatmul.mubr.bf16.vlgmr.msra.gmra.mrb[0].mxu0 %v1430_v32 }
  0x2d   : > { %722 = vmatmul.mubr.bf16.vlgmr.msra.gmra.mrb[0].mxu1 %v1433_v34  ;;  %648 = vmatprep.mubr.bf16.mxu0 %v1436_v36 }
  0x2e   : > { %729 = vmatprep.mubr.bf16.mxu1 %v1438_v37 }
  0x34   : > { %649 = vmatmul.mubr.bf16.gmra.mrb[4].mxu0 %v1440_v38 }
  0x35   : > { %730 = vmatmul.mubr.bf16.gmra.mrb[4].mxu1 %v1441_v39  ;;  %656 = vmatprep.mubr.bf16.mxu0 %v1442_v40 }
  0x36   : > { %737 = vmatprep.mubr.bf16.mxu1 %v1444_v41 }
  0x3c   : > { %657 = vmatmul.mubr.bf16.gmra.mrb[8].mxu0 %v1446_v42 }
  0x3d   : > { %738 = vmatmul.mubr.bf16.gmra.mrb[8].mxu1 %v1447_v43  ;;  %664 = vmatprep.mubr.bf16.mxu0 %v1448_v44 }
  0x3e   : > { %745 = vmatprep.mubr.bf16.mxu1 %v1450_v45 }
  0x44   : > { %665 = vmatmul.mubr.bf16.gmra.mrb[12].mxu0 %v1452_v46 }
  0x45   : > { %746 = vmatmul.mubr.bf16.gmra.mrb[12].mxu1 %v1453_v47  ;;  %672 = vmatprep.mubr.bf16.mxu0 %v1454_v48 }
  0x46   : > { %753 = vmatprep.mubr.bf16.mxu1 %v1456_v49 }
  0x4c   : > { %673 = vmatmul.mubr.bf16.gmra.mrb[16].mxu0 %v1458_v50 }
  0x4d   : > { %754 = vmatmul.mubr.bf16.gmra.mrb[16].mxu1 %v1459_v51  ;;  %680 = vmatprep.mubr.bf16.mxu0 %v1460_v52 }
  0x4e   : > { %761 = vmatprep.mubr.bf16.mxu1 %v1462_v53 }
  0x54   : > { %681 = vmatmul.mubr.bf16.gmra.mrb[20].mxu0 %v1464_v54 }
  0x55   : > { %762 = vmatmul.mubr.bf16.gmra.mrb[20].mxu1 %v1465_v55 }
  0xff   : > { %v1220_v56 = vpop.f32.mrb[0].mxu0 }
 0x100   : > { %v1272_v57 = vpop.f32.mrb[0].mxu1  ;;  %v1221_v59 = vpop.f32.mrb[1].mxu0 }
 0x101   : > { %v1222_v60 = vadd.f32 %v1221_v59, %v1220_v56  ;;  %v1273_v61 = vpop.f32.mrb[1].mxu1  ;;  %v1223_v62 = vpop.f32.mrb[2].mxu0 }
 0x102   : > { %v1274_v63 = vadd.f32 %v1273_v61, %v1272_v57  ;;  %v1275_v0 = vpop.f32.mrb[2].mxu1  ;;  %v1224_v1 = vpop.f32.mrb[3].mxu0 }
 0x103   : > { %v643_v2 = vadd.f32 %v1222_v60, %v1740_v58  ;;  %v1225_v3 = vadd.f32 %v1224_v1, %v1223_v62  ;;  %v1276_v4 = vpop.f32.mrb[3].mxu1 }
 0x104   : > { %v1277_v5 = vadd.f32 %v1276_v4, %v1275_v0 }
 0x105   : > { %v724_v6 = vadd.f32 %v1274_v63, %v643_v2  ;;  %v646_v7 = vadd.f32 %v1225_v3, %v1740_v58 }
 0x107   : > { %v770_v8 = vmax.f32 %v724_v6, 0.0  ;;  %v727_v9 = vadd.f32 %v1277_v5, %v646_v7  ;;  %v1226_v10 = vpop.f32.mrb[4].mxu0 }
 0x108   : > { %v1278_v11 = vpop.f32.mrb[4].mxu1  ;;  %v1227_v12 = vpop.f32.mrb[5].mxu0 }
 0x109   : > { %v1191_v13 = vpack.c.bf16 %v770_v8, %v770_v8  ;;  %v771_v14 = vmax.f32 %v727_v9, 0.0  ;;  %v1228_v15 = vadd.f32 %v1227_v12, %v1226_v10  ;;  %v1279_v16 = vpop.f32.mrb[5].mxu1  ;;  %v1229_v17 = vpop.f32.mrb[6].mxu0 }
 0x10a   : > { %v1280_v18 = vadd.f32 %v1279_v16, %v1278_v11  ;;  %v1281_v19 = vpop.f32.mrb[6].mxu1  ;;  %v1230_v20 = vpop.f32.mrb[7].mxu0 }
 0x10b   : > { %831 = vst.msk [vmem:[%s1745_s12] sm:$0xf] %vm830_vm0, %v1191_v13  ;;  %v1192_v21 = vpack.c.bf16 %v771_v14, %v771_v14  ;;  %v651_v22 = vadd.f32 %v1228_v15, %v1740_v58  ;;  %v1231_v23 = vadd.f32 %v1230_v20, %v1229_v17  ;;  %v1282_v24 = vpop.f32.mrb[7].mxu1 }
 0x10c   : > { %v1283_v25 = vadd.f32 %v1282_v24, %v1281_v19 }
 0x10d   : > { %832 = vst.msk [vmem:[%s1745_s12 + $0x4] sm:$0xf] %vm830_vm0, %v1192_v21  ;;  %v732_v26 = vadd.f32 %v1280_v18, %v651_v22  ;;  %v654_v27 = vadd.f32 %v1231_v23, %v1740_v58 }
 0x10f   : > { %v772_v28 = vmax.f32 %v732_v26, 0.0  ;;  %v735_v29 = vadd.f32 %v1283_v25, %v654_v27  ;;  %v1232_v30 = vpop.f32.mrb[8].mxu0 }
 0x110   : > { %v1284_v31 = vpop.f32.mrb[8].mxu1  ;;  %v1233_v32 = vpop.f32.mrb[9].mxu0 }
 0x111   : > { %v1193_v33 = vpack.c.bf16 %v772_v28, %v772_v28  ;;  %v773_v34 = vmax.f32 %v735_v29, 0.0  ;;  %v1234_v35 = vadd.f32 %v1233_v32, %v1232_v30  ;;  %v1285_v36 = vpop.f32.mrb[9].mxu1  ;;  %v1235_v37 = vpop.f32.mrb[10].mxu0 }
 0x112   : > { %v1286_v38 = vadd.f32 %v1285_v36, %v1284_v31  ;;  %v1287_v39 = vpop.f32.mrb[10].mxu1  ;;  %v1236_v40 = vpop.f32.mrb[11].mxu0 }
 0x113   : > { %833 = vst.msk [vmem:[%s1745_s12 + $0x8] sm:$0xf] %vm830_vm0, %v1193_v33  ;;  %v1194_v41 = vpack.c.bf16 %v773_v34, %v773_v34  ;;  %v659_v42 = vadd.f32 %v1234_v35, %v1740_v58  ;;  %v1237_v43 = vadd.f32 %v1236_v40, %v1235_v37  ;;  %v1288_v44 = vpop.f32.mrb[11].mxu1 }
 0x114   : > { %v1289_v45 = vadd.f32 %v1288_v44, %v1287_v39 }
 0x115   : > { %834 = vst.msk [vmem:[%s1745_s12 + $0xc] sm:$0xf] %vm830_vm0, %v1194_v41  ;;  %v740_v46 = vadd.f32 %v1286_v38, %v659_v42  ;;  %v662_v47 = vadd.f32 %v1237_v43, %v1740_v58 }
 0x117   : > { %v774_v48 = vmax.f32 %v740_v46, 0.0  ;;  %v743_v49 = vadd.f32 %v1289_v45, %v662_v47  ;;  %v1238_v50 = vpop.f32.mrb[12].mxu0 }
 0x118   : > { %v1290_v51 = vpop.f32.mrb[12].mxu1  ;;  %v1239_v52 = vpop.f32.mrb[13].mxu0 }
 0x119   : > { %v1195_v53 = vpack.c.bf16 %v774_v48, %v774_v48  ;;  %v775_v54 = vmax.f32 %v743_v49, 0.0  ;;  %v1240_v55 = vadd.f32 %v1239_v52, %v1238_v50  ;;  %v1291_v56 = vpop.f32.mrb[13].mxu1  ;;  %v1241_v57 = vpop.f32.mrb[14].mxu0 }
 0x11a   : > { %v1292_v59 = vadd.f32 %v1291_v56, %v1290_v51  ;;  %v1293_v60 = vpop.f32.mrb[14].mxu1  ;;  %v1242_v61 = vpop.f32.mrb[15].mxu0 }
 0x11b   : > { %835 = vst.msk [vmem:[%s1745_s12 + $0x10] sm:$0xf] %vm830_vm0, %v1195_v53  ;;  %v1196_v62 = vpack.c.bf16 %v775_v54, %v775_v54  ;;  %v667_v63 = vadd.f32 %v1240_v55, %v1740_v58  ;;  %v1243_v0 = vadd.f32 %v1242_v61, %v1241_v57  ;;  %v1294_v1 = vpop.f32.mrb[15].mxu1 }
 0x11c   : > { %v1295_v2 = vadd.f32 %v1294_v1, %v1293_v60 }
 0x11d   : > { %836 = vst.msk [vmem:[%s1745_s12 + $0x14] sm:$0xf] %vm830_vm0, %v1196_v62  ;;  %v748_v3 = vadd.f32 %v1292_v59, %v667_v63  ;;  %v670_v4 = vadd.f32 %v1243_v0, %v1740_v58 }
 0x11f   : > { %v776_v5 = vmax.f32 %v748_v3, 0.0  ;;  %v751_v6 = vadd.f32 %v1295_v2, %v670_v4  ;;  %v1244_v7 = vpop.f32.mrb[16].mxu0 }
 0x120   : > { %v1296_v8 = vpop.f32.mrb[16].mxu1  ;;  %v1245_v9 = vpop.f32.mrb[17].mxu0 }
 0x121   : > { %v1197_v10 = vpack.c.bf16 %v776_v5, %v776_v5  ;;  %v777_v11 = vmax.f32 %v751_v6, 0.0  ;;  %v1246_v12 = vadd.f32 %v1245_v9, %v1244_v7  ;;  %v1297_v13 = vpop.f32.mrb[17].mxu1  ;;  %v1247_v14 = vpop.f32.mrb[18].mxu0 }
 0x122   : > { %v1298_v15 = vadd.f32 %v1297_v13, %v1296_v8  ;;  %v1299_v16 = vpop.f32.mrb[18].mxu1  ;;  %v1248_v17 = vpop.f32.mrb[19].mxu0 }
 0x123   : > { %837 = vst.msk [vmem:[%s1745_s12 + $0x18] sm:$0xf] %vm830_vm0, %v1197_v10  ;;  %v1198_v18 = vpack.c.bf16 %v777_v11, %v777_v11  ;;  %v675_v19 = vadd.f32 %v1246_v12, %v1740_v58  ;;  %v1249_v20 = vadd.f32 %v1248_v17, %v1247_v14  ;;  %v1300_v21 = vpop.f32.mrb[19].mxu1 }
 0x124   : > { %v1301_v22 = vadd.f32 %v1300_v21, %v1299_v16 }
 0x125   : > { %838 = vst.msk [vmem:[%s1745_s12 + $0x1c] sm:$0xf] %vm830_vm0, %v1198_v18  ;;  %v756_v23 = vadd.f32 %v1298_v15, %v675_v19  ;;  %v678_v24 = vadd.f32 %v1249_v20, %v1740_v58 }
 0x127   : > { %v778_v25 = vmax.f32 %v756_v23, 0.0  ;;  %v759_v26 = vadd.f32 %v1301_v22, %v678_v24  ;;  %v1250_v27 = vpop.f32.mrb[20].mxu0 }
 0x128   : > { %v1302_v28 = vpop.f32.mrb[20].mxu1  ;;  %v1251_v29 = vpop.f32.mrb[21].mxu0 }
 0x129   : > { %v1199_v30 = vpack.c.bf16 %v778_v25, %v778_v25  ;;  %v779_v31 = vmax.f32 %v759_v26, 0.0  ;;  %v1252_v32 = vadd.f32 %v1251_v29, %v1250_v27  ;;  %v1303_v33 = vpop.f32.mrb[21].mxu1  ;;  %v1253_v34 = vpop.f32.mrb[22].mxu0 }
 0x12a   : > { %v1304_v35 = vadd.f32 %v1303_v33, %v1302_v28  ;;  %v1305_v36 = vpop.f32.mrb[22].mxu1  ;;  %v1254_v37 = vpop.f32.mrb[23].mxu0 }
 0x12b   : > { %839 = vst.msk [vmem:[%s1745_s12 + $0x20] sm:$0xf] %vm830_vm0, %v1199_v30  ;;  %v1200_v38 = vpack.c.bf16 %v779_v31, %v779_v31  ;;  %v683_v39 = vadd.f32 %v1252_v32, %v1740_v58  ;;  %v1255_v40 = vadd.f32 %v1254_v37, %v1253_v34  ;;  %v1306_v41 = vpop.f32.mrb[23].mxu1 }
 0x12c   : > { %v1307_v42 = vadd.f32 %v1306_v41, %v1305_v36 }
 0x12d   : > { %840 = vst.msk [vmem:[%s1745_s12 + $0x24] sm:$0xf] %vm830_vm0, %v1200_v38  ;;  %v764_v43 = vadd.f32 %v1304_v35, %v683_v39  ;;  %v686_v44 = vadd.f32 %v1255_v40, %v1740_v58 }
 0x12f   : > { %v780_v45 = vmax.f32 %v764_v43, 0.0  ;;  %v767_v46 = vadd.f32 %v1307_v42, %v686_v44  ;;  %849 = sbr.rel (!%p1603_p4) target bundleno = 379 (0x17b), region = 36 }
 0x131   : > { %v1201_v47 = vpack.c.bf16 %v780_v45, %v780_v45  ;;  %v781_v48 = vmax.f32 %v767_v46, 0.0 }
 0x133   : > { %841 = vst.msk [vmem:[%s1745_s12 + $0x28] sm:$0xf] %vm830_vm0, %v1201_v47  ;;  %v1202_v49 = vpack.c.bf16 %v781_v48, %v781_v48 }
 0x135   : > { %842 = vst.msk [vmem:[%s1745_s12 + $0x2c] sm:$0xf] %vm830_vm0, %v1202_v49 }
 0x136   : > { %s1852_s7 = smov (!%p852_p8, %s851_s7), 12 }
 0x137   : > { %s1178_s14 = sshll.u32 %s1852_s7, 6 }
 0x138   : > { %p1181_p9 = scmp.eq.s32.totalorder %s1178_s14, 0 }
 0x139   : > { %1466 = sdivrem.u32 (!%p1181_p9), %s1852_s7, 12 }
 0x13a   : > { %860 = sbr.rel (%p1181_p9) target bundleno = 379 (0x17b), region = 40 }
 0x142   : > { %s1794_s20 = spop.drf %1466 }
 0x143   : > { %p1182_p10 = scmp.le.s32.totalorder %s1794_s20, 0 }
 0x144   : > { %s1845_s15 = smov (!%p1182_p10), %s1788_s11  ;;  %s1846_s30 = smov (!%p1182_p10), %s1745_s12 }
 0x145   : > { %1059 = sbr.rel (%p1182_p10) target bundleno = 350 (0x15e), region = 112  ;;  %s1803_s17 = smov (!%p1182_p10), 0  }
 0x146   : > { %s1805_s18 = smov (!%p1182_p10), 0  }
 0x14c LB: >> { %v877_v58 = vld [vmem:[%s1532_s30] sm:$0xf]  ;;  %v879_v50 = vld [vmem:[%s1532_s30 + $0x4] sm:$0xf]  ;;  %v881_v51 = vld [vmem:[%s1532_s30 + $0x8] sm:$0xf]  ;;  %s1540_s18 = sphi %s1805_s18, %s871_s18   ;;  %s1536_s17 = sphi %s1803_s17, %s1847_s17   ;;  %s1532_s30 = sphi %s1846_s30, %s906_s30   ;;  %s1528_s15 = sphi %s1845_s15, %s907_s15  }
 0x14d   : >> { %878 = vst [vmem:[%s1528_s15] sm:$0xf] %v877_v58  ;;  %880 = vst [vmem:[%s1528_s15 + $0x4] sm:$0xf] %v879_v50  ;;  %v883_v52 = vld [vmem:[%s1532_s30 + $0xc] sm:$0xf]  ;;  %s901_s21 = sadd.s32 1, %s1536_s17 }
 0x14e   : >> { %882 = vst [vmem:[%s1528_s15 + $0x8] sm:$0xf] %v881_v51  ;;  %v885_v53 = vld [vmem:[%s1532_s30 + $0x10] sm:$0xf]  ;;  %v887_v54 = vld [vmem:[%s1532_s30 + $0x14] sm:$0xf]  ;;  %p902_p11 = scmp.ge.s32.totalorder %s901_s21, %s1794_s20 }
 0x14f   : >> { %884 = vst [vmem:[%s1528_s15 + $0xc] sm:$0xf] %v883_v52  ;;  %886 = vst [vmem:[%s1528_s15 + $0x10] sm:$0xf] %v885_v53  ;;  %v889_v55 = vld [vmem:[%s1532_s30 + $0x18] sm:$0xf] }
 0x150   : >> { %888 = vst [vmem:[%s1528_s15 + $0x14] sm:$0xf] %v887_v54  ;;  %v891_v56 = vld [vmem:[%s1532_s30 + $0x1c] sm:$0xf]  ;;  %v893_v57 = vld [vmem:[%s1532_s30 + $0x20] sm:$0xf] }
 0x151   : >> { %890 = vst [vmem:[%s1528_s15 + $0x18] sm:$0xf] %v889_v55  ;;  %892 = vst [vmem:[%s1528_s15 + $0x1c] sm:$0xf] %v891_v56  ;;  %v895_v59 = vld [vmem:[%s1532_s30 + $0x24] sm:$0xf] }
 0x152   : >> { %894 = vst [vmem:[%s1528_s15 + $0x20] sm:$0xf] %v893_v57  ;;  %v897_v60 = vld [vmem:[%s1532_s30 + $0x28] sm:$0xf]  ;;  %v899_v61 = vld [vmem:[%s1532_s30 + $0x2c] sm:$0xf] }
 0x153   : >> { %896 = vst [vmem:[%s1528_s15 + $0x24] sm:$0xf] %v895_v59  ;;  %898 = vst [vmem:[%s1528_s15 + $0x28] sm:$0xf] %v897_v60  ;;  %s1854_s21 = smov (%p902_p11, %s901_s21), 0  ;;  %s871_s18 = sadd.s32 1, %s1540_s18  }
 0x154   : >> { %900 = vst [vmem:[%s1528_s15 + $0x2c] sm:$0xf] %v899_v61  ;;  %s904_s22 = smul.u32 48, %s1854_s21  ;;  %p870_p12 = scmp.ge.s32.totalorder %s871_s18, %s1794_s20 }
 0x155   : >> { %s1847_s17 = smov %s1854_s21 }
 0x156   : >> { %s906_s30 = scalar_lea.vmem %s1745_s12, %s904_s22 [#allocation2]   ;;  %s907_s15 = scalar_lea.vmem %s1788_s11, %s904_s22  }
 0x157   : > { %873 = sbr.rel (!%p870_p12) target bundleno = 332 (0x14c), region = 118 }
 0x15e PF: > { %1468 = sdivrem.u32 %s1852_s7, 12 }
 0x15f   : > { %s1183_s23 = smul.u32 48, %s1794_s20 }
 0x161   : > { %s912_s24 = scalar_lea.vmem %s1745_s12, %s1183_s23 [#allocation2]   ;;  %s914_s25 = scalar_lea.vmem %s1788_s11, %s1183_s23  }
 0x167   : > { %s1469_s26 = spop.drf %1468 }
 0x168   : > { %p1185_p13 = scmp.le.s32.totalorder %s1469_s26, 0 }
 0x169   : > { %s1542_s27 = smov (!%p1185_p13), %s914_s25   ;;  %s1546_s28 = smov (!%p1185_p13), %s912_s24  }
 0x16a   : > { %1073 = sbr.rel (%p1185_p13) target bundleno = 379 (0x17b), region = 123  ;;  %s1550_s29 = smov (!%p1185_p13), 0  }
 0x16b   : > { %s1554_s4 = smov (!%p1185_p13), 0  }
 0x171 LB: >> { %v924_v62 = vld [vmem:[%s1548_s28] sm:$0xf]  ;;  %s926_s5 = sadd.s32 1, %s1552_s29  ;;  %s918_s4 = sadd.s32 1, %s1556_s4   ;;  %s1556_s4 = sphi %s1554_s4, %s918_s4   ;;  %s1552_s29 = sphi %s1550_s29, %s1551_s29   ;;  %s1548_s28 = sphi %s1546_s28, %s931_s28   ;;  %s1544_s27 = sphi %s1542_s27, %s932_s27  }
 0x172   : >> { %925 = vst [vmem:[%s1544_s27] sm:$0xf] %v924_v62  ;;  %p927_p0 = scmp.ge.s32.totalorder %s926_s5, %s1469_s26  ;;  %p917_p1 = scmp.ge.s32.totalorder %s918_s4, %s1469_s26 }
 0x174   : >> { %s1856_s5 = smov (%p927_p0, %s926_s5), 0  ;;  %920 = sbr.rel (!%p917_p1) target bundleno = 369 (0x171), region = 129 }
 0x175   : >> { %s1186_s6 = sshll.u32 %s1856_s5, 2  ;;  %s1551_s29 = smov %s1856_s5  }
 0x176   : >> { %s931_s28 = scalar_lea.vmem %s912_s24, %s1186_s6 [#allocation2]   ;;  %s932_s27 = scalar_lea.vmem %s914_s25, %s1186_s6  }
 0x17b PF: > { %p10_p2 = scmp.ge.s32.totalorder %s1593_s16, 4   ;;  %s1848_s12 = smov %s1520_s13 }
 0x17c   : > { %s1849_s13 = smov %s1601_s19  ;;  %s1850_s14 = smov %s1593_s16 }
 0x17d   :  { %12 = sbr.rel (!%p10_p2) target bundleno = 2 (0x2), region = 140 }

// kernel: dueling_dqn_forward.6
= control target key start
LH: loop header
LB: loop body
LE: loop exit
PB: predicated region body
PF: predicated region fallthrough
CT: control target
= control target key end

     0   :  { %s1596_s12 = smov 0   ;;  %s1598_s13 = smov 0   ;;  %s1849_s0 = inlined_call_operand.vmem [shape: bf16[98,576], index: 0, kind: input, shape index: {}]   ;;  %s1850_s1 = inlined_call_operand.vmem [shape: bf16[576,64], index: 1, kind: input, shape index: {}]   ;;  %s1851_s2 = inlined_call_operand.vmem [shape: f32[1,64], index: 2, kind: input, shape index: {}]   ;;  %s1852_s3 = inlined_call_operand.vmem [shape: bf16[98,64], index: 3, kind: output, shape index: {}]  }
   0x1   :  { %s1600_s14 = smov 0  }
   0x2 LB: > { %s1609_s15 = sadd.s32 4294967295, %s1542_s14   ;;  %s1611_s16 = sadd.s32 1, %s1542_s14   ;;  %s1542_s14 = sphi %s1600_s14, %s1859_s14   ;;  %s1538_s13 = sphi %s1598_s13, %s1858_s13   ;;  %s1534_s12 = sphi %s1596_s12, %s1857_s12  }
   0x3   : > { %s85_s17 = ssub.s32 %s1542_s14, %s1611_s16  ;;  %s88_s18 = sadd.s32 1, %s1538_s13 }
   0x4   : > { %p86_p0 = scmp.eq.s32.totalorder %s85_s17, 0  ;;  %p98_p1 = scmp.ne.s32.totalorder %s1538_s13, %s1534_s12 }
   0x5   : > { %p99_p2 = scmp.eq.s32.totalorder %s1609_s15, 1  ;;  %p1122_p3 = scmp.ge.s32.totalorder %s1542_s14, 1 }
   0x6   : > { %s1619_s19 = scalar_select %p86_p0, %s1538_s13, %s88_s18  }
   0x7   : > { %p1621_p4 = por %p99_p2, %p98_p1  ;;  %p149_p5 = scmp.lt.s32.totalorder %s1542_s14, 3 }
   0x9   : > { %p150_p6 = pnand %p1122_p3, %p149_p5 }
   0xa   : > { %v1424_v0 = vld [vmem:[%s1850_s1 + $0x40] sm:$0xff] (!%p150_p6)   ;;  %v1428_v4 = vld [vmem:[%s1850_s1 + $0x48] sm:$0xff] (!%p150_p6)   ;;  %v1432_v8 = vld [vmem:[%s1850_s1 + $0x50] sm:$0xff] (!%p150_p6)   ;;  %s1671_s30 = sshll.u32 (!%p150_p6), %s1609_s15, 3  ;;  %vm620_vm0 = vcmask (!%p150_p6), 523264   ;;  %s175_s17 = sand.u32 (!%p150_p6), 1, %s1534_s12  }
   0xb   : > { %153 = sbr.rel (%p150_p6) target bundleno = 353 (0x161), region = 32  ;;  %v1425_v1 = vld [vmem:[%s1850_s1 + $0xc0] sm:$0xff] (!%p150_p6)   ;;  %1223 = vmatprep.subr.bf16.mxu0 (!%p150_p6), %v1424_v0  ;;  %v1429_v5 = vld [vmem:[%s1850_s1 + $0xc8] sm:$0xff] (!%p150_p6)   ;;  %v1433_v9 = vld [vmem:[%s1850_s1 + $0xd0] sm:$0xff] (!%p150_p6)   ;;  %p184_p7 = scmp.lt.s32.totalorder (!%p150_p6), %s1671_s30, 12  ;;  %vm868_vm1 = vcmask (!%p150_p6), 519168  }
   0xc   : > { %v1426_v2 = vld [vmem:[%s1850_s1] sm:$0xff] (!%p150_p6)   ;;  %1263 = vmatprep.subr.bf16.mxu1 (!%p150_p6), %v1425_v1  ;;  %v1430_v6 = vld [vmem:[%s1850_s1 + $0x8] sm:$0xff] (!%p150_p6)   ;;  %v1434_v10 = vld [vmem:[%s1850_s1 + $0x10] sm:$0xff] (!%p150_p6)   ;;  %s1123_s18 = sshll.u32 (!%p150_p6), %s175_s17, 5 }
   0xd   : > { %v1427_v3 = vld [vmem:[%s1850_s1 + $0x80] sm:$0xff] (!%p150_p6)   ;;  %1224 = vmatpush3.bf16.msra.mxu0 (!%p150_p6), %v1426_v2  ;;  %v1431_v7 = vld [vmem:[%s1850_s1 + $0x88] sm:$0xff] (!%p150_p6)   ;;  %v1435_v11 = vld [vmem:[%s1850_s1 + $0x90] sm:$0xff] (!%p150_p6)   ;;  %s1770_s12 = scalar_lea.vmem (!%p150_p6), [#allocation2], %s1123_s18  }
   0xe   : > { %1264 = vmatpush3.bf16.msra.mxu1 (!%p150_p6), %v1427_v3  ;;  %1225 = vmatprep.subr.bf16.mxu0 (!%p150_p6), %v1428_v4  ;;  %v1436_v12 = vld [vmem:[%s1850_s1 + $0x58] sm:$0xff] (!%p150_p6)   ;;  %v1440_v16 = vld [vmem:[%s1850_s1 + $0x60] sm:$0xff] (!%p150_p6)   ;;  %v1444_v20 = vld [vmem:[%s1850_s1 + $0x68] sm:$0xff] (!%p150_p6)  }
   0xf   : > { %1265 = vmatprep.subr.bf16.mxu1 (!%p150_p6), %v1429_v5  ;;  %v1437_v13 = vld [vmem:[%s1850_s1 + $0xd8] sm:$0xff] (!%p150_p6)   ;;  %v1441_v17 = vld [vmem:[%s1850_s1 + $0xe0] sm:$0xff] (!%p150_p6)   ;;  %v1445_v21 = vld [vmem:[%s1850_s1 + $0xe8] sm:$0xff] (!%p150_p6)  }
  0x10   : > { %v1438_v14 = vld [vmem:[%s1850_s1 + $0x18] sm:$0xff] (!%p150_p6)   ;;  %v1442_v18 = vld [vmem:[%s1850_s1 + $0x20] sm:$0xff] (!%p150_p6)   ;;  %v1446_v22 = vld [vmem:[%s1850_s1 + $0x28] sm:$0xff] (!%p150_p6)  }
  0x11   : > { %1226 = vmatpush3.bf16.msra.mxu0 (!%p150_p6), %v1430_v6  ;;  %v1439_v15 = vld [vmem:[%s1850_s1 + $0x98] sm:$0xff] (!%p150_p6)   ;;  %v1443_v19 = vld [vmem:[%s1850_s1 + $0xa0] sm:$0xff] (!%p150_p6)   ;;  %v1447_v23 = vld [vmem:[%s1850_s1 + $0xa8] sm:$0xff] (!%p150_p6)  }
  0x12   : > { %1266 = vmatpush3.bf16.msra.mxu1 %v1431_v7  ;;  %1227 = vmatprep.subr.bf16.mxu0 %v1432_v8  ;;  %s185_s24 = scalar_select %p184_p7, %s1671_s30, 12  ;;  %v1448_v24 = vld [vmem:[%s1850_s1 + $0x70] sm:$0xff]   ;;  %v1452_v28 = vld [vmem:[%s1850_s1 + $0x78] sm:$0xff]   ;;  %v1462_v36 = vld [vmem:[%s1850_s1 + $0x100] sm:$0xff]  }
  0x13   : > { %1267 = vmatprep.subr.bf16.mxu1 %v1433_v9  ;;  %v1449_v25 = vld [vmem:[%s1850_s1 + $0xf0] sm:$0xff]   ;;  %v1453_v29 = vld [vmem:[%s1850_s1 + $0xf8] sm:$0xff]   ;;  %v1469_v39 = vld [vmem:[%s1850_s1 + $0x108] sm:$0xff]   ;;  %s885_s21 = ssub.s32 (%p1621_p4), 13, %s1671_s30  ;;  %s1220_s22 = sshll.u32 (%p1621_p4), %s1609_s15, 5 }
  0x14   : > { %s1335_s7 = smul.u32 20, %s185_s24  ;;  %v1450_v26 = vld [vmem:[%s1850_s1 + $0x30] sm:$0xff]   ;;  %v1454_v30 = vld [vmem:[%s1850_s1 + $0x38] sm:$0xff]   ;;  %v1126_v58 = vld [vmem:[%s1851_s2] ss:$0 sm:$0xff]  ;;  %p886_p8 = scmp.lt.s32.totalorder (%p1621_p4), %s885_s21, 8 }
  0x15   : > { %1228 = vmatpush3.bf16.msra.mxu0 %v1434_v10  ;;  %v1451_v27 = vld [vmem:[%s1850_s1 + $0xb0] sm:$0xff]   ;;  %v1455_v31 = vld [vmem:[%s1850_s1 + $0xb8] sm:$0xff]   ;;  %s1795_s25 = scalar_lea.vmem (%p1621_p4), %s1852_s3, %s1220_s22  }
  0x16   : > { %1268 = vmatpush3.bf16.msra.mxu1 %v1435_v11  ;;  %1229 = vmatprep.subr.bf16.mxu0 %v1436_v12  ;;  %s1723_s24 = scalar_lea.vmem %s1849_s0, %s1335_s7  ;;  %v1476_v44 = vld [vmem:[%s1850_s1 + $0x110] sm:$0xff]   ;;  %v1483_v45 = vld [vmem:[%s1850_s1 + $0x118] sm:$0xff]  }
  0x17   : > { %1269 = vmatprep.subr.bf16.mxu1 %v1437_v13  ;;  %v1456_v32 = vld [vmem:[%s1723_s24] ss:$20 sps:$4 sm:$0xff]   ;;  %v1458_v33 = vld [vmem:[%s1723_s24 + $0x4] ss:$20 sps:$4 sm:$0xff]   ;;  %v1459_v34 = vld [vmem:[%s1723_s24 + $0x8] ss:$20 sps:$4 sm:$0xff]  }
  0x18   : > { %v1461_v35 = vld [vmem:[%s1723_s24 + $0xc] ss:$20 sps:$4 sm:$0xff]   ;;  %665 = vmatprep.mubr.bf16.mxu0 %v1458_v33  ;;  %v1465_v38 = vld [vmem:[%s1723_s24 + $0x34] ss:$20 sps:$4 sm:$0xff]   ;;  %v1468_v41 = vld [vmem:[%s1723_s24 + $0x30] ss:$20 sps:$4 sm:$0xff]  }
  0x19   : > { %1230 = vmatpush3.bf16.msra.mxu0 %v1438_v14  ;;  %730 = vmatprep.mubr.bf16.mxu1 %v1461_v35  ;;  %v1463_v37 = vld [vmem:[%s1723_s24 + $0x2c] ss:$20 sps:$4 sm:$0xff]   ;;  %v1467_v40 = vld [vmem:[%s1723_s24 + $0x28] ss:$20 sps:$4 sm:$0xff]   ;;  %v1474_v46 = vld [vmem:[%s1723_s24 + $0x50] ss:$20 sps:$4 sm:$0xff]  }
  0x1a   : > { %1270 = vmatpush3.bf16.msra.mxu1 %v1439_v15  ;;  %1231 = vmatprep.subr.bf16.mxu0 %v1440_v16  ;;  %v1470_v42 = vld [vmem:[%s1723_s24 + $0x54] ss:$20 sps:$4 sm:$0xff]   ;;  %v1472_v43 = vld [vmem:[%s1723_s24 + $0x5c] ss:$20 sps:$4 sm:$0xff]   ;;  %v1475_v47 = vld [vmem:[%s1723_s24 + $0x58] ss:$20 sps:$4 sm:$0xff]  }
  0x1b   : > { %1271 = vmatprep.subr.bf16.mxu1 %v1441_v17  ;;  %v1477_v48 = vld [vmem:[%s1723_s24 + $0x7c] ss:$20 sps:$4 sm:$0xff]   ;;  %v1479_v49 = vld [vmem:[%s1723_s24 + $0x84] ss:$20 sps:$4 sm:$0xff]   ;;  %v1482_v51 = vld [vmem:[%s1723_s24 + $0x80] ss:$20 sps:$4 sm:$0xff]  }
  0x1c   : > { %v1481_v50 = vld [vmem:[%s1723_s24 + $0x78] ss:$20 sps:$4 sm:$0xff]   ;;  %v1484_v52 = vld [vmem:[%s1723_s24 + $0x10] ss:$20 sps:$4 sm:$0xff]   ;;  %v1485_v53 = vld [vmem:[%s1723_s24 + $0x60] ss:$20 sps:$4 sm:$0xff]  }
  0x1d   : > { %1232 = vmatpush3.bf16.msra.mxu0 %v1442_v18  ;;  %v1486_v54 = vld [vmem:[%s1723_s24 + $0x38] ss:$20 sps:$4 sm:$0xff]   ;;  %v1487_v55 = vld [vmem:[%s1723_s24 + $0x88] ss:$20 sps:$4 sm:$0xff]  }
  0x1e   : > { %1272 = vmatpush3.bf16.msra.mxu1 %v1443_v19  ;;  %1233 = vmatprep.subr.bf16.mxu0 %v1444_v20 }
  0x1f   : > { %1273 = vmatprep.subr.bf16.mxu1 %v1445_v21 }
  0x21   : > { %1234 = vmatpush3.bf16.msra.mxu0 %v1446_v22 }
  0x22   : > { %1274 = vmatpush3.bf16.msra.mxu1 %v1447_v23  ;;  %1235 = vmatprep.subr.bf16.mxu0 %v1448_v24 }
  0x23   : > { %1275 = vmatprep.subr.bf16.mxu1 %v1449_v25 }
  0x25   : > { %1236 = vmatpush3.bf16.msra.mxu0 %v1450_v26 }
  0x26   : > { %1276 = vmatpush3.bf16.msra.mxu1 %v1451_v27  ;;  %1237 = vmatprep.subr.bf16.mxu0 %v1452_v28 }
  0x27   : > { %1277 = vmatprep.subr.bf16.mxu1 %v1453_v29 }
  0x29   : > { %1238 = vmatpush3.bf16.msra.mxu0 %v1454_v30 }
  0x2a   : > { %1278 = vmatpush3.bf16.msra.mxu1 %v1455_v31  ;;  %1311 = vmatprep.subr.bf16.mxu0 %v1462_v36 }
  0x2b   : > { %1327 = vmatprep.subr.bf16.mxu1 %v1462_v36 }
  0x2c   : > { %666 = vmatmul.mubr.bf16.vlgmr.msra.gmra.mrb[0].mxu0 %v1456_v32 }
  0x2d   : > { %731 = vmatmul.mubr.bf16.vlgmr.msra.gmra.mrb[0].mxu1 %v1459_v34  ;;  %1312 = vmatpush3.bf16.msra.mxu0 %v1462_v36 }
  0x2e   : > { %1331 = vmatpush3.bf16.msra.mxu1 %v1462_v36  ;;  %673 = vmatprep.mubr.bf16.mxu0 %v1463_v37 }
  0x2f   : > { %738 = vmatprep.mubr.bf16.mxu1 %v1465_v38  ;;  %1313 = vmatprep.subr.bf16.mxu0 %v1469_v39 }
  0x30   : > { %1328 = vmatprep.subr.bf16.mxu1 %v1469_v39 }
  0x31   : > { %1314 = vmatpush3.bf16.msra.mxu0 %v1469_v39 }
  0x32   : > { %1332 = vmatpush3.bf16.msra.mxu1 %v1469_v39  ;;  %1315 = vmatprep.subr.bf16.mxu0 %v1476_v44 }
  0x33   : > { %1329 = vmatprep.subr.bf16.mxu1 %v1476_v44 }
  0x34   : > { %674 = vmatmul.mubr.bf16.gmra.mrb[4].mxu0 %v1467_v40 }
  0x35   : > { %739 = vmatmul.mubr.bf16.gmra.mrb[4].mxu1 %v1468_v41  ;;  %681 = vmatprep.mubr.bf16.mxu0 %v1470_v42 }
  0x36   : > { %746 = vmatprep.mubr.bf16.mxu1 %v1472_v43  ;;  %1316 = vmatpush3.bf16.msra.mxu0 %v1476_v44 }
  0x37   : > { %1333 = vmatpush3.bf16.msra.mxu1 %v1476_v44  ;;  %1317 = vmatprep.subr.bf16.mxu0 %v1483_v45 }
  0x38   : > { %1330 = vmatprep.subr.bf16.mxu1 %v1483_v45 }
  0x3a   : > { %1318 = vmatpush3.bf16.msra.mxu0 %v1483_v45 }
  0x3b   : > { %1334 = vmatpush3.bf16.msra.mxu1 %v1483_v45 }
  0x3c   : > { %682 = vmatmul.mubr.bf16.gmra.mrb[8].mxu0 %v1474_v46 }
  0x3d   : > { %747 = vmatmul.mubr.bf16.gmra.mrb[8].mxu1 %v1475_v47  ;;  %689 = vmatprep.mubr.bf16.mxu0 %v1477_v48 }
  0x3e   : > { %754 = vmatprep.mubr.bf16.mxu1 %v1479_v49 }
  0x44   : > { %690 = vmatmul.mubr.bf16.gmra.mrb[12].mxu0 %v1481_v50 }
  0x45   : > { %755 = vmatmul.mubr.bf16.gmra.mrb[12].mxu1 %v1482_v51  ;;  %1319 = vmatprep.mubr.msk.bf16.mxu0 %vm620_vm0, %v1484_v52 }
  0x46   : > { %1323 = vmatprep.mubr.msk.bf16.mxu1 %vm620_vm0, %v1485_v53 }
  0x4c   : > { %1320 = vmatmul.mubr.msk.bf16.vlgmr.msra.gmra.mrb[16].mxu0 %vm620_vm0, %v1486_v54 }
  0x4d   : > { %1324 = vmatmul.mubr.msk.bf16.vlgmr.msra.gmra.mrb[16].mxu1 %vm620_vm0, %v1487_v55 }
  0xff   : > { %v1239_v56 = vpop.f32.mrb[0].mxu0 }
 0x100   : > { %v1279_v57 = vpop.f32.mrb[0].mxu1  ;;  %v1240_v59 = vpop.f32.mrb[1].mxu0 }
 0x101   : > { %v1241_v60 = vadd.f32 %v1240_v59, %v1239_v56  ;;  %v1280_v61 = vpop.f32.mrb[1].mxu1  ;;  %v1242_v62 = vpop.f32.mrb[2].mxu0 }
 0x102   : > { %v1281_v63 = vadd.f32 %v1280_v61, %v1279_v57  ;;  %v1282_v0 = vpop.f32.mrb[2].mxu1  ;;  %v1243_v1 = vpop.f32.mrb[3].mxu0 }
 0x103   : > { %v668_v2 = vadd.f32 %v1241_v60, %v1126_v58  ;;  %v1244_v3 = vadd.f32 %v1243_v1, %v1242_v62  ;;  %v1283_v4 = vpop.f32.mrb[3].mxu1 }
 0x104   : > { %v1284_v5 = vadd.f32 %v1283_v4, %v1282_v0 }
 0x105   : > { %v671_v6 = vadd.f32 %v1244_v3, %v1126_v58  ;;  %v733_v7 = vadd.f32 %v1281_v63, %v668_v2 }
 0x107   : > { %v1245_v8 = vpop.f32.mrb[4].mxu0  ;;  %v1766_v9 = vadd.f32 %v1284_v5, %v671_v6 }
 0x108   : > { %v1285_v10 = vpop.f32.mrb[4].mxu1  ;;  %v1246_v11 = vpop.f32.mrb[5].mxu0 }
 0x109   : > { %v1247_v12 = vadd.f32 %v1246_v11, %v1245_v8  ;;  %v1286_v13 = vpop.f32.mrb[5].mxu1  ;;  %v1248_v14 = vpop.f32.mrb[6].mxu0 }
 0x10a   : > { %v1287_v15 = vadd.f32 %v1286_v13, %v1285_v10  ;;  %v1288_v16 = vpop.f32.mrb[6].mxu1  ;;  %v1249_v17 = vpop.f32.mrb[7].mxu0 }
 0x10b   : > { %v676_v18 = vadd.f32 %v1247_v12, %v1126_v58  ;;  %v1250_v19 = vadd.f32 %v1249_v17, %v1248_v14  ;;  %v1289_v20 = vpop.f32.mrb[7].mxu1 }
 0x10c   : > { %v1290_v21 = vadd.f32 %v1289_v20, %v1288_v16 }
 0x10d   : > { %v679_v22 = vadd.f32 %v1250_v19, %v1126_v58  ;;  %v741_v23 = vadd.f32 %v1287_v15, %v676_v18 }
 0x10f   : > { %v1251_v24 = vpop.f32.mrb[8].mxu0  ;;  %v744_v25 = vadd.f32 %v1290_v21, %v679_v22 }
 0x110   : > { %v1291_v26 = vpop.f32.mrb[8].mxu1  ;;  %v1252_v27 = vpop.f32.mrb[9].mxu0 }
 0x111   : > { %v1253_v28 = vadd.f32 %v1252_v27, %v1251_v24  ;;  %v1292_v29 = vpop.f32.mrb[9].mxu1  ;;  %v1254_v30 = vpop.f32.mrb[10].mxu0 }
 0x112   : > { %v1293_v31 = vadd.f32 %v1292_v29, %v1291_v26  ;;  %v1294_v32 = vpop.f32.mrb[10].mxu1  ;;  %v1255_v33 = vpop.f32.mrb[11].mxu0 }
 0x113   : > { %v684_v34 = vadd.f32 %v1253_v28, %v1126_v58  ;;  %v1256_v35 = vadd.f32 %v1255_v33, %v1254_v30  ;;  %v1295_v36 = vpop.f32.mrb[11].mxu1 }
 0x114   : > { %v1296_v37 = vadd.f32 %v1295_v36, %v1294_v32 }
 0x115   : > { %v687_v38 = vadd.f32 %v1256_v35, %v1126_v58  ;;  %v749_v39 = vadd.f32 %v1293_v31, %v684_v34 }
 0x117   : > { %v1257_v40 = vpop.f32.mrb[12].mxu0  ;;  %v752_v41 = vadd.f32 %v1296_v37, %v687_v38 }
 0x118   : > { %v1297_v42 = vpop.f32.mrb[12].mxu1  ;;  %v1258_v43 = vpop.f32.mrb[13].mxu0 }
 0x119   : > { %v1259_v44 = vadd.f32 %v1258_v43, %v1257_v40  ;;  %v1298_v45 = vpop.f32.mrb[13].mxu1  ;;  %v1260_v46 = vpop.f32.mrb[14].mxu0 }
 0x11a   : > { %v1299_v47 = vadd.f32 %v1298_v45, %v1297_v42  ;;  %v1300_v48 = vpop.f32.mrb[14].mxu1  ;;  %v1261_v49 = vpop.f32.mrb[15].mxu0 }
 0x11b   : > { %v692_v50 = vadd.f32 %v1259_v44, %v1126_v58  ;;  %v1262_v51 = vadd.f32 %v1261_v49, %v1260_v46  ;;  %v1301_v52 = vpop.f32.mrb[15].mxu1 }
 0x11c   : > { %v1302_v53 = vadd.f32 %v1301_v52, %v1300_v48 }
 0x11d   : > { %v695_v54 = vadd.f32 %v1262_v51, %v1126_v58  ;;  %v757_v55 = vadd.f32 %v1299_v47, %v692_v50 }
 0x11f   : > { %v1321_v56 = vpop.f32.mrb[16].mxu0  ;;  %v760_v57 = vadd.f32 %v1302_v53, %v695_v54 }
 0x120   : > { %v806_v59 = vadd.f32 %v1321_v56, %v741_v23  ;;  %v1325_v60 = vpop.f32.mrb[16].mxu1  ;;  %v797_v61 = vpop.f32.mrb[17].mxu0 }
 0x121   : > { %v822_v62 = vadd.f32 %v1325_v60, %v757_v55  ;;  %v798_v63 = vadd.f32 %v797_v61, %v733_v7  ;;  %v813_v0 = vpop.f32.mrb[17].mxu1  ;;  %v1322_v1 = vpop.f32.mrb[18].mxu0 }
 0x122   : > { %v830_v2 = vmax.f32 %v806_v59, 0.0  ;;  %v814_v3 = vadd.f32 %v813_v0, %v749_v39  ;;  %v809_v4 = vadd.f32 %v1322_v1, %v744_v25  ;;  %v1326_v5 = vpop.f32.mrb[18].mxu1  ;;  %v800_v6 = vpop.f32.mrb[19].mxu0 }
 0x123   : > { %v834_v8 = vmax.f32 %v822_v62, 0.0  ;;  %v828_v58 = vmax.f32 %v798_v63, 0.0  ;;  %v825_v10 = vadd.f32 %v1326_v5, %v760_v57  ;;  %v801_v11 = vadd.f32 %v800_v6, %v1766_v9  ;;  %v816_v12 = vpop.f32.mrb[19].mxu1 }
 0x124   : > { %v1214_v13 = vpack.c.bf16 %v830_v2, %v830_v2  ;;  %v832_v14 = vmax.f32 %v814_v3, 0.0  ;;  %v831_v15 = vmax.f32 %v809_v4, 0.0  ;;  %v817_v16 = vadd.f32 %v816_v12, %v752_v41  ;;  %883 = sbr.rel (!%p1621_p4) target bundleno = 353 (0x161), region = 36 }
 0x125   : > { %v1218_v17 = vpack.c.bf16 %v834_v8, %v834_v8  ;;  %v1212_v7 = vpack.c.bf16 %v828_v58, %v828_v58  ;;  %v835_v18 = vmax.f32 %v825_v10, 0.0  ;;  %v829_v19 = vmax.f32 %v801_v11, 0.0 }
 0x126   : > { %871 = vst.msk [vmem:[%s1770_s12 + $0x8] sm:$0xf] %vm868_vm1, %v1214_v13  ;;  %v1216_v9 = vpack.c.bf16 %v832_v14, %v832_v14  ;;  %v1215_v20 = vpack.c.bf16 %v831_v15, %v831_v15  ;;  %v833_v21 = vmax.f32 %v817_v16, 0.0 }
 0x127   : > { %875 = vst.msk [vmem:[%s1770_s12 + $0x18] sm:$0xf] %vm868_vm1, %v1218_v17  ;;  %869 = vst.msk [vmem:[%s1770_s12] sm:$0xf] %vm868_vm1, %v1212_v7  ;;  %v1219_v22 = vpack.c.bf16 %v835_v18, %v835_v18  ;;  %v1213_v23 = vpack.c.bf16 %v829_v19, %v829_v19 }
 0x128   : > { %873 = vst.msk [vmem:[%s1770_s12 + $0x10] sm:$0xf] %vm868_vm1, %v1216_v9  ;;  %872 = vst.msk [vmem:[%s1770_s12 + $0xc] sm:$0xf] %vm868_vm1, %v1215_v20  ;;  %v1217_v24 = vpack.c.bf16 %v833_v21, %v833_v21 }
 0x129   : > { %876 = vst.msk [vmem:[%s1770_s12 + $0x1c] sm:$0xf] %vm868_vm1, %v1219_v22  ;;  %870 = vst.msk [vmem:[%s1770_s12 + $0x4] sm:$0xf] %vm868_vm1, %v1213_v23 }
 0x12a   : > { %874 = vst.msk [vmem:[%s1770_s12 + $0x14] sm:$0xf] %vm868_vm1, %v1217_v24 }
 0x12b   : > { %s1861_s21 = smov (!%p886_p8, %s885_s21), 8 }
 0x12c   : > { %s1197_s26 = sshll.u32 %s1861_s21, 6 }
 0x12d   : > { %p1200_p9 = scmp.eq.s32.totalorder %s1197_s26, 0 }
 0x12e   : > { %s1801_s27 = sshrl.u32 (!%p1200_p9), %s1861_s21, 3 }
 0x12f   : > { %894 = sbr.rel (%p1200_p9) target bundleno = 353 (0x161), region = 40  ;;  %p1201_p10 = scmp.le.s32.totalorder (!%p1200_p9), %s1801_s27, 0 }
 0x136   : > { %1075 = sbr.rel (%p1201_p10) target bundleno = 332 (0x14c), region = 112  ;;  %s1854_s15 = smov (!%p1201_p10), %s1795_s25 }
 0x137   : > { %s1855_s20 = smov (!%p1201_p10), %s1770_s12  ;;  %s1810_s30 = smov (!%p1201_p10), 0  }
 0x138   : > { %s1812_s28 = smov (!%p1201_p10), 0  }
 0x13d LB: >> { %v910_v25 = vld [vmem:[%s1550_s20] sm:$0xf]  ;;  %v912_v26 = vld [vmem:[%s1550_s20 + $0x4] sm:$0xf]  ;;  %v914_v27 = vld [vmem:[%s1550_s20 + $0x8] sm:$0xf]  ;;  %s1558_s28 = sphi %s1812_s28, %s904_s28   ;;  %s1554_s30 = sphi %s1810_s30, %s1856_s30   ;;  %s1550_s20 = sphi %s1855_s20, %s931_s20   ;;  %s1546_s15 = sphi %s1854_s15, %s932_s15  }
 0x13e   : >> { %911 = vst [vmem:[%s1546_s15] sm:$0xf] %v910_v25  ;;  %913 = vst [vmem:[%s1546_s15 + $0x4] sm:$0xf] %v912_v26  ;;  %v916_v28 = vld [vmem:[%s1550_s20 + $0xc] sm:$0xf]  ;;  %s926_s29 = sadd.s32 1, %s1554_s30 }
 0x13f   : >> { %915 = vst [vmem:[%s1546_s15 + $0x8] sm:$0xf] %v914_v27  ;;  %v918_v29 = vld [vmem:[%s1550_s20 + $0x10] sm:$0xf]  ;;  %v920_v30 = vld [vmem:[%s1550_s20 + $0x14] sm:$0xf]  ;;  %p927_p11 = scmp.ge.s32.totalorder %s926_s29, %s1801_s27 }
 0x140   : >> { %917 = vst [vmem:[%s1546_s15 + $0xc] sm:$0xf] %v916_v28  ;;  %919 = vst [vmem:[%s1546_s15 + $0x10] sm:$0xf] %v918_v29  ;;  %v922_v31 = vld [vmem:[%s1550_s20 + $0x18] sm:$0xf] }
 0x141   : >> { %921 = vst [vmem:[%s1546_s15 + $0x14] sm:$0xf] %v920_v30  ;;  %v924_v32 = vld [vmem:[%s1550_s20 + $0x1c] sm:$0xf]  ;;  %923 = vst [vmem:[%s1546_s15 + $0x18] sm:$0xf] %v922_v31 }
 0x142   : >> { %925 = vst [vmem:[%s1546_s15 + $0x1c] sm:$0xf] %v924_v32  ;;  %s1863_s29 = smov (%p927_p11, %s926_s29), 0  ;;  %s904_s28 = sadd.s32 1, %s1558_s28  }
 0x143   : >> { %s1202_s4 = sshll.u32 %s1863_s29, 5  ;;  %p903_p12 = scmp.ge.s32.totalorder %s904_s28, %s1801_s27 }
 0x144   : >> { %s931_s20 = scalar_lea.vmem %s1770_s12, %s1202_s4 [#allocation2]   ;;  %s932_s15 = scalar_lea.vmem %s1795_s25, %s1202_s4  }
 0x145   : >> { %s1856_s30 = smov %s1863_s29  ;;  %906 = sbr.rel (!%p903_p12) target bundleno = 317 (0x13d), region = 118 }
 0x14c PF: > { %s1831_s5 = sand.u32 7, %s1861_s21   ;;  %s1221_s6 = sshll.u32 %s1801_s27, 5 }
 0x14d   : > { %s937_s7 = scalar_lea.vmem %s1770_s12, %s1221_s6 [#allocation2]   ;;  %s939_s8 = scalar_lea.vmem %s1795_s25, %s1221_s6  }
 0x14e   : > { %p1207_p13 = scmp.le.s32.totalorder %s1831_s5, 0 }
 0x14f   : > { %s1560_s9 = smov (!%p1207_p13), %s939_s8   ;;  %s1564_s10 = smov (!%p1207_p13), %s937_s7  }
 0x150   : > { %1089 = sbr.rel (%p1207_p13) target bundleno = 353 (0x161), region = 123  ;;  %s1568_s11 = smov (!%p1207_p13), 0  }
 0x151   : > { %s1572_s14 = smov (!%p1207_p13), 0  }
 0x157 LB: >> { %v949_v33 = vld [vmem:[%s1566_s10] sm:$0xf]  ;;  %s951_s17 = sadd.s32 1, %s1570_s11  ;;  %s943_s14 = sadd.s32 1, %s1574_s14   ;;  %s1574_s14 = sphi %s1572_s14, %s943_s14   ;;  %s1570_s11 = sphi %s1568_s11, %s1569_s11   ;;  %s1566_s10 = sphi %s1564_s10, %s956_s10   ;;  %s1562_s9 = sphi %s1560_s9, %s957_s9  }
 0x158   : >> { %950 = vst [vmem:[%s1562_s9] sm:$0xf] %v949_v33  ;;  %p952_p0 = scmp.ge.s32.totalorder %s951_s17, %s1831_s5  ;;  %p942_p1 = scmp.ge.s32.totalorder %s943_s14, %s1831_s5 }
 0x15a   : >> { %s1865_s17 = smov (%p952_p0, %s951_s17), 0  ;;  %945 = sbr.rel (!%p942_p1) target bundleno = 343 (0x157), region = 129 }
 0x15b   : >> { %s1208_s18 = sshll.u32 %s1865_s17, 2  ;;  %s1569_s11 = smov %s1865_s17  }
 0x15c   : >> { %s956_s10 = scalar_lea.vmem %s937_s7, %s1208_s18 [#allocation2]   ;;  %s957_s9 = scalar_lea.vmem %s939_s8, %s1208_s18  }
 0x161 PF: > { %p10_p2 = scmp.ge.s32.totalorder %s1611_s16, 4   ;;  %s1857_s12 = smov %s1538_s13 }
 0x162   : > { %s1858_s13 = smov %s1619_s19  ;;  %s1859_s14 = smov %s1611_s16 }
 0x163   :  { %12 = sbr.rel (!%p10_p2) target bundleno = 2 (0x2), region = 140 }

// kernel: dueling_dqn_forward.7
= control target key start
LH: loop header
LB: loop body
LE: loop exit
PB: predicated region body
PF: predicated region fallthrough
CT: control target
= control target key end

     0   :  { %10 = vsyncpa [#allocation5], 0  ;;  %s6472_s18 = smov 0   ;;  %s6474_s19 = smov 0   ;;  %s7885_s0 = inlined_call_operand.vmem [shape: bf16[2,3136], index: 0, kind: input, shape index: {}]   ;;  %s7886_s1 = inlined_call_operand.vmem [shape: bf16[3136,1024], index: 1, kind: input, shape index: {}]   ;;  %s7887_s2 = inlined_call_operand.vmem [shape: f32[1,1024], index: 2, kind: input, shape index: {}]   ;;  %s7888_s3 = inlined_call_operand.vmem [shape: bf16[1024,7], index: 3, kind: input, shape index: {}]   ;;  %s7889_s4 = inlined_call_operand.vmem [shape: f32[1,7], index: 4, kind: input, shape index: {}]   ;;  %s7890_s5 = inlined_call_operand.hbm [shape: f32[2,6], index: 5, kind: output, shape index: {}]  }
   0x1   :  { %s6476_s20 = smov 0  }
   0x2 LB: > { %s6488_s21 = sadd.s32 4294967295, %s6434_s20   ;;  %s6491_s22 = sadd.s32 1, %s6434_s20   ;;  %s6434_s20 = sphi %s6476_s20, %s7893_s20   ;;  %s6430_s19 = sphi %s6474_s19, %s7892_s19   ;;  %s6426_s18 = sphi %s6472_s18, %s7891_s18  }
   0x3   : > { %s41_s23 = ssub.s32 %s6434_s20, %s6491_s22  ;;  %s44_s24 = sadd.s32 1, %s6430_s19 }
   0x4   : > { %p42_p0 = scmp.eq.s32.totalorder %s41_s23, 0  ;;  %p51_p1 = scmp.ne.s32.totalorder %s6430_s19, %s6426_s18 }
   0x5   : > { %p52_p2 = scmp.eq.s32.totalorder %s6434_s20, 0  ;;  %p5238_p4 = scmp.ge.s32.totalorder %s6434_s20, 4 }
   0x6   : > { %s6500_s25 = scalar_select %p42_p0, %s6430_s19, %s44_s24  }
   0x7   : > { %p53_p3 = por %p52_p2, %p51_p1  ;;  %177 = sbr.rel (%p5238_p4) target bundleno = 410 (0x19a), region = 24 }
   0xe   : > { %180 = sbr.rel (!%p53_p3) target bundleno = 410 (0x19a), region = 28  ;;  %s182_s26 = sand.u32 (%p53_p3), 1, %s6430_s19  }
   0xf   : > { %s5662_s27 = sshll.u32 (%p53_p3), %s6434_s20, 3  ;;  %s5733_s28 = smul.u32 (%p53_p3), 3136, %s182_s26 }
  0x10   : > { %s6508_s6 = scalar_lea.vmem (%p53_p3), %s7886_s1, %s5662_s27 }
  0x11   : > { %v997_v0 = vld [vmem:[%s6508_s6] sm:$0xff] (%p53_p3)  ;;  %s6516_s7 = scalar_lea.vmem (%p53_p3), [#allocation3], %s5733_s28 }
  0x12   : > { %v999_v1 = vld [vmem:[%s6508_s6 + $0x20] sm:$0xff] (%p53_p3)  ;;  %998 = vst [vmem:[%s6516_s7] sm:$0xff] (%p53_p3), %v997_v0 }
  0x13   : > { %v1001_v2 = vld [vmem:[%s6508_s6 + $0x40] sm:$0xff] (%p53_p3)  ;;  %1000 = vst [vmem:[%s6516_s7 + $0x8] sm:$0xff] (%p53_p3), %v999_v1 }
  0x14   : > { %v1003_v3 = vld [vmem:[%s6508_s6 + $0x60] sm:$0xff] (%p53_p3)  ;;  %1002 = vst [vmem:[%s6516_s7 + $0x10] sm:$0xff] (%p53_p3), %v1001_v2 }
  0x15   : > { %v1005_v4 = vld [vmem:[%s6508_s6 + $0x80] sm:$0xff]  ;;  %1004 = vst [vmem:[%s6516_s7 + $0x18] sm:$0xff] %v1003_v3 }
  0x16   : > { %v1007_v5 = vld [vmem:[%s6508_s6 + $0xa0] sm:$0xff]  ;;  %1006 = vst [vmem:[%s6516_s7 + $0x20] sm:$0xff] %v1005_v4 }
  0x17   : > { %1008 = vst [vmem:[%s6516_s7 + $0x28] sm:$0xff] %v1007_v5  ;;  %v1009_v6 = vld [vmem:[%s6508_s6 + $0xc0] sm:$0xff] }
  0x18   : > { %v1011_v7 = vld [vmem:[%s6508_s6 + $0xe0] sm:$0xff]  ;;  %1010 = vst [vmem:[%s6516_s7 + $0x30] sm:$0xff] %v1009_v6 }
  0x19   : > { %v1013_v8 = vld [vmem:[%s6508_s6 + $0x100] sm:$0xff]  ;;  %1012 = vst [vmem:[%s6516_s7 + $0x38] sm:$0xff] %v1011_v7 }
  0x1a   : > { %1014 = vst [vmem:[%s6516_s7 + $0x40] sm:$0xff] %v1013_v8  ;;  %v1015_v9 = vld [vmem:[%s6508_s6 + $0x120] sm:$0xff] }
  0x1b   : > { %v1017_v10 = vld [vmem:[%s6508_s6 + $0x140] sm:$0xff]  ;;  %1016 = vst [vmem:[%s6516_s7 + $0x48] sm:$0xff] %v1015_v9 }
  0x1c   : > { %v1019_v11 = vld [vmem:[%s6508_s6 + $0x160] sm:$0xff]  ;;  %1018 = vst [vmem:[%s6516_s7 + $0x50] sm:$0xff] %v1017_v10 }
  0x1d   : > { %1020 = vst [vmem:[%s6516_s7 + $0x58] sm:$0xff] %v1019_v11  ;;  %v1021_v12 = vld [vmem:[%s6508_s6 + $0x180] sm:$0xff] }
  0x1e   : > { %v1023_v13 = vld [vmem:[%s6508_s6 + $0x1a0] sm:$0xff]  ;;  %1022 = vst [vmem:[%s6516_s7 + $0x60] sm:$0xff] %v1021_v12 }
  0x1f   : > { %v1025_v14 = vld [vmem:[%s6508_s6 + $0x1c0] sm:$0xff]  ;;  %1024 = vst [vmem:[%s6516_s7 + $0x68] sm:$0xff] %v1023_v13 }
  0x20   : > { %1026 = vst [vmem:[%s6516_s7 + $0x70] sm:$0xff] %v1025_v14  ;;  %v1027_v15 = vld [vmem:[%s6508_s6 + $0x1e0] sm:$0xff] }
  0x21   : > { %v1029_v16 = vld [vmem:[%s6508_s6 + $0x200] sm:$0xff]  ;;  %1028 = vst [vmem:[%s6516_s7 + $0x78] sm:$0xff] %v1027_v15 }
  0x22   : > { %v1031_v17 = vld [vmem:[%s6508_s6 + $0x220] sm:$0xff]  ;;  %1030 = vst [vmem:[%s6516_s7 + $0x80] sm:$0xff] %v1029_v16 }
  0x23   : > { %1032 = vst [vmem:[%s6516_s7 + $0x88] sm:$0xff] %v1031_v17  ;;  %v1033_v18 = vld [vmem:[%s6508_s6 + $0x240] sm:$0xff] }
  0x24   : > { %v1035_v19 = vld [vmem:[%s6508_s6 + $0x260] sm:$0xff]  ;;  %1034 = vst [vmem:[%s6516_s7 + $0x90] sm:$0xff] %v1033_v18 }
  0x25   : > { %v1037_v20 = vld [vmem:[%s6508_s6 + $0x280] sm:$0xff]  ;;  %1036 = vst [vmem:[%s6516_s7 + $0x98] sm:$0xff] %v1035_v19 }
  0x26   : > { %1038 = vst [vmem:[%s6516_s7 + $0xa0] sm:$0xff] %v1037_v20  ;;  %v1039_v21 = vld [vmem:[%s6508_s6 + $0x2a0] sm:$0xff] }
  0x27   : > { %v1041_v22 = vld [vmem:[%s6508_s6 + $0x2c0] sm:$0xff]  ;;  %1040 = vst [vmem:[%s6516_s7 + $0xa8] sm:$0xff] %v1039_v21 }
  0x28   : > { %v1043_v23 = vld [vmem:[%s6508_s6 + $0x2e0] sm:$0xff]  ;;  %1042 = vst [vmem:[%s6516_s7 + $0xb0] sm:$0xff] %v1041_v22 }
  0x29   : > { %1044 = vst [vmem:[%s6516_s7 + $0xb8] sm:$0xff] %v1043_v23  ;;  %v1045_v24 = vld [vmem:[%s6508_s6 + $0x300] sm:$0xff] }
  0x2a   : > { %v1047_v25 = vld [vmem:[%s6508_s6 + $0x320] sm:$0xff]  ;;  %1046 = vst [vmem:[%s6516_s7 + $0xc0] sm:$0xff] %v1045_v24 }
  0x2b   : > { %v1049_v26 = vld [vmem:[%s6508_s6 + $0x340] sm:$0xff]  ;;  %1048 = vst [vmem:[%s6516_s7 + $0xc8] sm:$0xff] %v1047_v25 }
  0x2c   : > { %1050 = vst [vmem:[%s6516_s7 + $0xd0] sm:$0xff] %v1049_v26  ;;  %v1051_v27 = vld [vmem:[%s6508_s6 + $0x360] sm:$0xff] }
  0x2d   : > { %v1053_v28 = vld [vmem:[%s6508_s6 + $0x380] sm:$0xff]  ;;  %1052 = vst [vmem:[%s6516_s7 + $0xd8] sm:$0xff] %v1051_v27 }
  0x2e   : > { %v1055_v29 = vld [vmem:[%s6508_s6 + $0x3a0] sm:$0xff]  ;;  %1054 = vst [vmem:[%s6516_s7 + $0xe0] sm:$0xff] %v1053_v28 }
  0x2f   : > { %1056 = vst [vmem:[%s6516_s7 + $0xe8] sm:$0xff] %v1055_v29  ;;  %v1057_v30 = vld [vmem:[%s6508_s6 + $0x3c0] sm:$0xff] }
  0x30   : > { %v1059_v31 = vld [vmem:[%s6508_s6 + $0x3e0] sm:$0xff]  ;;  %1058 = vst [vmem:[%s6516_s7 + $0xf0] sm:$0xff] %v1057_v30 }
  0x31   : > { %v1061_v32 = vld [vmem:[%s6508_s6 + $0x400] sm:$0xff]  ;;  %1060 = vst [vmem:[%s6516_s7 + $0xf8] sm:$0xff] %v1059_v31 }
  0x32   : > { %1062 = vst [vmem:[%s6516_s7 + $0x100] sm:$0xff] %v1061_v32  ;;  %v1063_v33 = vld [vmem:[%s6508_s6 + $0x420] sm:$0xff] }
  0x33   : > { %v1065_v34 = vld [vmem:[%s6508_s6 + $0x440] sm:$0xff]  ;;  %1064 = vst [vmem:[%s6516_s7 + $0x108] sm:$0xff] %v1063_v33 }
  0x34   : > { %v1067_v35 = vld [vmem:[%s6508_s6 + $0x460] sm:$0xff]  ;;  %1066 = vst [vmem:[%s6516_s7 + $0x110] sm:$0xff] %v1065_v34 }
  0x35   : > { %1068 = vst [vmem:[%s6516_s7 + $0x118] sm:$0xff] %v1067_v35  ;;  %v1069_v36 = vld [vmem:[%s6508_s6 + $0x480] sm:$0xff] }
  0x36   : > { %v1071_v37 = vld [vmem:[%s6508_s6 + $0x4a0] sm:$0xff]  ;;  %1070 = vst [vmem:[%s6516_s7 + $0x120] sm:$0xff] %v1069_v36 }
  0x37   : > { %v1073_v38 = vld [vmem:[%s6508_s6 + $0x4c0] sm:$0xff]  ;;  %1072 = vst [vmem:[%s6516_s7 + $0x128] sm:$0xff] %v1071_v37 }
  0x38   : > { %1074 = vst [vmem:[%s6516_s7 + $0x130] sm:$0xff] %v1073_v38  ;;  %v1075_v39 = vld [vmem:[%s6508_s6 + $0x4e0] sm:$0xff] }
  0x39   : > { %v1077_v40 = vld [vmem:[%s6508_s6 + $0x500] sm:$0xff]  ;;  %1076 = vst [vmem:[%s6516_s7 + $0x138] sm:$0xff] %v1075_v39 }
  0x3a   : > { %v1079_v41 = vld [vmem:[%s6508_s6 + $0x520] sm:$0xff]  ;;  %1078 = vst [vmem:[%s6516_s7 + $0x140] sm:$0xff] %v1077_v40 }
  0x3b   : > { %1080 = vst [vmem:[%s6516_s7 + $0x148] sm:$0xff] %v1079_v41  ;;  %v1081_v42 = vld [vmem:[%s6508_s6 + $0x540] sm:$0xff] }
  0x3c   : > { %v1083_v43 = vld [vmem:[%s6508_s6 + $0x560] sm:$0xff]  ;;  %1082 = vst [vmem:[%s6516_s7 + $0x150] sm:$0xff] %v1081_v42 }
  0x3d   : > { %v1085_v44 = vld [vmem:[%s6508_s6 + $0x580] sm:$0xff]  ;;  %1084 = vst [vmem:[%s6516_s7 + $0x158] sm:$0xff] %v1083_v43 }
  0x3e   : > { %1086 = vst [vmem:[%s6516_s7 + $0x160] sm:$0xff] %v1085_v44  ;;  %v1087_v45 = vld [vmem:[%s6508_s6 + $0x5a0] sm:$0xff] }
  0x3f   : > { %v1089_v46 = vld [vmem:[%s6508_s6 + $0x5c0] sm:$0xff]  ;;  %1088 = vst [vmem:[%s6516_s7 + $0x168] sm:$0xff] %v1087_v45 }
  0x40   : > { %v1091_v47 = vld [vmem:[%s6508_s6 + $0x5e0] sm:$0xff]  ;;  %1090 = vst [vmem:[%s6516_s7 + $0x170] sm:$0xff] %v1089_v46 }
  0x41   : > { %1092 = vst [vmem:[%s6516_s7 + $0x178] sm:$0xff] %v1091_v47  ;;  %v1093_v48 = vld [vmem:[%s6508_s6 + $0x600] sm:$0xff] }
  0x42   : > { %v1095_v49 = vld [vmem:[%s6508_s6 + $0x620] sm:$0xff]  ;;  %1094 = vst [vmem:[%s6516_s7 + $0x180] sm:$0xff] %v1093_v48 }
  0x43   : > { %v1097_v50 = vld [vmem:[%s6508_s6 + $0x640] sm:$0xff]  ;;  %1096 = vst [vmem:[%s6516_s7 + $0x188] sm:$0xff] %v1095_v49 }
  0x44   : > { %1098 = vst [vmem:[%s6516_s7 + $0x190] sm:$0xff] %v1097_v50  ;;  %v1099_v51 = vld [vmem:[%s6508_s6 + $0x660] sm:$0xff] }
  0x45   : > { %v1101_v52 = vld [vmem:[%s6508_s6 + $0x680] sm:$0xff]  ;;  %1100 = vst [vmem:[%s6516_s7 + $0x198] sm:$0xff] %v1099_v51 }
  0x46   : > { %v1103_v53 = vld [vmem:[%s6508_s6 + $0x6a0] sm:$0xff]  ;;  %1102 = vst [vmem:[%s6516_s7 + $0x1a0] sm:$0xff] %v1101_v52 }
  0x47   : > { %1104 = vst [vmem:[%s6516_s7 + $0x1a8] sm:$0xff] %v1103_v53  ;;  %v1105_v54 = vld [vmem:[%s6508_s6 + $0x6c0] sm:$0xff] }
  0x48   : > { %v1107_v55 = vld [vmem:[%s6508_s6 + $0x6e0] sm:$0xff]  ;;  %1106 = vst [vmem:[%s6516_s7 + $0x1b0] sm:$0xff] %v1105_v54 }
  0x49   : > { %v1109_v56 = vld [vmem:[%s6508_s6 + $0x700] sm:$0xff]  ;;  %1108 = vst [vmem:[%s6516_s7 + $0x1b8] sm:$0xff] %v1107_v55 }
  0x4a   : > { %1110 = vst [vmem:[%s6516_s7 + $0x1c0] sm:$0xff] %v1109_v56  ;;  %v1111_v57 = vld [vmem:[%s6508_s6 + $0x720] sm:$0xff] }
  0x4b   : > { %v1113_v58 = vld [vmem:[%s6508_s6 + $0x740] sm:$0xff]  ;;  %1112 = vst [vmem:[%s6516_s7 + $0x1c8] sm:$0xff] %v1111_v57 }
  0x4c   : > { %v1115_v59 = vld [vmem:[%s6508_s6 + $0x760] sm:$0xff]  ;;  %1114 = vst [vmem:[%s6516_s7 + $0x1d0] sm:$0xff] %v1113_v58 }
  0x4d   : > { %1116 = vst [vmem:[%s6516_s7 + $0x1d8] sm:$0xff] %v1115_v59  ;;  %v1117_v60 = vld [vmem:[%s6508_s6 + $0x780] sm:$0xff] }
  0x4e   : > { %v1119_v61 = vld [vmem:[%s6508_s6 + $0x7a0] sm:$0xff]  ;;  %1118 = vst [vmem:[%s6516_s7 + $0x1e0] sm:$0xff] %v1117_v60 }
  0x4f   : > { %v1121_v62 = vld [vmem:[%s6508_s6 + $0x7c0] sm:$0xff]  ;;  %1120 = vst [vmem:[%s6516_s7 + $0x1e8] sm:$0xff] %v1119_v61 }
  0x50   : > { %1122 = vst [vmem:[%s6516_s7 + $0x1f0] sm:$0xff] %v1121_v62  ;;  %v1123_v63 = vld [vmem:[%s6508_s6 + $0x7e0] sm:$0xff] }
  0x51   : > { %v1125_v0 = vld [vmem:[%s6508_s6 + $0x800] sm:$0xff]  ;;  %1124 = vst [vmem:[%s6516_s7 + $0x1f8] sm:$0xff] %v1123_v63 }
  0x52   : > { %v1127_v1 = vld [vmem:[%s6508_s6 + $0x820] sm:$0xff]  ;;  %1126 = vst [vmem:[%s6516_s7 + $0x200] sm:$0xff] %v1125_v0 }
  0x53   : > { %1128 = vst [vmem:[%s6516_s7 + $0x208] sm:$0xff] %v1127_v1  ;;  %v1129_v2 = vld [vmem:[%s6508_s6 + $0x840] sm:$0xff] }
  0x54   : > { %v1131_v3 = vld [vmem:[%s6508_s6 + $0x860] sm:$0xff]  ;;  %1130 = vst [vmem:[%s6516_s7 + $0x210] sm:$0xff] %v1129_v2 }
  0x55   : > { %v1133_v4 = vld [vmem:[%s6508_s6 + $0x880] sm:$0xff]  ;;  %1132 = vst [vmem:[%s6516_s7 + $0x218] sm:$0xff] %v1131_v3 }
  0x56   : > { %1134 = vst [vmem:[%s6516_s7 + $0x220] sm:$0xff] %v1133_v4  ;;  %v1135_v5 = vld [vmem:[%s6508_s6 + $0x8a0] sm:$0xff] }
  0x57   : > { %v1137_v6 = vld [vmem:[%s6508_s6 + $0x8c0] sm:$0xff]  ;;  %1136 = vst [vmem:[%s6516_s7 + $0x228] sm:$0xff] %v1135_v5 }
  0x58   : > { %v1139_v7 = vld [vmem:[%s6508_s6 + $0x8e0] sm:$0xff]  ;;  %1138 = vst [vmem:[%s6516_s7 + $0x230] sm:$0xff] %v1137_v6 }
  0x59   : > { %1140 = vst [vmem:[%s6516_s7 + $0x238] sm:$0xff] %v1139_v7  ;;  %v1141_v8 = vld [vmem:[%s6508_s6 + $0x900] sm:$0xff] }
  0x5a   : > { %v1143_v9 = vld [vmem:[%s6508_s6 + $0x920] sm:$0xff]  ;;  %1142 = vst [vmem:[%s6516_s7 + $0x240] sm:$0xff] %v1141_v8 }
  0x5b   : > { %v1145_v10 = vld [vmem:[%s6508_s6 + $0x940] sm:$0xff]  ;;  %1144 = vst [vmem:[%s6516_s7 + $0x248] sm:$0xff] %v1143_v9 }
  0x5c   : > { %1146 = vst [vmem:[%s6516_s7 + $0x250] sm:$0xff] %v1145_v10  ;;  %v1147_v11 = vld [vmem:[%s6508_s6 + $0x960] sm:$0xff] }
  0x5d   : > { %v1149_v12 = vld [vmem:[%s6508_s6 + $0x980] sm:$0xff]  ;;  %1148 = vst [vmem:[%s6516_s7 + $0x258] sm:$0xff] %v1147_v11 }
  0x5e   : > { %v1151_v13 = vld [vmem:[%s6508_s6 + $0x9a0] sm:$0xff]  ;;  %1150 = vst [vmem:[%s6516_s7 + $0x260] sm:$0xff] %v1149_v12 }
  0x5f   : > { %1152 = vst [vmem:[%s6516_s7 + $0x268] sm:$0xff] %v1151_v13  ;;  %v1153_v14 = vld [vmem:[%s6508_s6 + $0x9c0] sm:$0xff] }
  0x60   : > { %v1155_v15 = vld [vmem:[%s6508_s6 + $0x9e0] sm:$0xff]  ;;  %1154 = vst [vmem:[%s6516_s7 + $0x270] sm:$0xff] %v1153_v14 }
  0x61   : > { %v1157_v16 = vld [vmem:[%s6508_s6 + $0xa00] sm:$0xff]  ;;  %1156 = vst [vmem:[%s6516_s7 + $0x278] sm:$0xff] %v1155_v15 }
  0x62   : > { %1158 = vst [vmem:[%s6516_s7 + $0x280] sm:$0xff] %v1157_v16  ;;  %v1159_v17 = vld [vmem:[%s6508_s6 + $0xa20] sm:$0xff] }
  0x63   : > { %v1161_v18 = vld [vmem:[%s6508_s6 + $0xa40] sm:$0xff]  ;;  %1160 = vst [vmem:[%s6516_s7 + $0x288] sm:$0xff] %v1159_v17 }
  0x64   : > { %v1163_v19 = vld [vmem:[%s6508_s6 + $0xa60] sm:$0xff]  ;;  %1162 = vst [vmem:[%s6516_s7 + $0x290] sm:$0xff] %v1161_v18 }
  0x65   : > { %1164 = vst [vmem:[%s6516_s7 + $0x298] sm:$0xff] %v1163_v19  ;;  %v1165_v20 = vld [vmem:[%s6508_s6 + $0xa80] sm:$0xff] }
  0x66   : > { %v1167_v21 = vld [vmem:[%s6508_s6 + $0xaa0] sm:$0xff]  ;;  %1166 = vst [vmem:[%s6516_s7 + $0x2a0] sm:$0xff] %v1165_v20 }
  0x67   : > { %v1169_v22 = vld [vmem:[%s6508_s6 + $0xac0] sm:$0xff]  ;;  %1168 = vst [vmem:[%s6516_s7 + $0x2a8] sm:$0xff] %v1167_v21 }
  0x68   : > { %1170 = vst [vmem:[%s6516_s7 + $0x2b0] sm:$0xff] %v1169_v22  ;;  %v1171_v23 = vld [vmem:[%s6508_s6 + $0xae0] sm:$0xff] }
  0x69   : > { %v1173_v24 = vld [vmem:[%s6508_s6 + $0xb00] sm:$0xff]  ;;  %1172 = vst [vmem:[%s6516_s7 + $0x2b8] sm:$0xff] %v1171_v23 }
  0x6a   : > { %v1175_v25 = vld [vmem:[%s6508_s6 + $0xb20] sm:$0xff]  ;;  %1174 = vst [vmem:[%s6516_s7 + $0x2c0] sm:$0xff] %v1173_v24 }
  0x6b   : > { %1176 = vst [vmem:[%s6516_s7 + $0x2c8] sm:$0xff] %v1175_v25  ;;  %v1177_v26 = vld [vmem:[%s6508_s6 + $0xb40] sm:$0xff] }
  0x6c   : > { %v1179_v27 = vld [vmem:[%s6508_s6 + $0xb60] sm:$0xff]  ;;  %1178 = vst [vmem:[%s6516_s7 + $0x2d0] sm:$0xff] %v1177_v26 }
  0x6d   : > { %v1181_v28 = vld [vmem:[%s6508_s6 + $0xb80] sm:$0xff]  ;;  %1180 = vst [vmem:[%s6516_s7 + $0x2d8] sm:$0xff] %v1179_v27 }
  0x6e   : > { %1182 = vst [vmem:[%s6516_s7 + $0x2e0] sm:$0xff] %v1181_v28  ;;  %v1183_v29 = vld [vmem:[%s6508_s6 + $0xba0] sm:$0xff] }
  0x6f   : > { %v1185_v30 = vld [vmem:[%s6508_s6 + $0xbc0] sm:$0xff]  ;;  %1184 = vst [vmem:[%s6516_s7 + $0x2e8] sm:$0xff] %v1183_v29 }
  0x70   : > { %v1187_v31 = vld [vmem:[%s6508_s6 + $0xbe0] sm:$0xff]  ;;  %1186 = vst [vmem:[%s6516_s7 + $0x2f0] sm:$0xff] %v1185_v30 }
  0x71   : > { %1188 = vst [vmem:[%s6516_s7 + $0x2f8] sm:$0xff] %v1187_v31  ;;  %v1189_v32 = vld [vmem:[%s6508_s6 + $0xc00] sm:$0xff] }
  0x72   : > { %v1191_v33 = vld [vmem:[%s6508_s6 + $0xc20] sm:$0xff]  ;;  %1190 = vst [vmem:[%s6516_s7 + $0x300] sm:$0xff] %v1189_v32 }
  0x73   : > { %v1193_v34 = vld [vmem:[%s6508_s6 + $0xc40] sm:$0xff]  ;;  %1192 = vst [vmem:[%s6516_s7 + $0x308] sm:$0xff] %v1191_v33 }
  0x74   : > { %1194 = vst [vmem:[%s6516_s7 + $0x310] sm:$0xff] %v1193_v34  ;;  %v1195_v35 = vld [vmem:[%s6508_s6 + $0xc60] sm:$0xff] }
  0x75   : > { %v1197_v36 = vld [vmem:[%s6508_s6 + $0xc80] sm:$0xff]  ;;  %1196 = vst [vmem:[%s6516_s7 + $0x318] sm:$0xff] %v1195_v35 }
  0x76   : > { %v1199_v37 = vld [vmem:[%s6508_s6 + $0xca0] sm:$0xff]  ;;  %1198 = vst [vmem:[%s6516_s7 + $0x320] sm:$0xff] %v1197_v36 }
  0x77   : > { %1200 = vst [vmem:[%s6516_s7 + $0x328] sm:$0xff] %v1199_v37  ;;  %v1201_v38 = vld [vmem:[%s6508_s6 + $0xcc0] sm:$0xff] }
  0x78   : > { %v1203_v39 = vld [vmem:[%s6508_s6 + $0xce0] sm:$0xff]  ;;  %1202 = vst [vmem:[%s6516_s7 + $0x330] sm:$0xff] %v1201_v38 }
  0x79   : > { %v1205_v40 = vld [vmem:[%s6508_s6 + $0xd00] sm:$0xff]  ;;  %1204 = vst [vmem:[%s6516_s7 + $0x338] sm:$0xff] %v1203_v39 }
  0x7a   : > { %1206 = vst [vmem:[%s6516_s7 + $0x340] sm:$0xff] %v1205_v40  ;;  %v1207_v41 = vld [vmem:[%s6508_s6 + $0xd20] sm:$0xff] }
  0x7b   : > { %v1209_v42 = vld [vmem:[%s6508_s6 + $0xd40] sm:$0xff]  ;;  %1208 = vst [vmem:[%s6516_s7 + $0x348] sm:$0xff] %v1207_v41 }
  0x7c   : > { %v1211_v43 = vld [vmem:[%s6508_s6 + $0xd60] sm:$0xff]  ;;  %1210 = vst [vmem:[%s6516_s7 + $0x350] sm:$0xff] %v1209_v42 }
  0x7d   : > { %1212 = vst [vmem:[%s6516_s7 + $0x358] sm:$0xff] %v1211_v43  ;;  %v1213_v44 = vld [vmem:[%s6508_s6 + $0xd80] sm:$0xff] }
  0x7e   : > { %v1215_v45 = vld [vmem:[%s6508_s6 + $0xda0] sm:$0xff]  ;;  %1214 = vst [vmem:[%s6516_s7 + $0x360] sm:$0xff] %v1213_v44 }
  0x7f   : > { %v1217_v46 = vld [vmem:[%s6508_s6 + $0xdc0] sm:$0xff]  ;;  %1216 = vst [vmem:[%s6516_s7 + $0x368] sm:$0xff] %v1215_v45 }
  0x80   : > { %1218 = vst [vmem:[%s6516_s7 + $0x370] sm:$0xff] %v1217_v46  ;;  %v1219_v47 = vld [vmem:[%s6508_s6 + $0xde0] sm:$0xff] }
  0x81   : > { %v1221_v48 = vld [vmem:[%s6508_s6 + $0xe00] sm:$0xff]  ;;  %1220 = vst [vmem:[%s6516_s7 + $0x378] sm:$0xff] %v1219_v47 }
  0x82   : > { %v1223_v49 = vld [vmem:[%s6508_s6 + $0xe20] sm:$0xff]  ;;  %1222 = vst [vmem:[%s6516_s7 + $0x380] sm:$0xff] %v1221_v48 }
  0x83   : > { %1224 = vst [vmem:[%s6516_s7 + $0x388] sm:$0xff] %v1223_v49  ;;  %v1225_v50 = vld [vmem:[%s6508_s6 + $0xe40] sm:$0xff] }
  0x84   : > { %v1227_v51 = vld [vmem:[%s6508_s6 + $0xe60] sm:$0xff]  ;;  %1226 = vst [vmem:[%s6516_s7 + $0x390] sm:$0xff] %v1225_v50 }
  0x85   : > { %v1229_v52 = vld [vmem:[%s6508_s6 + $0xe80] sm:$0xff]  ;;  %1228 = vst [vmem:[%s6516_s7 + $0x398] sm:$0xff] %v1227_v51 }
  0x86   : > { %1230 = vst [vmem:[%s6516_s7 + $0x3a0] sm:$0xff] %v1229_v52  ;;  %v1231_v53 = vld [vmem:[%s6508_s6 + $0xea0] sm:$0xff] }
  0x87   : > { %v1233_v54 = vld [vmem:[%s6508_s6 + $0xec0] sm:$0xff]  ;;  %1232 = vst [vmem:[%s6516_s7 + $0x3a8] sm:$0xff] %v1231_v53 }
  0x88   : > { %v1235_v55 = vld [vmem:[%s6508_s6 + $0xee0] sm:$0xff]  ;;  %1234 = vst [vmem:[%s6516_s7 + $0x3b0] sm:$0xff] %v1233_v54 }
  0x89   : > { %1236 = vst [vmem:[%s6516_s7 + $0x3b8] sm:$0xff] %v1235_v55  ;;  %v1237_v56 = vld [vmem:[%s6508_s6 + $0xf00] sm:$0xff] }
  0x8a   : > { %v1239_v57 = vld [vmem:[%s6508_s6 + $0xf20] sm:$0xff]  ;;  %1238 = vst [vmem:[%s6516_s7 + $0x3c0] sm:$0xff] %v1237_v56 }
  0x8b   : > { %v1241_v58 = vld [vmem:[%s6508_s6 + $0xf40] sm:$0xff]  ;;  %1240 = vst [vmem:[%s6516_s7 + $0x3c8] sm:$0xff] %v1239_v57 }
  0x8c   : > { %1242 = vst [vmem:[%s6516_s7 + $0x3d0] sm:$0xff] %v1241_v58  ;;  %v1243_v59 = vld [vmem:[%s6508_s6 + $0xf60] sm:$0xff] }
  0x8d   : > { %v1245_v60 = vld [vmem:[%s6508_s6 + $0xf80] sm:$0xff]  ;;  %1244 = vst [vmem:[%s6516_s7 + $0x3d8] sm:$0xff] %v1243_v59 }
  0x8e   : > { %v1247_v61 = vld [vmem:[%s6508_s6 + $0xfa0] sm:$0xff]  ;;  %1246 = vst [vmem:[%s6516_s7 + $0x3e0] sm:$0xff] %v1245_v60 }
  0x8f   : > { %1248 = vst [vmem:[%s6516_s7 + $0x3e8] sm:$0xff] %v1247_v61  ;;  %v1249_v62 = vld [vmem:[%s6508_s6 + $0xfc0] sm:$0xff] }
  0x90   : > { %v1251_v63 = vld [vmem:[%s6508_s6 + $0xfe0] sm:$0xff]  ;;  %1250 = vst [vmem:[%s6516_s7 + $0x3f0] sm:$0xff] %v1249_v62 }
  0x91   : > { %v1253_v0 = vld [vmem:[%s6508_s6 + $0x1000] sm:$0xff]  ;;  %1252 = vst [vmem:[%s6516_s7 + $0x3f8] sm:$0xff] %v1251_v63 }
  0x92   : > { %1254 = vst [vmem:[%s6516_s7 + $0x400] sm:$0xff] %v1253_v0  ;;  %v1255_v1 = vld [vmem:[%s6508_s6 + $0x1020] sm:$0xff] }
  0x93   : > { %v1257_v2 = vld [vmem:[%s6508_s6 + $0x1040] sm:$0xff]  ;;  %1256 = vst [vmem:[%s6516_s7 + $0x408] sm:$0xff] %v1255_v1 }
  0x94   : > { %v1259_v3 = vld [vmem:[%s6508_s6 + $0x1060] sm:$0xff]  ;;  %1258 = vst [vmem:[%s6516_s7 + $0x410] sm:$0xff] %v1257_v2 }
  0x95   : > { %1260 = vst [vmem:[%s6516_s7 + $0x418] sm:$0xff] %v1259_v3  ;;  %v1261_v4 = vld [vmem:[%s6508_s6 + $0x1080] sm:$0xff] }
  0x96   : > { %v1263_v5 = vld [vmem:[%s6508_s6 + $0x10a0] sm:$0xff]  ;;  %1262 = vst [vmem:[%s6516_s7 + $0x420] sm:$0xff] %v1261_v4 }
  0x97   : > { %v1265_v6 = vld [vmem:[%s6508_s6 + $0x10c0] sm:$0xff]  ;;  %1264 = vst [vmem:[%s6516_s7 + $0x428] sm:$0xff] %v1263_v5 }
  0x98   : > { %1266 = vst [vmem:[%s6516_s7 + $0x430] sm:$0xff] %v1265_v6  ;;  %v1267_v7 = vld [vmem:[%s6508_s6 + $0x10e0] sm:$0xff] }
  0x99   : > { %v1269_v8 = vld [vmem:[%s6508_s6 + $0x1100] sm:$0xff]  ;;  %1268 = vst [vmem:[%s6516_s7 + $0x438] sm:$0xff] %v1267_v7 }
  0x9a   : > { %v1271_v9 = vld [vmem:[%s6508_s6 + $0x1120] sm:$0xff]  ;;  %1270 = vst [vmem:[%s6516_s7 + $0x440] sm:$0xff] %v1269_v8 }
  0x9b   : > { %1272 = vst [vmem:[%s6516_s7 + $0x448] sm:$0xff] %v1271_v9  ;;  %v1273_v10 = vld [vmem:[%s6508_s6 + $0x1140] sm:$0xff] }
  0x9c   : > { %v1275_v11 = vld [vmem:[%s6508_s6 + $0x1160] sm:$0xff]  ;;  %1274 = vst [vmem:[%s6516_s7 + $0x450] sm:$0xff] %v1273_v10 }
  0x9d   : > { %v1277_v12 = vld [vmem:[%s6508_s6 + $0x1180] sm:$0xff]  ;;  %1276 = vst [vmem:[%s6516_s7 + $0x458] sm:$0xff] %v1275_v11 }
  0x9e   : > { %1278 = vst [vmem:[%s6516_s7 + $0x460] sm:$0xff] %v1277_v12  ;;  %v1279_v13 = vld [vmem:[%s6508_s6 + $0x11a0] sm:$0xff] }
  0x9f   : > { %v1281_v14 = vld [vmem:[%s6508_s6 + $0x11c0] sm:$0xff]  ;;  %1280 = vst [vmem:[%s6516_s7 + $0x468] sm:$0xff] %v1279_v13 }
  0xa0   : > { %v1283_v15 = vld [vmem:[%s6508_s6 + $0x11e0] sm:$0xff]  ;;  %1282 = vst [vmem:[%s6516_s7 + $0x470] sm:$0xff] %v1281_v14 }
  0xa1   : > { %1284 = vst [vmem:[%s6516_s7 + $0x478] sm:$0xff] %v1283_v15  ;;  %v1285_v16 = vld [vmem:[%s6508_s6 + $0x1200] sm:$0xff] }
  0xa2   : > { %v1287_v17 = vld [vmem:[%s6508_s6 + $0x1220] sm:$0xff]  ;;  %1286 = vst [vmem:[%s6516_s7 + $0x480] sm:$0xff] %v1285_v16 }
  0xa3   : > { %v1289_v18 = vld [vmem:[%s6508_s6 + $0x1240] sm:$0xff]  ;;  %1288 = vst [vmem:[%s6516_s7 + $0x488] sm:$0xff] %v1287_v17 }
  0xa4   : > { %1290 = vst [vmem:[%s6516_s7 + $0x490] sm:$0xff] %v1289_v18  ;;  %v1291_v19 = vld [vmem:[%s6508_s6 + $0x1260] sm:$0xff] }
  0xa5   : > { %v1293_v20 = vld [vmem:[%s6508_s6 + $0x1280] sm:$0xff]  ;;  %1292 = vst [vmem:[%s6516_s7 + $0x498] sm:$0xff] %v1291_v19 }
  0xa6   : > { %v1295_v21 = vld [vmem:[%s6508_s6 + $0x12a0] sm:$0xff]  ;;  %1294 = vst [vmem:[%s6516_s7 + $0x4a0] sm:$0xff] %v1293_v20 }
  0xa7   : > { %1296 = vst [vmem:[%s6516_s7 + $0x4a8] sm:$0xff] %v1295_v21  ;;  %v1297_v22 = vld [vmem:[%s6508_s6 + $0x12c0] sm:$0xff] }
  0xa8   : > { %v1299_v23 = vld [vmem:[%s6508_s6 + $0x12e0] sm:$0xff]  ;;  %1298 = vst [vmem:[%s6516_s7 + $0x4b0] sm:$0xff] %v1297_v22 }
  0xa9   : > { %v1301_v24 = vld [vmem:[%s6508_s6 + $0x1300] sm:$0xff]  ;;  %1300 = vst [vmem:[%s6516_s7 + $0x4b8] sm:$0xff] %v1299_v23 }
  0xaa   : > { %1302 = vst [vmem:[%s6516_s7 + $0x4c0] sm:$0xff] %v1301_v24  ;;  %v1303_v25 = vld [vmem:[%s6508_s6 + $0x1320] sm:$0xff] }
  0xab   : > { %v1305_v26 = vld [vmem:[%s6508_s6 + $0x1340] sm:$0xff]  ;;  %1304 = vst [vmem:[%s6516_s7 + $0x4c8] sm:$0xff] %v1303_v25 }
  0xac   : > { %v1307_v27 = vld [vmem:[%s6508_s6 + $0x1360] sm:$0xff]  ;;  %1306 = vst [vmem:[%s6516_s7 + $0x4d0] sm:$0xff] %v1305_v26 }
  0xad   : > { %1308 = vst [vmem:[%s6516_s7 + $0x4d8] sm:$0xff] %v1307_v27  ;;  %v1309_v28 = vld [vmem:[%s6508_s6 + $0x1380] sm:$0xff] }
  0xae   : > { %v1311_v29 = vld [vmem:[%s6508_s6 + $0x13a0] sm:$0xff]  ;;  %1310 = vst [vmem:[%s6516_s7 + $0x4e0] sm:$0xff] %v1309_v28 }
  0xaf   : > { %v1313_v30 = vld [vmem:[%s6508_s6 + $0x13c0] sm:$0xff]  ;;  %1312 = vst [vmem:[%s6516_s7 + $0x4e8] sm:$0xff] %v1311_v29 }
  0xb0   : > { %1314 = vst [vmem:[%s6516_s7 + $0x4f0] sm:$0xff] %v1313_v30  ;;  %v1315_v31 = vld [vmem:[%s6508_s6 + $0x13e0] sm:$0xff] }
  0xb1   : > { %v1317_v32 = vld [vmem:[%s6508_s6 + $0x1400] sm:$0xff]  ;;  %1316 = vst [vmem:[%s6516_s7 + $0x4f8] sm:$0xff] %v1315_v31 }
  0xb2   : > { %v1319_v33 = vld [vmem:[%s6508_s6 + $0x1420] sm:$0xff]  ;;  %1318 = vst [vmem:[%s6516_s7 + $0x500] sm:$0xff] %v1317_v32 }
  0xb3   : > { %1320 = vst [vmem:[%s6516_s7 + $0x508] sm:$0xff] %v1319_v33  ;;  %v1321_v34 = vld [vmem:[%s6508_s6 + $0x1440] sm:$0xff] }
  0xb4   : > { %v1323_v35 = vld [vmem:[%s6508_s6 + $0x1460] sm:$0xff]  ;;  %1322 = vst [vmem:[%s6516_s7 + $0x510] sm:$0xff] %v1321_v34 }
  0xb5   : > { %v1325_v36 = vld [vmem:[%s6508_s6 + $0x1480] sm:$0xff]  ;;  %1324 = vst [vmem:[%s6516_s7 + $0x518] sm:$0xff] %v1323_v35 }
  0xb6   : > { %1326 = vst [vmem:[%s6516_s7 + $0x520] sm:$0xff] %v1325_v36  ;;  %v1327_v37 = vld [vmem:[%s6508_s6 + $0x14a0] sm:$0xff] }
  0xb7   : > { %v1329_v38 = vld [vmem:[%s6508_s6 + $0x14c0] sm:$0xff]  ;;  %1328 = vst [vmem:[%s6516_s7 + $0x528] sm:$0xff] %v1327_v37 }
  0xb8   : > { %v1331_v39 = vld [vmem:[%s6508_s6 + $0x14e0] sm:$0xff]  ;;  %1330 = vst [vmem:[%s6516_s7 + $0x530] sm:$0xff] %v1329_v38 }
  0xb9   : > { %1332 = vst [vmem:[%s6516_s7 + $0x538] sm:$0xff] %v1331_v39  ;;  %v1333_v40 = vld [vmem:[%s6508_s6 + $0x1500] sm:$0xff] }
  0xba   : > { %v1335_v41 = vld [vmem:[%s6508_s6 + $0x1520] sm:$0xff]  ;;  %1334 = vst [vmem:[%s6516_s7 + $0x540] sm:$0xff] %v1333_v40 }
  0xbb   : > { %v1337_v42 = vld [vmem:[%s6508_s6 + $0x1540] sm:$0xff]  ;;  %1336 = vst [vmem:[%s6516_s7 + $0x548] sm:$0xff] %v1335_v41 }
  0xbc   : > { %1338 = vst [vmem:[%s6516_s7 + $0x550] sm:$0xff] %v1337_v42  ;;  %v1339_v43 = vld [vmem:[%s6508_s6 + $0x1560] sm:$0xff] }
  0xbd   : > { %v1341_v44 = vld [vmem:[%s6508_s6 + $0x1580] sm:$0xff]  ;;  %1340 = vst [vmem:[%s6516_s7 + $0x558] sm:$0xff] %v1339_v43 }
  0xbe   : > { %v1343_v45 = vld [vmem:[%s6508_s6 + $0x15a0] sm:$0xff]  ;;  %1342 = vst [vmem:[%s6516_s7 + $0x560] sm:$0xff] %v1341_v44 }
  0xbf   : > { %1344 = vst [vmem:[%s6516_s7 + $0x568] sm:$0xff] %v1343_v45  ;;  %v1345_v46 = vld [vmem:[%s6508_s6 + $0x15c0] sm:$0xff] }
  0xc0   : > { %v1347_v47 = vld [vmem:[%s6508_s6 + $0x15e0] sm:$0xff]  ;;  %1346 = vst [vmem:[%s6516_s7 + $0x570] sm:$0xff] %v1345_v46 }
  0xc1   : > { %v1349_v48 = vld [vmem:[%s6508_s6 + $0x1600] sm:$0xff]  ;;  %1348 = vst [vmem:[%s6516_s7 + $0x578] sm:$0xff] %v1347_v47 }
  0xc2   : > { %1350 = vst [vmem:[%s6516_s7 + $0x580] sm:$0xff] %v1349_v48  ;;  %v1351_v49 = vld [vmem:[%s6508_s6 + $0x1620] sm:$0xff] }
  0xc3   : > { %v1353_v50 = vld [vmem:[%s6508_s6 + $0x1640] sm:$0xff]  ;;  %1352 = vst [vmem:[%s6516_s7 + $0x588] sm:$0xff] %v1351_v49 }
  0xc4   : > { %v1355_v51 = vld [vmem:[%s6508_s6 + $0x1660] sm:$0xff]  ;;  %1354 = vst [vmem:[%s6516_s7 + $0x590] sm:$0xff] %v1353_v50 }
  0xc5   : > { %1356 = vst [vmem:[%s6516_s7 + $0x598] sm:$0xff] %v1355_v51  ;;  %v1357_v52 = vld [vmem:[%s6508_s6 + $0x1680] sm:$0xff] }
  0xc6   : > { %v1359_v53 = vld [vmem:[%s6508_s6 + $0x16a0] sm:$0xff]  ;;  %1358 = vst [vmem:[%s6516_s7 + $0x5a0] sm:$0xff] %v1357_v52 }
  0xc7   : > { %v1361_v54 = vld [vmem:[%s6508_s6 + $0x16c0] sm:$0xff]  ;;  %1360 = vst [vmem:[%s6516_s7 + $0x5a8] sm:$0xff] %v1359_v53 }
  0xc8   : > { %1362 = vst [vmem:[%s6516_s7 + $0x5b0] sm:$0xff] %v1361_v54  ;;  %v1363_v55 = vld [vmem:[%s6508_s6 + $0x16e0] sm:$0xff] }
  0xc9   : > { %v1365_v56 = vld [vmem:[%s6508_s6 + $0x1700] sm:$0xff]  ;;  %1364 = vst [vmem:[%s6516_s7 + $0x5b8] sm:$0xff] %v1363_v55 }
  0xca   : > { %v1367_v57 = vld [vmem:[%s6508_s6 + $0x1720] sm:$0xff]  ;;  %1366 = vst [vmem:[%s6516_s7 + $0x5c0] sm:$0xff] %v1365_v56 }
  0xcb   : > { %1368 = vst [vmem:[%s6516_s7 + $0x5c8] sm:$0xff] %v1367_v57  ;;  %v1369_v58 = vld [vmem:[%s6508_s6 + $0x1740] sm:$0xff] }
  0xcc   : > { %v1371_v59 = vld [vmem:[%s6508_s6 + $0x1760] sm:$0xff]  ;;  %1370 = vst [vmem:[%s6516_s7 + $0x5d0] sm:$0xff] %v1369_v58 }
  0xcd   : > { %v1373_v60 = vld [vmem:[%s6508_s6 + $0x1780] sm:$0xff]  ;;  %1372 = vst [vmem:[%s6516_s7 + $0x5d8] sm:$0xff] %v1371_v59 }
  0xce   : > { %1374 = vst [vmem:[%s6516_s7 + $0x5e0] sm:$0xff] %v1373_v60  ;;  %v1375_v61 = vld [vmem:[%s6508_s6 + $0x17a0] sm:$0xff] }
  0xcf   : > { %v1377_v62 = vld [vmem:[%s6508_s6 + $0x17c0] sm:$0xff]  ;;  %1376 = vst [vmem:[%s6516_s7 + $0x5e8] sm:$0xff] %v1375_v61 }
  0xd0   : > { %v1379_v63 = vld [vmem:[%s6508_s6 + $0x17e0] sm:$0xff]  ;;  %1378 = vst [vmem:[%s6516_s7 + $0x5f0] sm:$0xff] %v1377_v62 }
  0xd1   : > { %1380 = vst [vmem:[%s6516_s7 + $0x5f8] sm:$0xff] %v1379_v63  ;;  %v1381_v0 = vld [vmem:[%s6508_s6 + $0x1800] sm:$0xff] }
  0xd2   : > { %v1383_v1 = vld [vmem:[%s6508_s6 + $0x1820] sm:$0xff]  ;;  %1382 = vst [vmem:[%s6516_s7 + $0x600] sm:$0xff] %v1381_v0 }
  0xd3   : > { %v1385_v2 = vld [vmem:[%s6508_s6 + $0x1840] sm:$0xff]  ;;  %1384 = vst [vmem:[%s6516_s7 + $0x608] sm:$0xff] %v1383_v1 }
  0xd4   : > { %1386 = vst [vmem:[%s6516_s7 + $0x610] sm:$0xff] %v1385_v2  ;;  %v1387_v3 = vld [vmem:[%s6508_s6 + $0x1860] sm:$0xff] }
  0xd5   : > { %v1389_v4 = vld [vmem:[%s6508_s6 + $0x1880] sm:$0xff]  ;;  %1388 = vst [vmem:[%s6516_s7 + $0x618] sm:$0xff] %v1387_v3 }
  0xd6   : > { %v1391_v5 = vld [vmem:[%s6508_s6 + $0x18a0] sm:$0xff]  ;;  %1390 = vst [vmem:[%s6516_s7 + $0x620] sm:$0xff] %v1389_v4 }
  0xd7   : > { %1392 = vst [vmem:[%s6516_s7 + $0x628] sm:$0xff] %v1391_v5  ;;  %v1393_v6 = vld [vmem:[%s6508_s6 + $0x18c0] sm:$0xff] }
  0xd8   : > { %v1395_v7 = vld [vmem:[%s6508_s6 + $0x18e0] sm:$0xff]  ;;  %1394 = vst [vmem:[%s6516_s7 + $0x630] sm:$0xff] %v1393_v6 }
  0xd9   : > { %v1397_v8 = vld [vmem:[%s6508_s6 + $0x1900] sm:$0xff]  ;;  %1396 = vst [vmem:[%s6516_s7 + $0x638] sm:$0xff] %v1395_v7 }
  0xda   : > { %1398 = vst [vmem:[%s6516_s7 + $0x640] sm:$0xff] %v1397_v8  ;;  %v1399_v9 = vld [vmem:[%s6508_s6 + $0x1920] sm:$0xff] }
  0xdb   : > { %v1401_v10 = vld [vmem:[%s6508_s6 + $0x1940] sm:$0xff]  ;;  %1400 = vst [vmem:[%s6516_s7 + $0x648] sm:$0xff] %v1399_v9 }
  0xdc   : > { %v1403_v11 = vld [vmem:[%s6508_s6 + $0x1960] sm:$0xff]  ;;  %1402 = vst [vmem:[%s6516_s7 + $0x650] sm:$0xff] %v1401_v10 }
  0xdd   : > { %1404 = vst [vmem:[%s6516_s7 + $0x658] sm:$0xff] %v1403_v11  ;;  %v1405_v12 = vld [vmem:[%s6508_s6 + $0x1980] sm:$0xff] }
  0xde   : > { %v1407_v13 = vld [vmem:[%s6508_s6 + $0x19a0] sm:$0xff]  ;;  %1406 = vst [vmem:[%s6516_s7 + $0x660] sm:$0xff] %v1405_v12 }
  0xdf   : > { %v1409_v14 = vld [vmem:[%s6508_s6 + $0x19c0] sm:$0xff]  ;;  %1408 = vst [vmem:[%s6516_s7 + $0x668] sm:$0xff] %v1407_v13 }
  0xe0   : > { %1410 = vst [vmem:[%s6516_s7 + $0x670] sm:$0xff] %v1409_v14  ;;  %v1411_v15 = vld [vmem:[%s6508_s6 + $0x19e0] sm:$0xff] }
  0xe1   : > { %v1413_v16 = vld [vmem:[%s6508_s6 + $0x1a00] sm:$0xff]  ;;  %1412 = vst [vmem:[%s6516_s7 + $0x678] sm:$0xff] %v1411_v15 }
  0xe2   : > { %v1415_v17 = vld [vmem:[%s6508_s6 + $0x1a20] sm:$0xff]  ;;  %1414 = vst [vmem:[%s6516_s7 + $0x680] sm:$0xff] %v1413_v16 }
  0xe3   : > { %1416 = vst [vmem:[%s6516_s7 + $0x688] sm:$0xff] %v1415_v17  ;;  %v1417_v18 = vld [vmem:[%s6508_s6 + $0x1a40] sm:$0xff] }
  0xe4   : > { %v1419_v19 = vld [vmem:[%s6508_s6 + $0x1a60] sm:$0xff]  ;;  %1418 = vst [vmem:[%s6516_s7 + $0x690] sm:$0xff] %v1417_v18 }
  0xe5   : > { %v1421_v20 = vld [vmem:[%s6508_s6 + $0x1a80] sm:$0xff]  ;;  %1420 = vst [vmem:[%s6516_s7 + $0x698] sm:$0xff] %v1419_v19 }
  0xe6   : > { %1422 = vst [vmem:[%s6516_s7 + $0x6a0] sm:$0xff] %v1421_v20  ;;  %v1423_v21 = vld [vmem:[%s6508_s6 + $0x1aa0] sm:$0xff] }
  0xe7   : > { %v1425_v22 = vld [vmem:[%s6508_s6 + $0x1ac0] sm:$0xff]  ;;  %1424 = vst [vmem:[%s6516_s7 + $0x6a8] sm:$0xff] %v1423_v21 }
  0xe8   : > { %v1427_v23 = vld [vmem:[%s6508_s6 + $0x1ae0] sm:$0xff]  ;;  %1426 = vst [vmem:[%s6516_s7 + $0x6b0] sm:$0xff] %v1425_v22 }
  0xe9   : > { %1428 = vst [vmem:[%s6516_s7 + $0x6b8] sm:$0xff] %v1427_v23  ;;  %v1429_v24 = vld [vmem:[%s6508_s6 + $0x1b00] sm:$0xff] }
  0xea   : > { %v1431_v25 = vld [vmem:[%s6508_s6 + $0x1b20] sm:$0xff]  ;;  %1430 = vst [vmem:[%s6516_s7 + $0x6c0] sm:$0xff] %v1429_v24 }
  0xeb   : > { %v1433_v26 = vld [vmem:[%s6508_s6 + $0x1b40] sm:$0xff]  ;;  %1432 = vst [vmem:[%s6516_s7 + $0x6c8] sm:$0xff] %v1431_v25 }
  0xec   : > { %1434 = vst [vmem:[%s6516_s7 + $0x6d0] sm:$0xff] %v1433_v26  ;;  %v1435_v27 = vld [vmem:[%s6508_s6 + $0x1b60] sm:$0xff] }
  0xed   : > { %v1437_v28 = vld [vmem:[%s6508_s6 + $0x1b80] sm:$0xff]  ;;  %1436 = vst [vmem:[%s6516_s7 + $0x6d8] sm:$0xff] %v1435_v27 }
  0xee   : > { %v1439_v29 = vld [vmem:[%s6508_s6 + $0x1ba0] sm:$0xff]  ;;  %1438 = vst [vmem:[%s6516_s7 + $0x6e0] sm:$0xff] %v1437_v28 }
  0xef   : > { %1440 = vst [vmem:[%s6516_s7 + $0x6e8] sm:$0xff] %v1439_v29  ;;  %v1441_v30 = vld [vmem:[%s6508_s6 + $0x1bc0] sm:$0xff] }
  0xf0   : > { %v1443_v31 = vld [vmem:[%s6508_s6 + $0x1be0] sm:$0xff]  ;;  %1442 = vst [vmem:[%s6516_s7 + $0x6f0] sm:$0xff] %v1441_v30 }
  0xf1   : > { %v1445_v32 = vld [vmem:[%s6508_s6 + $0x1c00] sm:$0xff]  ;;  %1444 = vst [vmem:[%s6516_s7 + $0x6f8] sm:$0xff] %v1443_v31 }
  0xf2   : > { %1446 = vst [vmem:[%s6516_s7 + $0x700] sm:$0xff] %v1445_v32  ;;  %v1447_v33 = vld [vmem:[%s6508_s6 + $0x1c20] sm:$0xff] }
  0xf3   : > { %v1449_v34 = vld [vmem:[%s6508_s6 + $0x1c40] sm:$0xff]  ;;  %1448 = vst [vmem:[%s6516_s7 + $0x708] sm:$0xff] %v1447_v33 }
  0xf4   : > { %v1451_v35 = vld [vmem:[%s6508_s6 + $0x1c60] sm:$0xff]  ;;  %1450 = vst [vmem:[%s6516_s7 + $0x710] sm:$0xff] %v1449_v34 }
  0xf5   : > { %1452 = vst [vmem:[%s6516_s7 + $0x718] sm:$0xff] %v1451_v35  ;;  %v1453_v36 = vld [vmem:[%s6508_s6 + $0x1c80] sm:$0xff] }
  0xf6   : > { %v1455_v37 = vld [vmem:[%s6508_s6 + $0x1ca0] sm:$0xff]  ;;  %1454 = vst [vmem:[%s6516_s7 + $0x720] sm:$0xff] %v1453_v36 }
  0xf7   : > { %v1457_v38 = vld [vmem:[%s6508_s6 + $0x1cc0] sm:$0xff]  ;;  %1456 = vst [vmem:[%s6516_s7 + $0x728] sm:$0xff] %v1455_v37 }
  0xf8   : > { %1458 = vst [vmem:[%s6516_s7 + $0x730] sm:$0xff] %v1457_v38  ;;  %v1459_v39 = vld [vmem:[%s6508_s6 + $0x1ce0] sm:$0xff] }
  0xf9   : > { %v1461_v40 = vld [vmem:[%s6508_s6 + $0x1d00] sm:$0xff]  ;;  %1460 = vst [vmem:[%s6516_s7 + $0x738] sm:$0xff] %v1459_v39 }
  0xfa   : > { %v1463_v41 = vld [vmem:[%s6508_s6 + $0x1d20] sm:$0xff]  ;;  %1462 = vst [vmem:[%s6516_s7 + $0x740] sm:$0xff] %v1461_v40 }
  0xfb   : > { %1464 = vst [vmem:[%s6516_s7 + $0x748] sm:$0xff] %v1463_v41  ;;  %v1465_v42 = vld [vmem:[%s6508_s6 + $0x1d40] sm:$0xff] }
  0xfc   : > { %v1467_v43 = vld [vmem:[%s6508_s6 + $0x1d60] sm:$0xff]  ;;  %1466 = vst [vmem:[%s6516_s7 + $0x750] sm:$0xff] %v1465_v42 }
  0xfd   : > { %v1469_v44 = vld [vmem:[%s6508_s6 + $0x1d80] sm:$0xff]  ;;  %1468 = vst [vmem:[%s6516_s7 + $0x758] sm:$0xff] %v1467_v43 }
  0xfe   : > { %1470 = vst [vmem:[%s6516_s7 + $0x760] sm:$0xff] %v1469_v44  ;;  %v1471_v45 = vld [vmem:[%s6508_s6 + $0x1da0] sm:$0xff] }
  0xff   : > { %v1473_v46 = vld [vmem:[%s6508_s6 + $0x1dc0] sm:$0xff]  ;;  %1472 = vst [vmem:[%s6516_s7 + $0x768] sm:$0xff] %v1471_v45 }
 0x100   : > { %v1475_v47 = vld [vmem:[%s6508_s6 + $0x1de0] sm:$0xff]  ;;  %1474 = vst [vmem:[%s6516_s7 + $0x770] sm:$0xff] %v1473_v46 }
 0x101   : > { %1476 = vst [vmem:[%s6516_s7 + $0x778] sm:$0xff] %v1475_v47  ;;  %v1477_v48 = vld [vmem:[%s6508_s6 + $0x1e00] sm:$0xff] }
 0x102   : > { %v1479_v49 = vld [vmem:[%s6508_s6 + $0x1e20] sm:$0xff]  ;;  %1478 = vst [vmem:[%s6516_s7 + $0x780] sm:$0xff] %v1477_v48 }
 0x103   : > { %v1481_v50 = vld [vmem:[%s6508_s6 + $0x1e40] sm:$0xff]  ;;  %1480 = vst [vmem:[%s6516_s7 + $0x788] sm:$0xff] %v1479_v49 }
 0x104   : > { %1482 = vst [vmem:[%s6516_s7 + $0x790] sm:$0xff] %v1481_v50  ;;  %v1483_v51 = vld [vmem:[%s6508_s6 + $0x1e60] sm:$0xff] }
 0x105   : > { %v1485_v52 = vld [vmem:[%s6508_s6 + $0x1e80] sm:$0xff]  ;;  %1484 = vst [vmem:[%s6516_s7 + $0x798] sm:$0xff] %v1483_v51 }
 0x106   : > { %v1487_v53 = vld [vmem:[%s6508_s6 + $0x1ea0] sm:$0xff]  ;;  %1486 = vst [vmem:[%s6516_s7 + $0x7a0] sm:$0xff] %v1485_v52 }
 0x107   : > { %1488 = vst [vmem:[%s6516_s7 + $0x7a8] sm:$0xff] %v1487_v53  ;;  %v1489_v54 = vld [vmem:[%s6508_s6 + $0x1ec0] sm:$0xff] }
 0x108   : > { %v1491_v55 = vld [vmem:[%s6508_s6 + $0x1ee0] sm:$0xff]  ;;  %1490 = vst [vmem:[%s6516_s7 + $0x7b0] sm:$0xff] %v1489_v54 }
 0x109   : > { %v1493_v56 = vld [vmem:[%s6508_s6 + $0x1f00] sm:$0xff]  ;;  %1492 = vst [vmem:[%s6516_s7 + $0x7b8] sm:$0xff] %v1491_v55 }
 0x10a   : > { %1494 = vst [vmem:[%s6516_s7 + $0x7c0] sm:$0xff] %v1493_v56  ;;  %v1495_v57 = vld [vmem:[%s6508_s6 + $0x1f20] sm:$0xff] }
 0x10b   : > { %v1497_v58 = vld [vmem:[%s6508_s6 + $0x1f40] sm:$0xff]  ;;  %1496 = vst [vmem:[%s6516_s7 + $0x7c8] sm:$0xff] %v1495_v57 }
 0x10c   : > { %v1499_v59 = vld [vmem:[%s6508_s6 + $0x1f60] sm:$0xff]  ;;  %1498 = vst [vmem:[%s6516_s7 + $0x7d0] sm:$0xff] %v1497_v58 }
 0x10d   : > { %1500 = vst [vmem:[%s6516_s7 + $0x7d8] sm:$0xff] %v1499_v59  ;;  %v1501_v60 = vld [vmem:[%s6508_s6 + $0x1f80] sm:$0xff] }
 0x10e   : > { %v1503_v61 = vld [vmem:[%s6508_s6 + $0x1fa0] sm:$0xff]  ;;  %1502 = vst [vmem:[%s6516_s7 + $0x7e0] sm:$0xff] %v1501_v60 }
 0x10f   : > { %v1505_v62 = vld [vmem:[%s6508_s6 + $0x1fc0] sm:$0xff]  ;;  %1504 = vst [vmem:[%s6516_s7 + $0x7e8] sm:$0xff] %v1503_v61 }
 0x110   : > { %1506 = vst [vmem:[%s6516_s7 + $0x7f0] sm:$0xff] %v1505_v62  ;;  %v1507_v63 = vld [vmem:[%s6508_s6 + $0x1fe0] sm:$0xff] }
 0x111   : > { %v1509_v0 = vld [vmem:[%s6508_s6 + $0x2000] sm:$0xff]  ;;  %1508 = vst [vmem:[%s6516_s7 + $0x7f8] sm:$0xff] %v1507_v63 }
 0x112   : > { %v1511_v1 = vld [vmem:[%s6508_s6 + $0x2020] sm:$0xff]  ;;  %1510 = vst [vmem:[%s6516_s7 + $0x800] sm:$0xff] %v1509_v0 }
 0x113   : > { %1512 = vst [vmem:[%s6516_s7 + $0x808] sm:$0xff] %v1511_v1  ;;  %v1513_v2 = vld [vmem:[%s6508_s6 + $0x2040] sm:$0xff] }
 0x114   : > { %v1515_v3 = vld [vmem:[%s6508_s6 + $0x2060] sm:$0xff]  ;;  %1514 = vst [vmem:[%s6516_s7 + $0x810] sm:$0xff] %v1513_v2 }
 0x115   : > { %v1517_v4 = vld [vmem:[%s6508_s6 + $0x2080] sm:$0xff]  ;;  %1516 = vst [vmem:[%s6516_s7 + $0x818] sm:$0xff] %v1515_v3 }
 0x116   : > { %1518 = vst [vmem:[%s6516_s7 + $0x820] sm:$0xff] %v1517_v4  ;;  %v1519_v5 = vld [vmem:[%s6508_s6 + $0x20a0] sm:$0xff] }
 0x117   : > { %v1521_v6 = vld [vmem:[%s6508_s6 + $0x20c0] sm:$0xff]  ;;  %1520 = vst [vmem:[%s6516_s7 + $0x828] sm:$0xff] %v1519_v5 }
 0x118   : > { %v1523_v7 = vld [vmem:[%s6508_s6 + $0x20e0] sm:$0xff]  ;;  %1522 = vst [vmem:[%s6516_s7 + $0x830] sm:$0xff] %v1521_v6 }
 0x119   : > { %1524 = vst [vmem:[%s6516_s7 + $0x838] sm:$0xff] %v1523_v7  ;;  %v1525_v8 = vld [vmem:[%s6508_s6 + $0x2100] sm:$0xff] }
 0x11a   : > { %v1527_v9 = vld [vmem:[%s6508_s6 + $0x2120] sm:$0xff]  ;;  %1526 = vst [vmem:[%s6516_s7 + $0x840] sm:$0xff] %v1525_v8 }
 0x11b   : > { %v1529_v10 = vld [vmem:[%s6508_s6 + $0x2140] sm:$0xff]  ;;  %1528 = vst [vmem:[%s6516_s7 + $0x848] sm:$0xff] %v1527_v9 }
 0x11c   : > { %1530 = vst [vmem:[%s6516_s7 + $0x850] sm:$0xff] %v1529_v10  ;;  %v1531_v11 = vld [vmem:[%s6508_s6 + $0x2160] sm:$0xff] }
 0x11d   : > { %v1533_v12 = vld [vmem:[%s6508_s6 + $0x2180] sm:$0xff]  ;;  %1532 = vst [vmem:[%s6516_s7 + $0x858] sm:$0xff] %v1531_v11 }
 0x11e   : > { %v1535_v13 = vld [vmem:[%s6508_s6 + $0x21a0] sm:$0xff]  ;;  %1534 = vst [vmem:[%s6516_s7 + $0x860] sm:$0xff] %v1533_v12 }
 0x11f   : > { %1536 = vst [vmem:[%s6516_s7 + $0x868] sm:$0xff] %v1535_v13  ;;  %v1537_v14 = vld [vmem:[%s6508_s6 + $0x21c0] sm:$0xff] }
 0x120   : > { %v1539_v15 = vld [vmem:[%s6508_s6 + $0x21e0] sm:$0xff]  ;;  %1538 = vst [vmem:[%s6516_s7 + $0x870] sm:$0xff] %v1537_v14 }
 0x121   : > { %v1541_v16 = vld [vmem:[%s6508_s6 + $0x2200] sm:$0xff]  ;;  %1540 = vst [vmem:[%s6516_s7 + $0x878] sm:$0xff] %v1539_v15 }
 0x122   : > { %1542 = vst [vmem:[%s6516_s7 + $0x880] sm:$0xff] %v1541_v16  ;;  %v1543_v17 = vld [vmem:[%s6508_s6 + $0x2220] sm:$0xff] }
 0x123   : > { %v1545_v18 = vld [vmem:[%s6508_s6 + $0x2240] sm:$0xff]  ;;  %1544 = vst [vmem:[%s6516_s7 + $0x888] sm:$0xff] %v1543_v17 }
 0x124   : > { %v1547_v19 = vld [vmem:[%s6508_s6 + $0x2260] sm:$0xff]  ;;  %1546 = vst [vmem:[%s6516_s7 + $0x890] sm:$0xff] %v1545_v18 }
 0x125   : > { %1548 = vst [vmem:[%s6516_s7 + $0x898] sm:$0xff] %v1547_v19  ;;  %v1549_v20 = vld [vmem:[%s6508_s6 + $0x2280] sm:$0xff] }
 0x126   : > { %v1551_v21 = vld [vmem:[%s6508_s6 + $0x22a0] sm:$0xff]  ;;  %1550 = vst [vmem:[%s6516_s7 + $0x8a0] sm:$0xff] %v1549_v20 }
 0x127   : > { %v1553_v22 = vld [vmem:[%s6508_s6 + $0x22c0] sm:$0xff]  ;;  %1552 = vst [vmem:[%s6516_s7 + $0x8a8] sm:$0xff] %v1551_v21 }
 0x128   : > { %1554 = vst [vmem:[%s6516_s7 + $0x8b0] sm:$0xff] %v1553_v22  ;;  %v1555_v23 = vld [vmem:[%s6508_s6 + $0x22e0] sm:$0xff] }
 0x129   : > { %v1557_v24 = vld [vmem:[%s6508_s6 + $0x2300] sm:$0xff]  ;;  %1556 = vst [vmem:[%s6516_s7 + $0x8b8] sm:$0xff] %v1555_v23 }
 0x12a   : > { %v1559_v25 = vld [vmem:[%s6508_s6 + $0x2320] sm:$0xff]  ;;  %1558 = vst [vmem:[%s6516_s7 + $0x8c0] sm:$0xff] %v1557_v24 }
 0x12b   : > { %1560 = vst [vmem:[%s6516_s7 + $0x8c8] sm:$0xff] %v1559_v25  ;;  %v1561_v26 = vld [vmem:[%s6508_s6 + $0x2340] sm:$0xff] }
 0x12c   : > { %v1563_v27 = vld [vmem:[%s6508_s6 + $0x2360] sm:$0xff]  ;;  %1562 = vst [vmem:[%s6516_s7 + $0x8d0] sm:$0xff] %v1561_v26 }
 0x12d   : > { %v1565_v28 = vld [vmem:[%s6508_s6 + $0x2380] sm:$0xff]  ;;  %1564 = vst [vmem:[%s6516_s7 + $0x8d8] sm:$0xff] %v1563_v27 }
 0x12e   : > { %1566 = vst [vmem:[%s6516_s7 + $0x8e0] sm:$0xff] %v1565_v28  ;;  %v1567_v29 = vld [vmem:[%s6508_s6 + $0x23a0] sm:$0xff] }
 0x12f   : > { %v1569_v30 = vld [vmem:[%s6508_s6 + $0x23c0] sm:$0xff]  ;;  %1568 = vst [vmem:[%s6516_s7 + $0x8e8] sm:$0xff] %v1567_v29 }
 0x130   : > { %v1571_v31 = vld [vmem:[%s6508_s6 + $0x23e0] sm:$0xff]  ;;  %1570 = vst [vmem:[%s6516_s7 + $0x8f0] sm:$0xff] %v1569_v30 }
 0x131   : > { %1572 = vst [vmem:[%s6516_s7 + $0x8f8] sm:$0xff] %v1571_v31  ;;  %v1573_v32 = vld [vmem:[%s6508_s6 + $0x2400] sm:$0xff] }
 0x132   : > { %v1575_v33 = vld [vmem:[%s6508_s6 + $0x2420] sm:$0xff]  ;;  %1574 = vst [vmem:[%s6516_s7 + $0x900] sm:$0xff] %v1573_v32 }
 0x133   : > { %v1577_v34 = vld [vmem:[%s6508_s6 + $0x2440] sm:$0xff]  ;;  %1576 = vst [vmem:[%s6516_s7 + $0x908] sm:$0xff] %v1575_v33 }
 0x134   : > { %1578 = vst [vmem:[%s6516_s7 + $0x910] sm:$0xff] %v1577_v34  ;;  %v1579_v35 = vld [vmem:[%s6508_s6 + $0x2460] sm:$0xff] }
 0x135   : > { %v1581_v36 = vld [vmem:[%s6508_s6 + $0x2480] sm:$0xff]  ;;  %1580 = vst [vmem:[%s6516_s7 + $0x918] sm:$0xff] %v1579_v35 }
 0x136   : > { %v1583_v37 = vld [vmem:[%s6508_s6 + $0x24a0] sm:$0xff]  ;;  %1582 = vst [vmem:[%s6516_s7 + $0x920] sm:$0xff] %v1581_v36 }
 0x137   : > { %1584 = vst [vmem:[%s6516_s7 + $0x928] sm:$0xff] %v1583_v37  ;;  %v1585_v38 = vld [vmem:[%s6508_s6 + $0x24c0] sm:$0xff] }
 0x138   : > { %v1587_v39 = vld [vmem:[%s6508_s6 + $0x24e0] sm:$0xff]  ;;  %1586 = vst [vmem:[%s6516_s7 + $0x930] sm:$0xff] %v1585_v38 }
 0x139   : > { %v1589_v40 = vld [vmem:[%s6508_s6 + $0x2500] sm:$0xff]  ;;  %1588 = vst [vmem:[%s6516_s7 + $0x938] sm:$0xff] %v1587_v39 }
 0x13a   : > { %1590 = vst [vmem:[%s6516_s7 + $0x940] sm:$0xff] %v1589_v40  ;;  %v1591_v41 = vld [vmem:[%s6508_s6 + $0x2520] sm:$0xff] }
 0x13b   : > { %v1593_v42 = vld [vmem:[%s6508_s6 + $0x2540] sm:$0xff]  ;;  %1592 = vst [vmem:[%s6516_s7 + $0x948] sm:$0xff] %v1591_v41 }
 0x13c   : > { %v1595_v43 = vld [vmem:[%s6508_s6 + $0x2560] sm:$0xff]  ;;  %1594 = vst [vmem:[%s6516_s7 + $0x950] sm:$0xff] %v1593_v42 }
 0x13d   : > { %1596 = vst [vmem:[%s6516_s7 + $0x958] sm:$0xff] %v1595_v43  ;;  %v1597_v44 = vld [vmem:[%s6508_s6 + $0x2580] sm:$0xff] }
 0x13e   : > { %v1599_v45 = vld [vmem:[%s6508_s6 + $0x25a0] sm:$0xff]  ;;  %1598 = vst [vmem:[%s6516_s7 + $0x960] sm:$0xff] %v1597_v44 }
 0x13f   : > { %v1601_v46 = vld [vmem:[%s6508_s6 + $0x25c0] sm:$0xff]  ;;  %1600 = vst [vmem:[%s6516_s7 + $0x968] sm:$0xff] %v1599_v45 }
 0x140   : > { %1602 = vst [vmem:[%s6516_s7 + $0x970] sm:$0xff] %v1601_v46  ;;  %v1603_v47 = vld [vmem:[%s6508_s6 + $0x25e0] sm:$0xff] }
 0x141   : > { %v1605_v48 = vld [vmem:[%s6508_s6 + $0x2600] sm:$0xff]  ;;  %1604 = vst [vmem:[%s6516_s7 + $0x978] sm:$0xff] %v1603_v47 }
 0x142   : > { %v1607_v49 = vld [vmem:[%s6508_s6 + $0x2620] sm:$0xff]  ;;  %1606 = vst [vmem:[%s6516_s7 + $0x980] sm:$0xff] %v1605_v48 }
 0x143   : > { %1608 = vst [vmem:[%s6516_s7 + $0x988] sm:$0xff] %v1607_v49  ;;  %v1609_v50 = vld [vmem:[%s6508_s6 + $0x2640] sm:$0xff] }
 0x144   : > { %v1611_v51 = vld [vmem:[%s6508_s6 + $0x2660] sm:$0xff]  ;;  %1610 = vst [vmem:[%s6516_s7 + $0x990] sm:$0xff] %v1609_v50 }
 0x145   : > { %v1613_v52 = vld [vmem:[%s6508_s6 + $0x2680] sm:$0xff]  ;;  %1612 = vst [vmem:[%s6516_s7 + $0x998] sm:$0xff] %v1611_v51 }
 0x146   : > { %1614 = vst [vmem:[%s6516_s7 + $0x9a0] sm:$0xff] %v1613_v52  ;;  %v1615_v53 = vld [vmem:[%s6508_s6 + $0x26a0] sm:$0xff] }
 0x147   : > { %v1617_v54 = vld [vmem:[%s6508_s6 + $0x26c0] sm:$0xff]  ;;  %1616 = vst [vmem:[%s6516_s7 + $0x9a8] sm:$0xff] %v1615_v53 }
 0x148   : > { %v1619_v55 = vld [vmem:[%s6508_s6 + $0x26e0] sm:$0xff]  ;;  %1618 = vst [vmem:[%s6516_s7 + $0x9b0] sm:$0xff] %v1617_v54 }
 0x149   : > { %1620 = vst [vmem:[%s6516_s7 + $0x9b8] sm:$0xff] %v1619_v55  ;;  %v1621_v56 = vld [vmem:[%s6508_s6 + $0x2700] sm:$0xff] }
 0x14a   : > { %v1623_v57 = vld [vmem:[%s6508_s6 + $0x2720] sm:$0xff]  ;;  %1622 = vst [vmem:[%s6516_s7 + $0x9c0] sm:$0xff] %v1621_v56 }
 0x14b   : > { %v1625_v58 = vld [vmem:[%s6508_s6 + $0x2740] sm:$0xff]  ;;  %1624 = vst [vmem:[%s6516_s7 + $0x9c8] sm:$0xff] %v1623_v57 }
 0x14c   : > { %1626 = vst [vmem:[%s6516_s7 + $0x9d0] sm:$0xff] %v1625_v58  ;;  %v1627_v59 = vld [vmem:[%s6508_s6 + $0x2760] sm:$0xff] }
 0x14d   : > { %v1629_v60 = vld [vmem:[%s6508_s6 + $0x2780] sm:$0xff]  ;;  %1628 = vst [vmem:[%s6516_s7 + $0x9d8] sm:$0xff] %v1627_v59 }
 0x14e   : > { %v1631_v61 = vld [vmem:[%s6508_s6 + $0x27a0] sm:$0xff]  ;;  %1630 = vst [vmem:[%s6516_s7 + $0x9e0] sm:$0xff] %v1629_v60 }
 0x14f   : > { %1632 = vst [vmem:[%s6516_s7 + $0x9e8] sm:$0xff] %v1631_v61  ;;  %v1633_v62 = vld [vmem:[%s6508_s6 + $0x27c0] sm:$0xff] }
 0x150   : > { %v1635_v63 = vld [vmem:[%s6508_s6 + $0x27e0] sm:$0xff]  ;;  %1634 = vst [vmem:[%s6516_s7 + $0x9f0] sm:$0xff] %v1633_v62 }
 0x151   : > { %v1637_v0 = vld [vmem:[%s6508_s6 + $0x2800] sm:$0xff]  ;;  %1636 = vst [vmem:[%s6516_s7 + $0x9f8] sm:$0xff] %v1635_v63 }
 0x152   : > { %1638 = vst [vmem:[%s6516_s7 + $0xa00] sm:$0xff] %v1637_v0  ;;  %v1639_v1 = vld [vmem:[%s6508_s6 + $0x2820] sm:$0xff] }
 0x153   : > { %v1641_v2 = vld [vmem:[%s6508_s6 + $0x2840] sm:$0xff]  ;;  %1640 = vst [vmem:[%s6516_s7 + $0xa08] sm:$0xff] %v1639_v1 }
 0x154   : > { %v1643_v3 = vld [vmem:[%s6508_s6 + $0x2860] sm:$0xff]  ;;  %1642 = vst [vmem:[%s6516_s7 + $0xa10] sm:$0xff] %v1641_v2 }
 0x155   : > { %1644 = vst [vmem:[%s6516_s7 + $0xa18] sm:$0xff] %v1643_v3  ;;  %v1645_v4 = vld [vmem:[%s6508_s6 + $0x2880] sm:$0xff] }
 0x156   : > { %v1647_v5 = vld [vmem:[%s6508_s6 + $0x28a0] sm:$0xff]  ;;  %1646 = vst [vmem:[%s6516_s7 + $0xa20] sm:$0xff] %v1645_v4 }
 0x157   : > { %v1649_v6 = vld [vmem:[%s6508_s6 + $0x28c0] sm:$0xff]  ;;  %1648 = vst [vmem:[%s6516_s7 + $0xa28] sm:$0xff] %v1647_v5 }
 0x158   : > { %1650 = vst [vmem:[%s6516_s7 + $0xa30] sm:$0xff] %v1649_v6  ;;  %v1651_v7 = vld [vmem:[%s6508_s6 + $0x28e0] sm:$0xff] }
 0x159   : > { %v1653_v8 = vld [vmem:[%s6508_s6 + $0x2900] sm:$0xff]  ;;  %1652 = vst [vmem:[%s6516_s7 + $0xa38] sm:$0xff] %v1651_v7 }
 0x15a   : > { %v1655_v9 = vld [vmem:[%s6508_s6 + $0x2920] sm:$0xff]  ;;  %1654 = vst [vmem:[%s6516_s7 + $0xa40] sm:$0xff] %v1653_v8 }
 0x15b   : > { %1656 = vst [vmem:[%s6516_s7 + $0xa48] sm:$0xff] %v1655_v9  ;;  %v1657_v10 = vld [vmem:[%s6508_s6 + $0x2940] sm:$0xff] }
 0x15c   : > { %v1659_v11 = vld [vmem:[%s6508_s6 + $0x2960] sm:$0xff]  ;;  %1658 = vst [vmem:[%s6516_s7 + $0xa50] sm:$0xff] %v1657_v10 }
 0x15d   : > { %v1661_v12 = vld [vmem:[%s6508_s6 + $0x2980] sm:$0xff]  ;;  %1660 = vst [vmem:[%s6516_s7 + $0xa58] sm:$0xff] %v1659_v11 }
 0x15e   : > { %1662 = vst [vmem:[%s6516_s7 + $0xa60] sm:$0xff] %v1661_v12  ;;  %v1663_v13 = vld [vmem:[%s6508_s6 + $0x29a0] sm:$0xff] }
 0x15f   : > { %v1665_v14 = vld [vmem:[%s6508_s6 + $0x29c0] sm:$0xff]  ;;  %1664 = vst [vmem:[%s6516_s7 + $0xa68] sm:$0xff] %v1663_v13 }
 0x160   : > { %v1667_v15 = vld [vmem:[%s6508_s6 + $0x29e0] sm:$0xff]  ;;  %1666 = vst [vmem:[%s6516_s7 + $0xa70] sm:$0xff] %v1665_v14 }
 0x161   : > { %1668 = vst [vmem:[%s6516_s7 + $0xa78] sm:$0xff] %v1667_v15  ;;  %v1669_v16 = vld [vmem:[%s6508_s6 + $0x2a00] sm:$0xff] }
 0x162   : > { %v1671_v17 = vld [vmem:[%s6508_s6 + $0x2a20] sm:$0xff]  ;;  %1670 = vst [vmem:[%s6516_s7 + $0xa80] sm:$0xff] %v1669_v16 }
 0x163   : > { %v1673_v18 = vld [vmem:[%s6508_s6 + $0x2a40] sm:$0xff]  ;;  %1672 = vst [vmem:[%s6516_s7 + $0xa88] sm:$0xff] %v1671_v17 }
 0x164   : > { %1674 = vst [vmem:[%s6516_s7 + $0xa90] sm:$0xff] %v1673_v18  ;;  %v1675_v19 = vld [vmem:[%s6508_s6 + $0x2a60] sm:$0xff] }
 0x165   : > { %v1677_v20 = vld [vmem:[%s6508_s6 + $0x2a80] sm:$0xff]  ;;  %1676 = vst [vmem:[%s6516_s7 + $0xa98] sm:$0xff] %v1675_v19 }
 0x166   : > { %v1679_v21 = vld [vmem:[%s6508_s6 + $0x2aa0] sm:$0xff]  ;;  %1678 = vst [vmem:[%s6516_s7 + $0xaa0] sm:$0xff] %v1677_v20 }
 0x167   : > { %1680 = vst [vmem:[%s6516_s7 + $0xaa8] sm:$0xff] %v1679_v21  ;;  %v1681_v22 = vld [vmem:[%s6508_s6 + $0x2ac0] sm:$0xff] }
 0x168   : > { %v1683_v23 = vld [vmem:[%s6508_s6 + $0x2ae0] sm:$0xff]  ;;  %1682 = vst [vmem:[%s6516_s7 + $0xab0] sm:$0xff] %v1681_v22 }
 0x169   : > { %v1685_v24 = vld [vmem:[%s6508_s6 + $0x2b00] sm:$0xff]  ;;  %1684 = vst [vmem:[%s6516_s7 + $0xab8] sm:$0xff] %v1683_v23 }
 0x16a   : > { %1686 = vst [vmem:[%s6516_s7 + $0xac0] sm:$0xff] %v1685_v24  ;;  %v1687_v25 = vld [vmem:[%s6508_s6 + $0x2b20] sm:$0xff] }
 0x16b   : > { %v1689_v26 = vld [vmem:[%s6508_s6 + $0x2b40] sm:$0xff]  ;;  %1688 = vst [vmem:[%s6516_s7 + $0xac8] sm:$0xff] %v1687_v25 }
 0x16c   : > { %v1691_v27 = vld [vmem:[%s6508_s6 + $0x2b60] sm:$0xff]  ;;  %1690 = vst [vmem:[%s6516_s7 + $0xad0] sm:$0xff] %v1689_v26 }
 0x16d   : > { %1692 = vst [vmem:[%s6516_s7 + $0xad8] sm:$0xff] %v1691_v27  ;;  %v1693_v28 = vld [vmem:[%s6508_s6 + $0x2b80] sm:$0xff] }
 0x16e   : > { %v1695_v29 = vld [vmem:[%s6508_s6 + $0x2ba0] sm:$0xff]  ;;  %1694 = vst [vmem:[%s6516_s7 + $0xae0] sm:$0xff] %v1693_v28 }
 0x16f   : > { %v1697_v30 = vld [vmem:[%s6508_s6 + $0x2bc0] sm:$0xff]  ;;  %1696 = vst [vmem:[%s6516_s7 + $0xae8] sm:$0xff] %v1695_v29 }
 0x170   : > { %1698 = vst [vmem:[%s6516_s7 + $0xaf0] sm:$0xff] %v1697_v30  ;;  %v1699_v31 = vld [vmem:[%s6508_s6 + $0x2be0] sm:$0xff] }
 0x171   : > { %v1701_v32 = vld [vmem:[%s6508_s6 + $0x2c00] sm:$0xff]  ;;  %1700 = vst [vmem:[%s6516_s7 + $0xaf8] sm:$0xff] %v1699_v31 }
 0x172   : > { %v1703_v33 = vld [vmem:[%s6508_s6 + $0x2c20] sm:$0xff]  ;;  %1702 = vst [vmem:[%s6516_s7 + $0xb00] sm:$0xff] %v1701_v32 }
 0x173   : > { %1704 = vst [vmem:[%s6516_s7 + $0xb08] sm:$0xff] %v1703_v33  ;;  %v1705_v34 = vld [vmem:[%s6508_s6 + $0x2c40] sm:$0xff] }
 0x174   : > { %v1707_v35 = vld [vmem:[%s6508_s6 + $0x2c60] sm:$0xff]  ;;  %1706 = vst [vmem:[%s6516_s7 + $0xb10] sm:$0xff] %v1705_v34 }
 0x175   : > { %v1709_v36 = vld [vmem:[%s6508_s6 + $0x2c80] sm:$0xff]  ;;  %1708 = vst [vmem:[%s6516_s7 + $0xb18] sm:$0xff] %v1707_v35 }
 0x176   : > { %1710 = vst [vmem:[%s6516_s7 + $0xb20] sm:$0xff] %v1709_v36  ;;  %v1711_v37 = vld [vmem:[%s6508_s6 + $0x2ca0] sm:$0xff] }
 0x177   : > { %v1713_v38 = vld [vmem:[%s6508_s6 + $0x2cc0] sm:$0xff]  ;;  %1712 = vst [vmem:[%s6516_s7 + $0xb28] sm:$0xff] %v1711_v37 }
 0x178   : > { %v1715_v39 = vld [vmem:[%s6508_s6 + $0x2ce0] sm:$0xff]  ;;  %1714 = vst [vmem:[%s6516_s7 + $0xb30] sm:$0xff] %v1713_v38 }
 0x179   : > { %1716 = vst [vmem:[%s6516_s7 + $0xb38] sm:$0xff] %v1715_v39  ;;  %v1717_v40 = vld [vmem:[%s6508_s6 + $0x2d00] sm:$0xff] }
 0x17a   : > { %v1719_v41 = vld [vmem:[%s6508_s6 + $0x2d20] sm:$0xff]  ;;  %1718 = vst [vmem:[%s6516_s7 + $0xb40] sm:$0xff] %v1717_v40 }
 0x17b   : > { %v1721_v42 = vld [vmem:[%s6508_s6 + $0x2d40] sm:$0xff]  ;;  %1720 = vst [vmem:[%s6516_s7 + $0xb48] sm:$0xff] %v1719_v41 }
 0x17c   : > { %1722 = vst [vmem:[%s6516_s7 + $0xb50] sm:$0xff] %v1721_v42  ;;  %v1723_v43 = vld [vmem:[%s6508_s6 + $0x2d60] sm:$0xff] }
 0x17d   : > { %v1725_v44 = vld [vmem:[%s6508_s6 + $0x2d80] sm:$0xff]  ;;  %1724 = vst [vmem:[%s6516_s7 + $0xb58] sm:$0xff] %v1723_v43 }
 0x17e   : > { %v1727_v45 = vld [vmem:[%s6508_s6 + $0x2da0] sm:$0xff]  ;;  %1726 = vst [vmem:[%s6516_s7 + $0xb60] sm:$0xff] %v1725_v44 }
 0x17f   : > { %1728 = vst [vmem:[%s6516_s7 + $0xb68] sm:$0xff] %v1727_v45  ;;  %v1729_v46 = vld [vmem:[%s6508_s6 + $0x2dc0] sm:$0xff] }
 0x180   : > { %v1731_v47 = vld [vmem:[%s6508_s6 + $0x2de0] sm:$0xff]  ;;  %1730 = vst [vmem:[%s6516_s7 + $0xb70] sm:$0xff] %v1729_v46 }
 0x181   : > { %v1733_v48 = vld [vmem:[%s6508_s6 + $0x2e00] sm:$0xff]  ;;  %1732 = vst [vmem:[%s6516_s7 + $0xb78] sm:$0xff] %v1731_v47 }
 0x182   : > { %1734 = vst [vmem:[%s6516_s7 + $0xb80] sm:$0xff] %v1733_v48  ;;  %v1735_v49 = vld [vmem:[%s6508_s6 + $0x2e20] sm:$0xff] }
 0x183   : > { %v1737_v50 = vld [vmem:[%s6508_s6 + $0x2e40] sm:$0xff]  ;;  %1736 = vst [vmem:[%s6516_s7 + $0xb88] sm:$0xff] %v1735_v49 }
 0x184   : > { %v1739_v51 = vld [vmem:[%s6508_s6 + $0x2e60] sm:$0xff]  ;;  %1738 = vst [vmem:[%s6516_s7 + $0xb90] sm:$0xff] %v1737_v50 }
 0x185   : > { %1740 = vst [vmem:[%s6516_s7 + $0xb98] sm:$0xff] %v1739_v51  ;;  %v1741_v52 = vld [vmem:[%s6508_s6 + $0x2e80] sm:$0xff] }
 0x186   : > { %v1743_v53 = vld [vmem:[%s6508_s6 + $0x2ea0] sm:$0xff]  ;;  %1742 = vst [vmem:[%s6516_s7 + $0xba0] sm:$0xff] %v1741_v52 }
 0x187   : > { %v1745_v54 = vld [vmem:[%s6508_s6 + $0x2ec0] sm:$0xff]  ;;  %1744 = vst [vmem:[%s6516_s7 + $0xba8] sm:$0xff] %v1743_v53 }
 0x188   : > { %1746 = vst [vmem:[%s6516_s7 + $0xbb0] sm:$0xff] %v1745_v54  ;;  %v1747_v55 = vld [vmem:[%s6508_s6 + $0x2ee0] sm:$0xff] }
 0x189   : > { %v1749_v56 = vld [vmem:[%s6508_s6 + $0x2f00] sm:$0xff]  ;;  %1748 = vst [vmem:[%s6516_s7 + $0xbb8] sm:$0xff] %v1747_v55 }
 0x18a   : > { %v1751_v57 = vld [vmem:[%s6508_s6 + $0x2f20] sm:$0xff]  ;;  %1750 = vst [vmem:[%s6516_s7 + $0xbc0] sm:$0xff] %v1749_v56 }
 0x18b   : > { %1752 = vst [vmem:[%s6516_s7 + $0xbc8] sm:$0xff] %v1751_v57  ;;  %v1753_v58 = vld [vmem:[%s6508_s6 + $0x2f40] sm:$0xff] }
 0x18c   : > { %v1755_v59 = vld [vmem:[%s6508_s6 + $0x2f60] sm:$0xff]  ;;  %1754 = vst [vmem:[%s6516_s7 + $0xbd0] sm:$0xff] %v1753_v58 }
 0x18d   : > { %v1757_v60 = vld [vmem:[%s6508_s6 + $0x2f80] sm:$0xff]  ;;  %1756 = vst [vmem:[%s6516_s7 + $0xbd8] sm:$0xff] %v1755_v59 }
 0x18e   : > { %1758 = vst [vmem:[%s6516_s7 + $0xbe0] sm:$0xff] %v1757_v60  ;;  %v1759_v61 = vld [vmem:[%s6508_s6 + $0x2fa0] sm:$0xff] }
 0x18f   : > { %v1761_v62 = vld [vmem:[%s6508_s6 + $0x2fc0] sm:$0xff]  ;;  %1760 = vst [vmem:[%s6516_s7 + $0xbe8] sm:$0xff] %v1759_v61 }
 0x190   : > { %v1763_v63 = vld [vmem:[%s6508_s6 + $0x2fe0] sm:$0xff]  ;;  %1762 = vst [vmem:[%s6516_s7 + $0xbf0] sm:$0xff] %v1761_v62 }
 0x191   : > { %1764 = vst [vmem:[%s6516_s7 + $0xbf8] sm:$0xff] %v1763_v63  ;;  %v1765_v0 = vld [vmem:[%s6508_s6 + $0x3000] sm:$0xff] }
 0x192   : > { %v1767_v1 = vld [vmem:[%s6508_s6 + $0x3020] sm:$0xff]  ;;  %1766 = vst [vmem:[%s6516_s7 + $0xc00] sm:$0xff] %v1765_v0 }
 0x193   : > { %v1769_v2 = vld [vmem:[%s6508_s6 + $0x3040] sm:$0xff]  ;;  %1768 = vst [vmem:[%s6516_s7 + $0xc08] sm:$0xff] %v1767_v1 }
 0x194   : > { %1770 = vst [vmem:[%s6516_s7 + $0xc10] sm:$0xff] %v1769_v2  ;;  %v1771_v3 = vld [vmem:[%s6508_s6 + $0x3060] sm:$0xff] }
 0x195   : > { %v1773_v4 = vld [vmem:[%s6508_s6 + $0x3080] sm:$0xff]  ;;  %1772 = vst [vmem:[%s6516_s7 + $0xc18] sm:$0xff] %v1771_v3 }
 0x196   : > { %v1775_v5 = vld [vmem:[%s6508_s6 + $0x30a0] sm:$0xff]  ;;  %1774 = vst [vmem:[%s6516_s7 + $0xc20] sm:$0xff] %v1773_v4 }
 0x197   : > { %1776 = vst [vmem:[%s6516_s7 + $0xc28] sm:$0xff] %v1775_v5  ;;  %v1777_v6 = vld [vmem:[%s6508_s6 + $0x30c0] sm:$0xff] }
 0x198   : > { %v1779_v7 = vld [vmem:[%s6508_s6 + $0x30e0] sm:$0xff]  ;;  %1778 = vst [vmem:[%s6516_s7 + $0xc30] sm:$0xff] %v1777_v6 }
 0x199   : > { %1780 = vst [vmem:[%s6516_s7 + $0xc38] sm:$0xff] %v1779_v7 }
 0x19a PF: > { %p5241_p5 = scmp.ge.s32.totalorder %s6434_s20, 1  ;;  %p1802_p6 = scmp.lt.s32.totalorder %s6434_s20, 5 }
 0x19c   : > { %p1803_p7 = pnand %p5241_p5, %p1802_p6 }
 0x19d   : > { %s1809_s8 = sand.u32 (!%p1803_p7), 1, %s6426_s18   ;;  %s5242_s9 = sshll.u32 (!%p1803_p7), %s6488_s21, 1 }
 0x19e   : > { %1806 = sbr.rel (%p1803_p7) target bundleno = 1684 (0x694), region = 74  ;;  %p1842_p8 = scmp.lt.s32.totalorder (!%p1803_p7), %s5242_s9, 7 }
 0x19f   : > { %s5734_s10 = smul.u32 (!%p1803_p7), 3136, %s1809_s8  ;;  %s5243_s11 = sshll.u32 (!%p1803_p7), %s6488_s21, 5 }
 0x1a0   : > { %p1847_p9 = scmp.lt.s32.totalorder (!%p1803_p7), %s5243_s11, 127  ;;  %p5245_p10 = scmp.ne.s32.totalorder (!%p1803_p7), %s6488_s21, 0 }
 0x1a1   : > { %s7312_s18 = scalar_lea.vmem (!%p1803_p7), [#allocation3], %s5734_s10 }
 0x1a5   : > { %s7895_s9 = smov (!%p1842_p8, %s5242_s9), 7  ;;  %s7897_s11 = smov (!%p1847_p9, %s5243_s11), 127 }
 0x1a6   : > { %s1844_s14 = scalar_lea.vmem %s7887_s2, %s7895_s9  ;;  %s5244_s15 = sshll.u32 %s7897_s11, 2  ;;  %vm1857_vm0 = vcmask (!%p5245_p10), 50176   ;;  %v6436_v8 = vmov (!%p5245_p10), 0.0  }
 0x1a7   : > { %s7310_s20 = scalar_lea.vmem %s7888_s3, %s5244_s15  ;;  %1856 = sbr.rel (%p5245_p10) target bundleno = 430 (0x1ae), region = 82  ;;  %1858 = vst.msk [vmem:[#allocation2] sm:$0x3] (!%p5245_p10), %vm1857_vm0, %v6436_v8 }
 0x1ae PF: > { %v5771_v9 = vld [vmem:[%s7312_s18 + $0x4] ss:$8 sps:$4 sm:$0xff]   ;;  %v5775_v11 = vld [vmem:[%s7312_s18] ss:$8 sps:$4 sm:$0xff]   ;;  %v5777_v13 = vld [vmem:[%s7312_s18 + $0x14] ss:$8 sps:$4 sm:$0xff]   ;;  %v2257_v45 = vlaneseq }
 0x1af   : > { %v5773_v10 = vld [vmem:[%s7312_s18 + $0x604] ss:$8 sps:$4 sm:$0xff]   ;;  %4420 = vmatprep.subr.bf16.mxu1 %v5771_v9  ;;  %v5776_v12 = vld [vmem:[%s7312_s18 + $0x600] ss:$8 sps:$4 sm:$0xff]   ;;  %v5779_v14 = vld [vmem:[%s7312_s18 + $0x614] ss:$8 sps:$4 sm:$0xff]  }
 0x1b0   : > { %4666 = vmatprep.subr.bf16.mxu0 %v5773_v10  ;;  %4421 = vmatpush1.bf16.msra.mxu1 %v5775_v11  ;;  %v5781_v15 = vld [vmem:[%s7312_s18 + $0x10] ss:$8 sps:$4 sm:$0xff]   ;;  %v5783_v17 = vld [vmem:[%s7312_s18 + $0x24] ss:$8 sps:$4 sm:$0xff]   ;;  %v5787_v19 = vld [vmem:[%s7312_s18 + $0x20] ss:$8 sps:$4 sm:$0xff]  }
 0x1b1   : > { %4667 = vmatpush1.bf16.msra.mxu0 %v5776_v12  ;;  %4422 = vmatprep.subr.bf16.mxu1 %v5777_v13  ;;  %v5782_v16 = vld [vmem:[%s7312_s18 + $0x610] ss:$8 sps:$4 sm:$0xff]   ;;  %v5785_v18 = vld [vmem:[%s7312_s18 + $0x624] ss:$8 sps:$4 sm:$0xff]   ;;  %v5788_v20 = vld [vmem:[%s7312_s18 + $0x620] ss:$8 sps:$4 sm:$0xff]  }
 0x1b2   : > { %4668 = vmatprep.subr.bf16.mxu0 %v5779_v14  ;;  %v5789_v21 = vld [vmem:[%s7312_s18 + $0x34] ss:$8 sps:$4 sm:$0xff]   ;;  %v5793_v23 = vld [vmem:[%s7312_s18 + $0x30] ss:$8 sps:$4 sm:$0xff]   ;;  %v5795_v25 = vld [vmem:[%s7312_s18 + $0x44] ss:$8 sps:$4 sm:$0xff]  }
 0x1b3   : > { %v5791_v22 = vld [vmem:[%s7312_s18 + $0x634] ss:$8 sps:$4 sm:$0xff]   ;;  %v5794_v24 = vld [vmem:[%s7312_s18 + $0x630] ss:$8 sps:$4 sm:$0xff]   ;;  %v5797_v26 = vld [vmem:[%s7312_s18 + $0x644] ss:$8 sps:$4 sm:$0xff]  }
 0x1b4   : > { %4423 = vmatpush1.bf16.msra.mxu1 %v5781_v15  ;;  %v5799_v27 = vld [vmem:[%s7312_s18 + $0x40] ss:$8 sps:$4 sm:$0xff]   ;;  %v5801_v29 = vld [vmem:[%s7312_s18 + $0x54] ss:$8 sps:$4 sm:$0xff]   ;;  %v5805_v31 = vld [vmem:[%s7312_s18 + $0x50] ss:$8 sps:$4 sm:$0xff]  }
 0x1b5   : > { %4669 = vmatpush1.bf16.msra.mxu0 %v5782_v16  ;;  %4424 = vmatprep.subr.bf16.mxu1 %v5783_v17  ;;  %v5800_v28 = vld [vmem:[%s7312_s18 + $0x640] ss:$8 sps:$4 sm:$0xff]   ;;  %v5803_v30 = vld [vmem:[%s7312_s18 + $0x654] ss:$8 sps:$4 sm:$0xff]   ;;  %v5806_v32 = vld [vmem:[%s7312_s18 + $0x650] ss:$8 sps:$4 sm:$0xff]  }
 0x1b6   : > { %4670 = vmatprep.subr.bf16.mxu0 %v5785_v18  ;;  %v5807_v33 = vld [vmem:[%s7312_s18 + $0x64] ss:$8 sps:$4 sm:$0xff]   ;;  %v5811_v35 = vld [vmem:[%s7312_s18 + $0x60] ss:$8 sps:$4 sm:$0xff]   ;;  %v5813_v37 = vld [vmem:[%s7312_s18 + $0x74] ss:$8 sps:$4 sm:$0xff]  }
 0x1b7   : > { %v5809_v34 = vld [vmem:[%s7312_s18 + $0x664] ss:$8 sps:$4 sm:$0xff]   ;;  %v5812_v36 = vld [vmem:[%s7312_s18 + $0x660] ss:$8 sps:$4 sm:$0xff]   ;;  %v5815_v38 = vld [vmem:[%s7312_s18 + $0x674] ss:$8 sps:$4 sm:$0xff]  }
 0x1b8   : > { %4425 = vmatpush1.bf16.msra.mxu1 %v5787_v19  ;;  %v5817_v39 = vld [vmem:[%s7312_s18 + $0x70] ss:$8 sps:$4 sm:$0xff]   ;;  %v5819_v41 = vld [vmem:[%s7312_s18 + $0x84] ss:$8 sps:$4 sm:$0xff]   ;;  %v5823_v43 = vld [vmem:[%s7312_s18 + $0x80] ss:$8 sps:$4 sm:$0xff]  }
 0x1b9   : > { %4671 = vmatpush1.bf16.msra.mxu0 %v5788_v20  ;;  %4426 = vmatprep.subr.bf16.mxu1 %v5789_v21  ;;  %v5818_v40 = vld [vmem:[%s7312_s18 + $0x670] ss:$8 sps:$4 sm:$0xff]   ;;  %v5821_v42 = vld [vmem:[%s7312_s18 + $0x684] ss:$8 sps:$4 sm:$0xff]   ;;  %v5824_v44 = vld [vmem:[%s7312_s18 + $0x680] ss:$8 sps:$4 sm:$0xff]  }
 0x1ba   : > { %4672 = vmatprep.subr.bf16.mxu0 %v5791_v22  ;;  %v6437_v46 = vmov 1966171168   ;;  %v5825_v48 = vld [vmem:[%s7312_s18 + $0x94] ss:$8 sps:$4 sm:$0xff]   ;;  %v5829_v50 = vld [vmem:[%s7312_s18 + $0x90] ss:$8 sps:$4 sm:$0xff]  }
 0x1bb   : > { %v2273_v47 = vunpack.c.l.s4 %v6437_v46  ;;  %v5827_v49 = vld [vmem:[%s7312_s18 + $0x694] ss:$8 sps:$4 sm:$0xff]   ;;  %v7354_v51 = vshrl.u32 %v2257_v45, 7  ;;  %v5830_v53 = vld [vmem:[%s7312_s18 + $0x690] ss:$8 sps:$4 sm:$0xff]   ;;  %v1860_v1 = vld [vmem:[%s7885_s0 + $0x8] sm:$0xff] }
 0x1bc   : > { %4427 = vmatpush1.bf16.msra.mxu1 %v5793_v23  ;;  %v5831_v54 = vld [vmem:[%s7312_s18 + $0xa4] ss:$8 sps:$4 sm:$0xff]   ;;  %v5835_v56 = vld [vmem:[%s7312_s18 + $0xa0] ss:$8 sps:$4 sm:$0xff]   ;;  %v5837_v59 = vld [vmem:[%s7312_s18 + $0xb4] ss:$8 sps:$4 sm:$0xff]   ;;  %v2320_v5 = vcombine.high %v1860_v1, %v1860_v1 }
 0x1bd   : > { %4673 = vmatpush1.bf16.msra.mxu0 %v5794_v24  ;;  %4428 = vmatprep.subr.bf16.mxu1 %v5795_v25  ;;  %v2274_v52 = vunpack.c.0.s8 %v2273_v47  ;;  %v5833_v55 = vld [vmem:[%s7312_s18 + $0x6a4] ss:$8 sps:$4 sm:$0xff]   ;;  %v5836_v57 = vld [vmem:[%s7312_s18 + $0x6a0] ss:$8 sps:$4 sm:$0xff]   ;;  %v5839_v60 = vld [vmem:[%s7312_s18 + $0x6b4] ss:$8 sps:$4 sm:$0xff]  }
 0x1be   : > { %4674 = vmatprep.subr.bf16.mxu0 %v5797_v26  ;;  %v7369_v61 = vld [vmem:[%s7885_s0] sm:$0xff]  ;;  %v5841_v62 = vld [vmem:[%s7312_s18 + $0xb0] ss:$8 sps:$4 sm:$0xff]   ;;  %vm4416_vm1 = vcmask 523264   ;;  %vm5127_vm2 = vcmask 50176   ;;  %p5656_p11 = scmp.ne.s32.totalorder %s6488_s21, 3 }
 0x1bf   : > { %v7362_v58 = vsub.s32 %v2274_v52, %v7354_v51  ;;  %v5842_v0 = vld [vmem:[%s7312_s18 + $0x6b0] ss:$8 sps:$4 sm:$0xff]   ;;  %v5843_v2 = vld [vmem:[%s7312_s18 + $0xc4] ss:$8 sps:$4 sm:$0xff]   ;;  %v5847_v8 = vld [vmem:[%s7312_s18 + $0xc0] ss:$8 sps:$4 sm:$0xff]  }
 0x1c0   : > { %4429 = vmatpush1.bf16.msra.mxu1 %v5799_v27  ;;  %v5845_v3 = vld [vmem:[%s7312_s18 + $0x6c4] ss:$8 sps:$4 sm:$0xff]   ;;  %v5848_v9 = vld [vmem:[%s7312_s18 + $0x6c0] ss:$8 sps:$4 sm:$0xff]   ;;  %v5849_v10 = vld [vmem:[%s7312_s18 + $0xd4] ss:$8 sps:$4 sm:$0xff]  }
 0x1c1   : > { %4675 = vmatpush1.bf16.msra.mxu0 %v5800_v28  ;;  %4430 = vmatprep.subr.bf16.mxu1 %v5801_v29  ;;  %v2278_v63 = vrot.slane %v7369_v61, %v7362_v58  ;;  %v2334_v7 = vrot.slane %v2320_v5, %v7362_v58  ;;  %v5851_v11 = vld [vmem:[%s7312_s18 + $0x6d4] ss:$8 sps:$4 sm:$0xff]   ;;  %v5853_v14 = vld [vmem:[%s7312_s18 + $0xd0] ss:$8 sps:$4 sm:$0xff]   ;;  %v5855_v16 = vld [vmem:[%s7312_s18 + $0xe4] ss:$8 sps:$4 sm:$0xff]  }
 0x1c2   : > { %4676 = vmatprep.subr.bf16.mxu0 %v5803_v30  ;;  %v5854_v15 = vld [vmem:[%s7312_s18 + $0x6d0] ss:$8 sps:$4 sm:$0xff]   ;;  %v5857_v17 = vld [vmem:[%s7312_s18 + $0x6e4] ss:$8 sps:$4 sm:$0xff]   ;;  %v5859_v18 = vld [vmem:[%s7312_s18 + $0xe0] ss:$8 sps:$4 sm:$0xff]  }
 0x1c3   : > { %v2286_v4 = vcombine.high %v2278_v63, %v2278_v63  ;;  %v2336_v12 = vcombine.high %v2334_v7, %v2334_v7  ;;  %v5860_v19 = vld [vmem:[%s7312_s18 + $0x6e0] ss:$8 sps:$4 sm:$0xff]   ;;  %v5861_v20 = vld [vmem:[%s7312_s18 + $0xf4] ss:$8 sps:$4 sm:$0xff]   ;;  %v5865_v22 = vld [vmem:[%s7312_s18 + $0xf0] ss:$8 sps:$4 sm:$0xff]   ;;  %v7400_v26 = vrot.slane %v2278_v63, %v7362_v58  ;;  %v7403_v27 = vrot.slane %v2334_v7, %v7362_v58 }
 0x1c4   : > { %4431 = vmatpush1.bf16.msra.mxu1 %v5805_v31  ;;  %v5863_v21 = vld [vmem:[%s7312_s18 + $0x6f4] ss:$8 sps:$4 sm:$0xff]   ;;  %v5866_v23 = vld [vmem:[%s7312_s18 + $0x6f0] ss:$8 sps:$4 sm:$0xff]   ;;  %v5870_v24 = vld [vmem:[%s7312_s18 + $0x104] ss:$8 sps:$4 sm:$0xff]  }
 0x1c5   : > { %4677 = vmatpush1.bf16.msra.mxu0 %v5806_v32  ;;  %4432 = vmatprep.subr.bf16.mxu1 %v5807_v33  ;;  %v2308_v6 = vrot.slane %v2286_v4, %v7362_v58  ;;  %v2364_v13 = vrot.slane %v2336_v12, %v7362_v58  ;;  %v5874_v25 = vld [vmem:[%s7312_s18 + $0x704] ss:$8 sps:$4 sm:$0xff]   ;;  %v5868_v28 = vld [vmem:[%s7312_s18 + $0x100] ss:$8 sps:$4 sm:$0xff]   ;;  %v5877_v30 = vld [vmem:[%s7312_s18 + $0x114] ss:$8 sps:$4 sm:$0xff]  }
 0x1c6   : > { %4678 = vmatprep.subr.bf16.mxu0 %v5809_v34  ;;  %v5872_v29 = vld [vmem:[%s7312_s18 + $0x700] ss:$8 sps:$4 sm:$0xff]   ;;  %v5880_v31 = vld [vmem:[%s7312_s18 + $0x714] ss:$8 sps:$4 sm:$0xff]   ;;  %v5875_v34 = vld [vmem:[%s7312_s18 + $0x110] ss:$8 sps:$4 sm:$0xff]  }
 0x1c7   : > { %4452 = vmatprep.mubr.bf16.mxu1 %v2308_v6  ;;  %4698 = vmatprep.mubr.bf16.mxu0 %v2364_v13  ;;  %v2318_v32 = vcombine.high %v2308_v6, %v2308_v6  ;;  %v2368_v33 = vcombine.high %v2364_v13, %v2364_v13  ;;  %v5898_v45 = vld [vmem:[%s7312_s18 + $0x744] ss:$8 sps:$4 sm:$0xff]   ;;  %v5893_v46 = vld [vmem:[%s7312_s18 + $0x140] ss:$8 sps:$4 sm:$0xff]   ;;  %v5902_v52 = vld [vmem:[%s7312_s18 + $0x750] ss:$8 sps:$4 sm:$0xff]  }
 0x1c8   : > { %4433 = vmatpush1.bf16.msra.mxu1 %v5811_v35  ;;  %v5878_v35 = vld [vmem:[%s7312_s18 + $0x710] ss:$8 sps:$4 sm:$0xff]   ;;  %v5896_v47 = vld [vmem:[%s7312_s18 + $0x740] ss:$8 sps:$4 sm:$0xff]   ;;  %v5919_v63 = vld [vmem:[%s7312_s18 + $0x184] ss:$8 sps:$4 sm:$0xff]  }
 0x1c9   : > { %4679 = vmatpush1.bf16.msra.mxu0 %v5812_v36  ;;  %4434 = vmatprep.subr.bf16.mxu1 %v5813_v37  ;;  %v5883_v36 = vld [vmem:[%s7312_s18 + $0x124] ss:$8 sps:$4 sm:$0xff]   ;;  %v5917_v1 = vld [vmem:[%s7312_s18 + $0x180] ss:$8 sps:$4 sm:$0xff]   ;;  %v5928_v4 = vld [vmem:[%s7312_s18 + $0x794] ss:$8 sps:$4 sm:$0xff]  }
 0x1ca   : > { %4680 = vmatprep.subr.bf16.mxu0 %v5815_v38  ;;  %v5886_v37 = vld [vmem:[%s7312_s18 + $0x724] ss:$8 sps:$4 sm:$0xff]   ;;  %v5881_v38 = vld [vmem:[%s7312_s18 + $0x120] ss:$8 sps:$4 sm:$0xff]   ;;  %v5923_v5 = vld [vmem:[%s7312_s18 + $0x190] ss:$8 sps:$4 sm:$0xff]  }
 0x1cb   : > { %v5926_v6 = vld [vmem:[%s7312_s18 + $0x790] ss:$8 sps:$4 sm:$0xff]   ;;  %v5931_v7 = vld [vmem:[%s7312_s18 + $0x1a4] ss:$8 sps:$4 sm:$0xff]   ;;  %v5940_v12 = vld [vmem:[%s7312_s18 + $0x7b4] ss:$8 sps:$4 sm:$0xff]  }
 0x1cc   : > { %4435 = vmatpush1.bf16.msra.mxu1 %v5817_v39  ;;  %v5884_v39 = vld [vmem:[%s7312_s18 + $0x720] ss:$8 sps:$4 sm:$0xff]   ;;  %v5935_v13 = vld [vmem:[%s7312_s18 + $0x1b0] ss:$8 sps:$4 sm:$0xff]   ;;  %s6440_s13 = smov (!%p5656_p11), 127   ;;  %vm5146_vm3 = vcmask (!%p5656_p11), 41984  }
 0x1cd   : > { %4681 = vmatpush1.bf16.msra.mxu0 %v5818_v40  ;;  %4436 = vmatprep.subr.bf16.mxu1 %v5819_v41  ;;  %v5889_v40 = vld [vmem:[%s7312_s18 + $0x134] ss:$8 sps:$4 sm:$0xff]  }
 0x1ce   : > { %4682 = vmatprep.subr.bf16.mxu0 %v5821_v42  ;;  %v5892_v41 = vld [vmem:[%s7312_s18 + $0x734] ss:$8 sps:$4 sm:$0xff]   ;;  %v5887_v42 = vld [vmem:[%s7312_s18 + $0x130] ss:$8 sps:$4 sm:$0xff]  }
 0x1d0   : > { %4437 = vmatpush1.bf16.msra.mxu1 %v5823_v43  ;;  %v5890_v43 = vld [vmem:[%s7312_s18 + $0x730] ss:$8 sps:$4 sm:$0xff]  }
 0x1d1   : > { %4683 = vmatpush1.bf16.msra.mxu0 %v5824_v44  ;;  %4438 = vmatprep.subr.bf16.mxu1 %v5825_v48  ;;  %v5895_v44 = vld [vmem:[%s7312_s18 + $0x144] ss:$8 sps:$4 sm:$0xff]   ;;  %v5901_v48 = vld [vmem:[%s7312_s18 + $0x154] ss:$8 sps:$4 sm:$0xff]  }
 0x1d2   : > { %4684 = vmatprep.subr.bf16.mxu0 %v5827_v49  ;;  %v5904_v49 = vld [vmem:[%s7312_s18 + $0x754] ss:$8 sps:$4 sm:$0xff]  }
 0x1d4   : > { %4439 = vmatpush1.bf16.msra.mxu1 %v5829_v50  ;;  %v5899_v50 = vld [vmem:[%s7312_s18 + $0x150] ss:$8 sps:$4 sm:$0xff]  }
 0x1d5   : > { %4685 = vmatpush1.bf16.msra.mxu0 %v5830_v53  ;;  %4440 = vmatprep.subr.bf16.mxu1 %v5831_v54  ;;  %v5907_v53 = vld [vmem:[%s7312_s18 + $0x164] ss:$8 sps:$4 sm:$0xff]  }
 0x1d6   : > { %4686 = vmatprep.subr.bf16.mxu0 %v5833_v55  ;;  %v5910_v54 = vld [vmem:[%s7312_s18 + $0x764] ss:$8 sps:$4 sm:$0xff]   ;;  %v5905_v55 = vld [vmem:[%s7312_s18 + $0x160] ss:$8 sps:$4 sm:$0xff]  }
 0x1d8   : > { %4441 = vmatpush1.bf16.msra.mxu1 %v5835_v56  ;;  %v5908_v56 = vld [vmem:[%s7312_s18 + $0x760] ss:$8 sps:$4 sm:$0xff]  }
 0x1d9   : > { %4687 = vmatpush1.bf16.msra.mxu0 %v5836_v57  ;;  %4442 = vmatprep.subr.bf16.mxu1 %v5837_v59  ;;  %v5913_v57 = vld [vmem:[%s7312_s18 + $0x174] ss:$8 sps:$4 sm:$0xff]  }
 0x1da   : > { %4688 = vmatprep.subr.bf16.mxu0 %v5839_v60  ;;  %v5916_v59 = vld [vmem:[%s7312_s18 + $0x774] ss:$8 sps:$4 sm:$0xff]   ;;  %v5911_v60 = vld [vmem:[%s7312_s18 + $0x170] ss:$8 sps:$4 sm:$0xff]  }
 0x1dc   : > { %4443 = vmatpush1.bf16.msra.mxu1 %v5841_v62  ;;  %v5914_v62 = vld [vmem:[%s7312_s18 + $0x770] ss:$8 sps:$4 sm:$0xff]  }
 0x1dd   : > { %4689 = vmatpush1.bf16.msra.mxu0 %v5842_v0  ;;  %4444 = vmatprep.subr.bf16.mxu1 %v5843_v2  ;;  %v5922_v0 = vld [vmem:[%s7312_s18 + $0x784] ss:$8 sps:$4 sm:$0xff]   ;;  %v5920_v2 = vld [vmem:[%s7312_s18 + $0x780] ss:$8 sps:$4 sm:$0xff]  }
 0x1de   : > { %4690 = vmatprep.subr.bf16.mxu0 %v5845_v3  ;;  %v5925_v3 = vld [vmem:[%s7312_s18 + $0x194] ss:$8 sps:$4 sm:$0xff]  }
 0x1e0   : > { %4445 = vmatpush1.bf16.msra.mxu1 %v5847_v8  ;;  %v5934_v8 = vld [vmem:[%s7312_s18 + $0x7a4] ss:$8 sps:$4 sm:$0xff]  }
 0x1e1   : > { %4691 = vmatpush1.bf16.msra.mxu0 %v5848_v9  ;;  %4446 = vmatprep.subr.bf16.mxu1 %v5849_v10  ;;  %v5929_v9 = vld [vmem:[%s7312_s18 + $0x1a0] ss:$8 sps:$4 sm:$0xff]  }
 0x1e2   : > { %4692 = vmatprep.subr.bf16.mxu0 %v5851_v11  ;;  %v5932_v10 = vld [vmem:[%s7312_s18 + $0x7a0] ss:$8 sps:$4 sm:$0xff]   ;;  %v5937_v11 = vld [vmem:[%s7312_s18 + $0x1b4] ss:$8 sps:$4 sm:$0xff]  }
 0x1e4   : > { %4447 = vmatpush1.bf16.msra.mxu1 %v5853_v14  ;;  %v5938_v14 = vld [vmem:[%s7312_s18 + $0x7b0] ss:$8 sps:$4 sm:$0xff]  }
 0x1e5   : > { %4693 = vmatpush1.bf16.msra.mxu0 %v5854_v15  ;;  %4448 = vmatprep.subr.bf16.mxu1 %v5855_v16  ;;  %v5943_v15 = vld [vmem:[%s7312_s18 + $0x1c4] ss:$8 sps:$4 sm:$0xff]  }
 0x1e6   : > { %4694 = vmatprep.subr.bf16.mxu0 %v5857_v17  ;;  %v5946_v16 = vld [vmem:[%s7312_s18 + $0x7c4] ss:$8 sps:$4 sm:$0xff]   ;;  %v5941_v17 = vld [vmem:[%s7312_s18 + $0x1c0] ss:$8 sps:$4 sm:$0xff]  }
 0x1e8   : > { %4449 = vmatpush1.bf16.msra.mxu1 %v5859_v18  ;;  %v5944_v18 = vld [vmem:[%s7312_s18 + $0x7c0] ss:$8 sps:$4 sm:$0xff]  }
 0x1e9   : > { %4695 = vmatpush1.bf16.msra.mxu0 %v5860_v19  ;;  %4450 = vmatprep.subr.bf16.mxu1 %v5861_v20  ;;  %v5949_v19 = vld [vmem:[%s7312_s18 + $0x1d4] ss:$8 sps:$4 sm:$0xff]  }
 0x1ea   : > { %4696 = vmatprep.subr.bf16.mxu0 %v5863_v21  ;;  %v5952_v20 = vld [vmem:[%s7312_s18 + $0x7d4] ss:$8 sps:$4 sm:$0xff]   ;;  %v5947_v21 = vld [vmem:[%s7312_s18 + $0x1d0] ss:$8 sps:$4 sm:$0xff]  }
 0x1ec   : > { %4451 = vmatpush1.bf16.msra.mxu1 %v5865_v22  ;;  %v5950_v22 = vld [vmem:[%s7312_s18 + $0x7d0] ss:$8 sps:$4 sm:$0xff]  }
 0x1ed   : > { %4697 = vmatpush1.bf16.msra.mxu0 %v5866_v23  ;;  %4461 = vmatprep.subr.bf16.mxu1 %v5870_v24  ;;  %v5955_v23 = vld [vmem:[%s7312_s18 + $0x1e4] ss:$8 sps:$4 sm:$0xff]  }
 0x1ee   : > { %4707 = vmatprep.subr.bf16.mxu0 %v5874_v25  ;;  %v5958_v24 = vld [vmem:[%s7312_s18 + $0x7e4] ss:$8 sps:$4 sm:$0xff]   ;;  %v2271_v25 = vcombine.high %v7369_v61, %v7369_v61  ;;  %v5962_v61 = vld [vmem:[%s7312_s18 + $0x7f0] ss:$8 sps:$4 sm:$0xff]  }
 0x1ef   : > { %4453 = vmatmul.mubr.bf16.vlgmr.msra.gmra.mrb[0].mxu1 %v7400_v26 }
 0x1f0   : > { %4699 = vmatmul.mubr.bf16.vlgmr.msra.gmra.mrb[0].mxu0 %v7403_v27  ;;  %4462 = vmatpush1.bf16.msra.mxu1 %v5868_v28  ;;  %v5953_v28 = vld [vmem:[%s7312_s18 + $0x1e0] ss:$8 sps:$4 sm:$0xff]  }
 0x1f1   : > { %4708 = vmatpush1.bf16.msra.mxu0 %v5872_v29  ;;  %4463 = vmatprep.subr.bf16.mxu1 %v5877_v30  ;;  %v5956_v29 = vld [vmem:[%s7312_s18 + $0x7e0] ss:$8 sps:$4 sm:$0xff]   ;;  %v5961_v30 = vld [vmem:[%s7312_s18 + $0x1f4] ss:$8 sps:$4 sm:$0xff]  }
 0x1f2   : > { %4709 = vmatprep.subr.bf16.mxu0 %v5880_v31  ;;  %4493 = vmatprep.mubr.bf16.mxu1 %v2318_v32  ;;  %v5964_v31 = vld [vmem:[%s7312_s18 + $0x7f4] ss:$8 sps:$4 sm:$0xff]   ;;  %v7470_v32 = vrot.slane %v2271_v25, %v7362_v58  ;;  %v6031_v25 = vld [vmem:[%s7312_s18 + $0x2b0] ss:$8 sps:$4 sm:$0xff]  }
 0x1f3   : > { %4739 = vmatprep.mubr.bf16.mxu0 %v2368_v33  ;;  %v5959_v33 = vld [vmem:[%s7312_s18 + $0x1f0] ss:$8 sps:$4 sm:$0xff]  }
 0x1f4   : > { %4464 = vmatpush1.bf16.msra.mxu1 %v5875_v34  ;;  %v5967_v34 = vld [vmem:[%s7312_s18 + $0x204] ss:$8 sps:$4 sm:$0xff]  }
 0x1f5   : > { %4710 = vmatpush1.bf16.msra.mxu0 %v5878_v35  ;;  %4465 = vmatprep.subr.bf16.mxu1 %v5883_v36  ;;  %v5970_v35 = vld [vmem:[%s7312_s18 + $0x804] ss:$8 sps:$4 sm:$0xff]   ;;  %v2287_v36 = vcombine.high %v7470_v32, %v7470_v32 }
 0x1f6   : > { %4711 = vmatprep.subr.bf16.mxu0 %v5886_v37  ;;  %v2316_v37 = vcombine.high %v7400_v26, %v7400_v26  ;;  %v7492_v26 = vld [vmem:[%s7885_s0 + $0x10] sm:$0xff] }
 0x1f8   : > { %4466 = vmatpush1.bf16.msra.mxu1 %v5881_v38  ;;  %v2366_v38 = vcombine.high %v7403_v27, %v7403_v27  ;;  %v5971_v27 = vld [vmem:[%s7312_s18 + $0x210] ss:$8 sps:$4 sm:$0xff]  }
 0x1f9   : > { %4712 = vmatpush1.bf16.msra.mxu0 %v5884_v39  ;;  %4467 = vmatprep.subr.bf16.mxu1 %v5889_v40  ;;  %v5965_v39 = vld [vmem:[%s7312_s18 + $0x200] ss:$8 sps:$4 sm:$0xff]  }
 0x1fa   : > { %4713 = vmatprep.subr.bf16.mxu0 %v5892_v41  ;;  %v5968_v40 = vld [vmem:[%s7312_s18 + $0x800] ss:$8 sps:$4 sm:$0xff]   ;;  %v5973_v41 = vld [vmem:[%s7312_s18 + $0x214] ss:$8 sps:$4 sm:$0xff]  }
 0x1fc   : > { %4468 = vmatpush1.bf16.msra.mxu1 %v5887_v42  ;;  %v5976_v42 = vld [vmem:[%s7312_s18 + $0x814] ss:$8 sps:$4 sm:$0xff]  }
 0x1fd   : > { %4714 = vmatpush1.bf16.msra.mxu0 %v5890_v43  ;;  %4469 = vmatprep.subr.bf16.mxu1 %v5895_v44  ;;  %v7487_v43 = vrot.slane %v2287_v36, %v7362_v58  ;;  %v7497_v44 = vrot.slane %v7492_v26, %v7362_v58  ;;  %v6046_v36 = vld [vmem:[%s7312_s18 + $0x8d0] ss:$8 sps:$4 sm:$0xff]  }
 0x1fe   : > { %4715 = vmatprep.subr.bf16.mxu0 %v5898_v45  ;;  %v5974_v45 = vld [vmem:[%s7312_s18 + $0x810] ss:$8 sps:$4 sm:$0xff]  }
 0x200   : > { %4470 = vmatpush1.bf16.msra.mxu1 %v5893_v46  ;;  %v5979_v46 = vld [vmem:[%s7312_s18 + $0x224] ss:$8 sps:$4 sm:$0xff]  }
 0x201   : > { %4716 = vmatpush1.bf16.msra.mxu0 %v5896_v47  ;;  %4471 = vmatprep.subr.bf16.mxu1 %v5901_v48  ;;  %v5982_v47 = vld [vmem:[%s7312_s18 + $0x824] ss:$8 sps:$4 sm:$0xff]   ;;  %v2384_v48 = vcombine.high %v7497_v44, %v7497_v44 }
 0x202   : > { %4717 = vmatprep.subr.bf16.mxu0 %v5904_v49  ;;  %v5977_v49 = vld [vmem:[%s7312_s18 + $0x220] ss:$8 sps:$4 sm:$0xff]  }
 0x204   : > { %4472 = vmatpush1.bf16.msra.mxu1 %v5899_v50  ;;  %v7507_v50 = vrot.slane %v2384_v48, %v7362_v58  ;;  %v6061_v48 = vld [vmem:[%s7312_s18 + $0x300] ss:$8 sps:$4 sm:$0xff]  }
 0x205   : > { %4718 = vmatpush1.bf16.msra.mxu0 %v5902_v52  ;;  %4473 = vmatprep.subr.bf16.mxu1 %v5907_v53  ;;  %v5980_v52 = vld [vmem:[%s7312_s18 + $0x820] ss:$8 sps:$4 sm:$0xff]   ;;  %v5985_v53 = vld [vmem:[%s7312_s18 + $0x234] ss:$8 sps:$4 sm:$0xff]  }
 0x206   : > { %4719 = vmatprep.subr.bf16.mxu0 %v5910_v54  ;;  %v5988_v54 = vld [vmem:[%s7312_s18 + $0x834] ss:$8 sps:$4 sm:$0xff]  }
 0x208   : > { %4474 = vmatpush1.bf16.msra.mxu1 %v5905_v55  ;;  %v5983_v55 = vld [vmem:[%s7312_s18 + $0x230] ss:$8 sps:$4 sm:$0xff]  }
 0x209   : > { %4720 = vmatpush1.bf16.msra.mxu0 %v5908_v56  ;;  %4475 = vmatprep.subr.bf16.mxu1 %v5913_v57  ;;  %v5986_v56 = vld [vmem:[%s7312_s18 + $0x830] ss:$8 sps:$4 sm:$0xff]   ;;  %v5991_v57 = vld [vmem:[%s7312_s18 + $0x244] ss:$8 sps:$4 sm:$0xff]  }
 0x20a   : > { %4721 = vmatprep.subr.bf16.mxu0 %v5916_v59  ;;  %v5994_v59 = vld [vmem:[%s7312_s18 + $0x844] ss:$8 sps:$4 sm:$0xff]  }
 0x20c   : > { %4476 = vmatpush1.bf16.msra.mxu1 %v5911_v60  ;;  %v5989_v60 = vld [vmem:[%s7312_s18 + $0x240] ss:$8 sps:$4 sm:$0xff]  }
 0x20d   : > { %4722 = vmatpush1.bf16.msra.mxu0 %v5914_v62  ;;  %4477 = vmatprep.subr.bf16.mxu1 %v5919_v63  ;;  %v5992_v62 = vld [vmem:[%s7312_s18 + $0x840] ss:$8 sps:$4 sm:$0xff]   ;;  %v5997_v63 = vld [vmem:[%s7312_s18 + $0x254] ss:$8 sps:$4 sm:$0xff]  }
 0x20e   : > { %4723 = vmatprep.subr.bf16.mxu0 %v5922_v0  ;;  %v6000_v0 = vld [vmem:[%s7312_s18 + $0x854] ss:$8 sps:$4 sm:$0xff]  }
 0x210   : > { %4478 = vmatpush1.bf16.msra.mxu1 %v5917_v1  ;;  %v5995_v1 = vld [vmem:[%s7312_s18 + $0x250] ss:$8 sps:$4 sm:$0xff]  }
 0x211   : > { %4724 = vmatpush1.bf16.msra.mxu0 %v5920_v2  ;;  %4479 = vmatprep.subr.bf16.mxu1 %v5925_v3  ;;  %v5998_v2 = vld [vmem:[%s7312_s18 + $0x850] ss:$8 sps:$4 sm:$0xff]   ;;  %v6003_v3 = vld [vmem:[%s7312_s18 + $0x264] ss:$8 sps:$4 sm:$0xff]  }
 0x212   : > { %4725 = vmatprep.subr.bf16.mxu0 %v5928_v4  ;;  %v6006_v4 = vld [vmem:[%s7312_s18 + $0x864] ss:$8 sps:$4 sm:$0xff]  }
 0x214   : > { %4480 = vmatpush1.bf16.msra.mxu1 %v5923_v5  ;;  %v6001_v5 = vld [vmem:[%s7312_s18 + $0x260] ss:$8 sps:$4 sm:$0xff]  }
 0x215   : > { %4726 = vmatpush1.bf16.msra.mxu0 %v5926_v6  ;;  %4481 = vmatprep.subr.bf16.mxu1 %v5931_v7  ;;  %v6004_v6 = vld [vmem:[%s7312_s18 + $0x860] ss:$8 sps:$4 sm:$0xff]   ;;  %v6009_v7 = vld [vmem:[%s7312_s18 + $0x274] ss:$8 sps:$4 sm:$0xff]  }
 0x216   : > { %4727 = vmatprep.subr.bf16.mxu0 %v5934_v8  ;;  %v6012_v8 = vld [vmem:[%s7312_s18 + $0x874] ss:$8 sps:$4 sm:$0xff]  }
 0x218   : > { %4482 = vmatpush1.bf16.msra.mxu1 %v5929_v9  ;;  %v6007_v9 = vld [vmem:[%s7312_s18 + $0x270] ss:$8 sps:$4 sm:$0xff]  }
 0x219   : > { %4728 = vmatpush1.bf16.msra.mxu0 %v5932_v10  ;;  %4483 = vmatprep.subr.bf16.mxu1 %v5937_v11  ;;  %v6010_v10 = vld [vmem:[%s7312_s18 + $0x870] ss:$8 sps:$4 sm:$0xff]   ;;  %v6015_v11 = vld [vmem:[%s7312_s18 + $0x284] ss:$8 sps:$4 sm:$0xff]  }
 0x21a   : > { %4729 = vmatprep.subr.bf16.mxu0 %v5940_v12  ;;  %v6018_v12 = vld [vmem:[%s7312_s18 + $0x884] ss:$8 sps:$4 sm:$0xff]  }
 0x21c   : > { %4484 = vmatpush1.bf16.msra.mxu1 %v5935_v13  ;;  %v6013_v13 = vld [vmem:[%s7312_s18 + $0x280] ss:$8 sps:$4 sm:$0xff]  }
 0x21d   : > { %4730 = vmatpush1.bf16.msra.mxu0 %v5938_v14  ;;  %4485 = vmatprep.subr.bf16.mxu1 %v5943_v15  ;;  %v6016_v14 = vld [vmem:[%s7312_s18 + $0x880] ss:$8 sps:$4 sm:$0xff]   ;;  %v6021_v15 = vld [vmem:[%s7312_s18 + $0x294] ss:$8 sps:$4 sm:$0xff]  }
 0x21e   : > { %4731 = vmatprep.subr.bf16.mxu0 %v5946_v16  ;;  %v6024_v16 = vld [vmem:[%s7312_s18 + $0x894] ss:$8 sps:$4 sm:$0xff]  }
 0x220   : > { %4486 = vmatpush1.bf16.msra.mxu1 %v5941_v17  ;;  %v6019_v17 = vld [vmem:[%s7312_s18 + $0x290] ss:$8 sps:$4 sm:$0xff]  }
 0x221   : > { %4732 = vmatpush1.bf16.msra.mxu0 %v5944_v18  ;;  %4487 = vmatprep.subr.bf16.mxu1 %v5949_v19  ;;  %v6022_v18 = vld [vmem:[%s7312_s18 + $0x890] ss:$8 sps:$4 sm:$0xff]   ;;  %v6027_v19 = vld [vmem:[%s7312_s18 + $0x2a4] ss:$8 sps:$4 sm:$0xff]  }
 0x222   : > { %4733 = vmatprep.subr.bf16.mxu0 %v5952_v20  ;;  %v6030_v20 = vld [vmem:[%s7312_s18 + $0x8a4] ss:$8 sps:$4 sm:$0xff]  }
 0x224   : > { %4488 = vmatpush1.bf16.msra.mxu1 %v5947_v21  ;;  %v6025_v21 = vld [vmem:[%s7312_s18 + $0x2a0] ss:$8 sps:$4 sm:$0xff]  }
 0x225   : > { %4734 = vmatpush1.bf16.msra.mxu0 %v5950_v22  ;;  %4489 = vmatprep.subr.bf16.mxu1 %v5955_v23  ;;  %v6028_v22 = vld [vmem:[%s7312_s18 + $0x8a0] ss:$8 sps:$4 sm:$0xff]   ;;  %v6033_v23 = vld [vmem:[%s7312_s18 + $0x2b4] ss:$8 sps:$4 sm:$0xff]  }
 0x226   : > { %4735 = vmatprep.subr.bf16.mxu0 %v5958_v24  ;;  %v6036_v24 = vld [vmem:[%s7312_s18 + $0x8b4] ss:$8 sps:$4 sm:$0xff]  }
 0x228   : > { %4490 = vmatpush1.bf16.msra.mxu1 %v5953_v28  ;;  %v6034_v28 = vld [vmem:[%s7312_s18 + $0x8b0] ss:$8 sps:$4 sm:$0xff]  }
 0x229   : > { %4736 = vmatpush1.bf16.msra.mxu0 %v5956_v29  ;;  %4491 = vmatprep.subr.bf16.mxu1 %v5961_v30  ;;  %v6039_v29 = vld [vmem:[%s7312_s18 + $0x2c4] ss:$8 sps:$4 sm:$0xff]  }
 0x22a   : > { %4737 = vmatprep.subr.bf16.mxu0 %v5964_v31  ;;  %v6042_v30 = vld [vmem:[%s7312_s18 + $0x8c4] ss:$8 sps:$4 sm:$0xff]   ;;  %v6037_v31 = vld [vmem:[%s7312_s18 + $0x2c0] ss:$8 sps:$4 sm:$0xff]  }
 0x22c   : > { %4492 = vmatpush1.bf16.msra.mxu1 %v5959_v33  ;;  %v6040_v33 = vld [vmem:[%s7312_s18 + $0x8c0] ss:$8 sps:$4 sm:$0xff]  }
 0x22d   : > { %4738 = vmatpush1.bf16.msra.mxu0 %v5962_v61  ;;  %4502 = vmatprep.subr.bf16.mxu1 %v5967_v34  ;;  %v6045_v61 = vld [vmem:[%s7312_s18 + $0x2d4] ss:$8 sps:$4 sm:$0xff]  }
 0x22e   : > { %4748 = vmatprep.subr.bf16.mxu0 %v5970_v35  ;;  %v6048_v34 = vld [vmem:[%s7312_s18 + $0x8d4] ss:$8 sps:$4 sm:$0xff]   ;;  %v6043_v35 = vld [vmem:[%s7312_s18 + $0x2d0] ss:$8 sps:$4 sm:$0xff]  }
 0x22f   : > { %4494 = vmatmul.mubr.bf16.vlgmr.msra.gmra.mrb[0].mxu1 %v2316_v37  ;;  %v6051_v37 = vld [vmem:[%s7312_s18 + $0x2e4] ss:$8 sps:$4 sm:$0xff]  }
 0x230   : > { %4740 = vmatmul.mubr.bf16.vlgmr.msra.gmra.mrb[0].mxu0 %v2366_v38  ;;  %4503 = vmatpush1.bf16.msra.mxu1 %v5965_v39  ;;  %v6054_v38 = vld [vmem:[%s7312_s18 + $0x8e4] ss:$8 sps:$4 sm:$0xff]   ;;  %v6049_v39 = vld [vmem:[%s7312_s18 + $0x2e0] ss:$8 sps:$4 sm:$0xff]  }
 0x231   : > { %4749 = vmatpush1.bf16.msra.mxu0 %v5968_v40  ;;  %4504 = vmatprep.subr.bf16.mxu1 %v5973_v41  ;;  %v6052_v40 = vld [vmem:[%s7312_s18 + $0x8e0] ss:$8 sps:$4 sm:$0xff]   ;;  %v6057_v41 = vld [vmem:[%s7312_s18 + $0x2f4] ss:$8 sps:$4 sm:$0xff]  }
 0x232   : > { %4750 = vmatprep.subr.bf16.mxu0 %v5976_v42  ;;  %4534 = vmatprep.mubr.bf16.mxu1 %v7487_v43  ;;  %v6060_v42 = vld [vmem:[%s7312_s18 + $0x8f4] ss:$8 sps:$4 sm:$0xff]  }
 0x233   : > { %4780 = vmatprep.mubr.bf16.mxu0 %v7507_v50 }
 0x234   : > { %4505 = vmatpush1.bf16.msra.mxu1 %v5971_v27  ;;  %v6055_v27 = vld [vmem:[%s7312_s18 + $0x2f0] ss:$8 sps:$4 sm:$0xff]  }
 0x235   : > { %4751 = vmatpush1.bf16.msra.mxu0 %v5974_v45  ;;  %4506 = vmatprep.subr.bf16.mxu1 %v5979_v46  ;;  %v6058_v45 = vld [vmem:[%s7312_s18 + $0x8f0] ss:$8 sps:$4 sm:$0xff]   ;;  %v6063_v46 = vld [vmem:[%s7312_s18 + $0x304] ss:$8 sps:$4 sm:$0xff]  }
 0x236   : > { %4752 = vmatprep.subr.bf16.mxu0 %v5982_v47  ;;  %v6066_v47 = vld [vmem:[%s7312_s18 + $0x904] ss:$8 sps:$4 sm:$0xff]  }
 0x238   : > { %4507 = vmatpush1.bf16.msra.mxu1 %v5977_v49  ;;  %v7568_v49 = vrot.slane %v7470_v32, %v7362_v58  ;;  %v2416_v32 = vcombine.high %v7507_v50, %v7507_v50  ;;  %v6073_v50 = vld [vmem:[%s7312_s18 + $0x320] ss:$8 sps:$4 sm:$0xff]  }
 0x239   : > { %4753 = vmatpush1.bf16.msra.mxu0 %v5980_v52  ;;  %4508 = vmatprep.subr.bf16.mxu1 %v5985_v53  ;;  %v7572_v52 = vrot.slane %v7497_v44, %v7362_v58  ;;  %v6064_v53 = vld [vmem:[%s7312_s18 + $0x900] ss:$8 sps:$4 sm:$0xff]   ;;  %v6067_v44 = vld [vmem:[%s7312_s18 + $0x310] ss:$8 sps:$4 sm:$0xff]  }
 0x23a   : > { %4754 = vmatprep.subr.bf16.mxu0 %v5988_v54  ;;  %v6069_v54 = vld [vmem:[%s7312_s18 + $0x314] ss:$8 sps:$4 sm:$0xff]  }
 0x23c   : > { %4509 = vmatpush1.bf16.msra.mxu1 %v5983_v55  ;;  %v6072_v55 = vld [vmem:[%s7312_s18 + $0x914] ss:$8 sps:$4 sm:$0xff]  }
 0x23d   : > { %4755 = vmatpush1.bf16.msra.mxu0 %v5986_v56  ;;  %4510 = vmatprep.subr.bf16.mxu1 %v5991_v57  ;;  %v2319_v56 = vcombine.high %v7487_v43, %v7487_v43  ;;  %v6070_v57 = vld [vmem:[%s7312_s18 + $0x910] ss:$8 sps:$4 sm:$0xff]   ;;  %v6078_v43 = vld [vmem:[%s7312_s18 + $0x924] ss:$8 sps:$4 sm:$0xff]  }
 0x23e   : > { %4756 = vmatprep.subr.bf16.mxu0 %v5994_v59  ;;  %v6075_v59 = vld [vmem:[%s7312_s18 + $0x324] ss:$8 sps:$4 sm:$0xff]  }
 0x240   : > { %4511 = vmatpush1.bf16.msra.mxu1 %v5989_v60  ;;  %v6076_v60 = vld [vmem:[%s7312_s18 + $0x920] ss:$8 sps:$4 sm:$0xff]  }
 0x241   : > { %4757 = vmatpush1.bf16.msra.mxu0 %v5992_v62  ;;  %4512 = vmatprep.subr.bf16.mxu1 %v5997_v63  ;;  %v6081_v62 = vld [vmem:[%s7312_s18 + $0x334] ss:$8 sps:$4 sm:$0xff]  }
 0x242   : > { %4758 = vmatprep.subr.bf16.mxu0 %v6000_v0  ;;  %v6084_v63 = vld [vmem:[%s7312_s18 + $0x934] ss:$8 sps:$4 sm:$0xff]   ;;  %v6079_v0 = vld [vmem:[%s7312_s18 + $0x330] ss:$8 sps:$4 sm:$0xff]  }
 0x244   : > { %4513 = vmatpush1.bf16.msra.mxu1 %v5995_v1  ;;  %v6082_v1 = vld [vmem:[%s7312_s18 + $0x930] ss:$8 sps:$4 sm:$0xff]  }
 0x245   : > { %4759 = vmatpush1.bf16.msra.mxu0 %v5998_v2  ;;  %4514 = vmatprep.subr.bf16.mxu1 %v6003_v3  ;;  %v6087_v2 = vld [vmem:[%s7312_s18 + $0x344] ss:$8 sps:$4 sm:$0xff]  }
 0x246   : > { %4760 = vmatprep.subr.bf16.mxu0 %v6006_v4  ;;  %v6090_v3 = vld [vmem:[%s7312_s18 + $0x944] ss:$8 sps:$4 sm:$0xff]   ;;  %v6085_v4 = vld [vmem:[%s7312_s18 + $0x340] ss:$8 sps:$4 sm:$0xff]  }
 0x248   : > { %4515 = vmatpush1.bf16.msra.mxu1 %v6001_v5  ;;  %v6088_v5 = vld [vmem:[%s7312_s18 + $0x940] ss:$8 sps:$4 sm:$0xff]  }
 0x249   : > { %4761 = vmatpush1.bf16.msra.mxu0 %v6004_v6  ;;  %4516 = vmatprep.subr.bf16.mxu1 %v6009_v7  ;;  %v6093_v6 = vld [vmem:[%s7312_s18 + $0x354] ss:$8 sps:$4 sm:$0xff]  }
 0x24a   : > { %4762 = vmatprep.subr.bf16.mxu0 %v6012_v8  ;;  %v6096_v7 = vld [vmem:[%s7312_s18 + $0x954] ss:$8 sps:$4 sm:$0xff]   ;;  %v6091_v8 = vld [vmem:[%s7312_s18 + $0x350] ss:$8 sps:$4 sm:$0xff]  }
 0x24c   : > { %4517 = vmatpush1.bf16.msra.mxu1 %v6007_v9  ;;  %v6094_v9 = vld [vmem:[%s7312_s18 + $0x950] ss:$8 sps:$4 sm:$0xff]  }
 0x24d   : > { %4763 = vmatpush1.bf16.msra.mxu0 %v6010_v10  ;;  %4518 = vmatprep.subr.bf16.mxu1 %v6015_v11  ;;  %v6099_v10 = vld [vmem:[%s7312_s18 + $0x364] ss:$8 sps:$4 sm:$0xff]  }
 0x24e   : > { %4764 = vmatprep.subr.bf16.mxu0 %v6018_v12  ;;  %v6102_v11 = vld [vmem:[%s7312_s18 + $0x964] ss:$8 sps:$4 sm:$0xff]   ;;  %v6097_v12 = vld [vmem:[%s7312_s18 + $0x360] ss:$8 sps:$4 sm:$0xff]  }
 0x250   : > { %4519 = vmatpush1.bf16.msra.mxu1 %v6013_v13  ;;  %v6100_v13 = vld [vmem:[%s7312_s18 + $0x960] ss:$8 sps:$4 sm:$0xff]  }
 0x251   : > { %4765 = vmatpush1.bf16.msra.mxu0 %v6016_v14  ;;  %4520 = vmatprep.subr.bf16.mxu1 %v6021_v15  ;;  %v6105_v14 = vld [vmem:[%s7312_s18 + $0x374] ss:$8 sps:$4 sm:$0xff]  }
 0x252   : > { %4766 = vmatprep.subr.bf16.mxu0 %v6024_v16  ;;  %v6108_v15 = vld [vmem:[%s7312_s18 + $0x974] ss:$8 sps:$4 sm:$0xff]   ;;  %v6103_v16 = vld [vmem:[%s7312_s18 + $0x370] ss:$8 sps:$4 sm:$0xff]  }
 0x254   : > { %4521 = vmatpush1.bf16.msra.mxu1 %v6019_v17  ;;  %v6106_v17 = vld [vmem:[%s7312_s18 + $0x970] ss:$8 sps:$4 sm:$0xff]  }
 0x255   : > { %4767 = vmatpush1.bf16.msra.mxu0 %v6022_v18  ;;  %4522 = vmatprep.subr.bf16.mxu1 %v6027_v19  ;;  %v6111_v18 = vld [vmem:[%s7312_s18 + $0x384] ss:$8 sps:$4 sm:$0xff]  }
 0x256   : > { %4768 = vmatprep.subr.bf16.mxu0 %v6030_v20  ;;  %v6114_v19 = vld [vmem:[%s7312_s18 + $0x984] ss:$8 sps:$4 sm:$0xff]   ;;  %v6109_v20 = vld [vmem:[%s7312_s18 + $0x380] ss:$8 sps:$4 sm:$0xff]  }
 0x258   : > { %4523 = vmatpush1.bf16.msra.mxu1 %v6025_v21  ;;  %v6112_v21 = vld [vmem:[%s7312_s18 + $0x980] ss:$8 sps:$4 sm:$0xff]  }
 0x259   : > { %4769 = vmatpush1.bf16.msra.mxu0 %v6028_v22  ;;  %4524 = vmatprep.subr.bf16.mxu1 %v6033_v23  ;;  %v6117_v22 = vld [vmem:[%s7312_s18 + $0x394] ss:$8 sps:$4 sm:$0xff]  }
 0x25a   : > { %4770 = vmatprep.subr.bf16.mxu0 %v6036_v24  ;;  %v6120_v23 = vld [vmem:[%s7312_s18 + $0x994] ss:$8 sps:$4 sm:$0xff]   ;;  %v6115_v24 = vld [vmem:[%s7312_s18 + $0x390] ss:$8 sps:$4 sm:$0xff]  }
 0x25c   : > { %4525 = vmatpush1.bf16.msra.mxu1 %v6031_v25  ;;  %v6118_v25 = vld [vmem:[%s7312_s18 + $0x990] ss:$8 sps:$4 sm:$0xff]  }
 0x25d   : > { %4771 = vmatpush1.bf16.msra.mxu0 %v6034_v28  ;;  %4526 = vmatprep.subr.bf16.mxu1 %v6039_v29  ;;  %v6123_v28 = vld [vmem:[%s7312_s18 + $0x3a4] ss:$8 sps:$4 sm:$0xff]  }
 0x25e   : > { %4772 = vmatprep.subr.bf16.mxu0 %v6042_v30  ;;  %v6126_v29 = vld [vmem:[%s7312_s18 + $0x9a4] ss:$8 sps:$4 sm:$0xff]   ;;  %v6121_v30 = vld [vmem:[%s7312_s18 + $0x3a0] ss:$8 sps:$4 sm:$0xff]  }
 0x260   : > { %4527 = vmatpush1.bf16.msra.mxu1 %v6037_v31  ;;  %v6124_v31 = vld [vmem:[%s7312_s18 + $0x9a0] ss:$8 sps:$4 sm:$0xff]  }
 0x261   : > { %4773 = vmatpush1.bf16.msra.mxu0 %v6040_v33  ;;  %4528 = vmatprep.subr.bf16.mxu1 %v6045_v61  ;;  %v6129_v33 = vld [vmem:[%s7312_s18 + $0x3b4] ss:$8 sps:$4 sm:$0xff]  }
 0x262   : > { %4774 = vmatprep.subr.bf16.mxu0 %v6048_v34  ;;  %v6132_v61 = vld [vmem:[%s7312_s18 + $0x9b4] ss:$8 sps:$4 sm:$0xff]   ;;  %v6127_v34 = vld [vmem:[%s7312_s18 + $0x3b0] ss:$8 sps:$4 sm:$0xff]  }
 0x264   : > { %4529 = vmatpush1.bf16.msra.mxu1 %v6043_v35  ;;  %v6130_v35 = vld [vmem:[%s7312_s18 + $0x9b0] ss:$8 sps:$4 sm:$0xff]  }
 0x265   : > { %4775 = vmatpush1.bf16.msra.mxu0 %v6046_v36  ;;  %4530 = vmatprep.subr.bf16.mxu1 %v6051_v37  ;;  %v6135_v36 = vld [vmem:[%s7312_s18 + $0x3c4] ss:$8 sps:$4 sm:$0xff]  }
 0x266   : > { %4776 = vmatprep.subr.bf16.mxu0 %v6054_v38  ;;  %v6138_v37 = vld [vmem:[%s7312_s18 + $0x9c4] ss:$8 sps:$4 sm:$0xff]   ;;  %v6133_v38 = vld [vmem:[%s7312_s18 + $0x3c0] ss:$8 sps:$4 sm:$0xff]  }
 0x268   : > { %4531 = vmatpush1.bf16.msra.mxu1 %v6049_v39  ;;  %v6136_v39 = vld [vmem:[%s7312_s18 + $0x9c0] ss:$8 sps:$4 sm:$0xff]  }
 0x269   : > { %4777 = vmatpush1.bf16.msra.mxu0 %v6052_v40  ;;  %4532 = vmatprep.subr.bf16.mxu1 %v6057_v41  ;;  %v6141_v40 = vld [vmem:[%s7312_s18 + $0x3d4] ss:$8 sps:$4 sm:$0xff]  }
 0x26a   : > { %4778 = vmatprep.subr.bf16.mxu0 %v6060_v42  ;;  %v6144_v41 = vld [vmem:[%s7312_s18 + $0x9d4] ss:$8 sps:$4 sm:$0xff]   ;;  %v6139_v42 = vld [vmem:[%s7312_s18 + $0x3d0] ss:$8 sps:$4 sm:$0xff]  }
 0x26c   : > { %4533 = vmatpush1.bf16.msra.mxu1 %v6055_v27  ;;  %v6142_v27 = vld [vmem:[%s7312_s18 + $0x9d0] ss:$8 sps:$4 sm:$0xff]  }
 0x26d   : > { %4779 = vmatpush1.bf16.msra.mxu0 %v6058_v45  ;;  %4543 = vmatprep.subr.bf16.mxu1 %v6063_v46  ;;  %v6147_v45 = vld [vmem:[%s7312_s18 + $0x3e4] ss:$8 sps:$4 sm:$0xff]  }
 0x26e   : > { %4789 = vmatprep.subr.bf16.mxu0 %v6066_v47  ;;  %v6150_v46 = vld [vmem:[%s7312_s18 + $0x9e4] ss:$8 sps:$4 sm:$0xff]   ;;  %v2369_v47 = vcombine.high %v7492_v26, %v7492_v26  ;;  %v6151_v26 = vld [vmem:[%s7312_s18 + $0x3f0] ss:$8 sps:$4 sm:$0xff]  }
 0x26f   : > { %4535 = vmatmul.mubr.bf16.vlgmr.msra.gmra.mrb[0].mxu1 %v7568_v49 }
 0x270   : > { %4781 = vmatmul.mubr.bf16.vlgmr.msra.gmra.mrb[0].mxu0 %v7572_v52  ;;  %4544 = vmatpush1.bf16.msra.mxu1 %v6061_v48  ;;  %v6145_v48 = vld [vmem:[%s7312_s18 + $0x3e0] ss:$8 sps:$4 sm:$0xff]  }
 0x271   : > { %4790 = vmatpush1.bf16.msra.mxu0 %v6064_v53  ;;  %4545 = vmatprep.subr.bf16.mxu1 %v6069_v54  ;;  %v6148_v53 = vld [vmem:[%s7312_s18 + $0x9e0] ss:$8 sps:$4 sm:$0xff]   ;;  %v6153_v54 = vld [vmem:[%s7312_s18 + $0x3f4] ss:$8 sps:$4 sm:$0xff]  }
 0x272   : > { %4791 = vmatprep.subr.bf16.mxu0 %v6072_v55  ;;  %4575 = vmatprep.mubr.bf16.mxu1 %v2319_v56  ;;  %v6156_v55 = vld [vmem:[%s7312_s18 + $0x9f4] ss:$8 sps:$4 sm:$0xff]   ;;  %v7644_v56 = vld.sshfl [vmem:[%s7885_s0 + $0x8] sm:$0xff pattern:$0x75316420] }
 0x273   : > { %4821 = vmatprep.mubr.bf16.mxu0 %v2416_v32  ;;  %v7647_v32 = vrot.slane %v2369_v47, %v7362_v58  ;;  %v6226_v47 = vld [vmem:[%s7312_s18 + $0xab0] ss:$8 sps:$4 sm:$0xff]  }
 0x274   : > { %4546 = vmatpush1.bf16.msra.mxu1 %v6067_v44  ;;  %v6154_v44 = vld [vmem:[%s7312_s18 + $0x9f0] ss:$8 sps:$4 sm:$0xff]  }
 0x275   : > { %4792 = vmatpush1.bf16.msra.mxu0 %v6070_v57  ;;  %4547 = vmatprep.subr.bf16.mxu1 %v6075_v59  ;;  %v6159_v57 = vld [vmem:[%s7312_s18 + $0x404] ss:$8 sps:$4 sm:$0xff]  }
 0x276   : > { %4793 = vmatprep.subr.bf16.mxu0 %v6078_v43  ;;  %v6162_v59 = vld [vmem:[%s7312_s18 + $0xa04] ss:$8 sps:$4 sm:$0xff]   ;;  %v2335_v43 = vcombine.high %v7644_v56, %v7644_v56 }
 0x278   : > { %4548 = vmatpush1.bf16.msra.mxu1 %v6073_v50  ;;  %v2385_v50 = vcombine.high %v7647_v32, %v7647_v32 }
 0x279   : > { %4794 = vmatpush1.bf16.msra.mxu0 %v6076_v60  ;;  %4549 = vmatprep.subr.bf16.mxu1 %v6081_v62  ;;  %v6157_v60 = vld [vmem:[%s7312_s18 + $0x400] ss:$8 sps:$4 sm:$0xff]   ;;  %v2317_v62 = vcombine.high %v7568_v49, %v7568_v49 }
 0x27a   : > { %4795 = vmatprep.subr.bf16.mxu0 %v6084_v63  ;;  %v2414_v63 = vcombine.high %v7572_v52, %v7572_v52  ;;  %v7671_v49 = vrot.slane %v2385_v50, %v7362_v58  ;;  %v6171_v52 = vld [vmem:[%s7312_s18 + $0x424] ss:$8 sps:$4 sm:$0xff]  }
 0x27b   : > { %v6246_v50 = vld [vmem:[%s7312_s18 + $0xae4] ss:$8 sps:$4 sm:$0xff]  }
 0x27c   : > { %4550 = vmatpush1.bf16.msra.mxu1 %v6079_v0  ;;  %v6160_v0 = vld [vmem:[%s7312_s18 + $0xa00] ss:$8 sps:$4 sm:$0xff]  }
 0x27d   : > { %4796 = vmatpush1.bf16.msra.mxu0 %v6082_v1  ;;  %4551 = vmatprep.subr.bf16.mxu1 %v6087_v2  ;;  %v6165_v1 = vld [vmem:[%s7312_s18 + $0x414] ss:$8 sps:$4 sm:$0xff]  }
 0x27e   : > { %4797 = vmatprep.subr.bf16.mxu0 %v6090_v3  ;;  %v6168_v2 = vld [vmem:[%s7312_s18 + $0xa14] ss:$8 sps:$4 sm:$0xff]   ;;  %v6163_v3 = vld [vmem:[%s7312_s18 + $0x410] ss:$8 sps:$4 sm:$0xff]  }
 0x280   : > { %4552 = vmatpush1.bf16.msra.mxu1 %v6085_v4  ;;  %v6166_v4 = vld [vmem:[%s7312_s18 + $0xa10] ss:$8 sps:$4 sm:$0xff]  }
 0x281   : > { %4798 = vmatpush1.bf16.msra.mxu0 %v6088_v5  ;;  %4553 = vmatprep.subr.bf16.mxu1 %v6093_v6  ;;  %v7668_v5 = vrot.slane %v2335_v43, %v7362_v58  ;;  %v6174_v6 = vld [vmem:[%s7312_s18 + $0xa24] ss:$8 sps:$4 sm:$0xff]  }
 0x282   : > { %4799 = vmatprep.subr.bf16.mxu0 %v6096_v7  ;;  %v6169_v7 = vld [vmem:[%s7312_s18 + $0x420] ss:$8 sps:$4 sm:$0xff]   ;;  %v6243_v43 = vld [vmem:[%s7312_s18 + $0x4e4] ss:$8 sps:$4 sm:$0xff]  }
 0x284   : > { %4554 = vmatpush1.bf16.msra.mxu1 %v6091_v8  ;;  %v6172_v8 = vld [vmem:[%s7312_s18 + $0xa20] ss:$8 sps:$4 sm:$0xff]  }
 0x285   : > { %4800 = vmatpush1.bf16.msra.mxu0 %v6094_v9  ;;  %4555 = vmatprep.subr.bf16.mxu1 %v6099_v10  ;;  %v6177_v9 = vld [vmem:[%s7312_s18 + $0x434] ss:$8 sps:$4 sm:$0xff]  }
 0x286   : > { %4801 = vmatprep.subr.bf16.mxu0 %v6102_v11  ;;  %v6180_v10 = vld [vmem:[%s7312_s18 + $0xa34] ss:$8 sps:$4 sm:$0xff]   ;;  %v6175_v11 = vld [vmem:[%s7312_s18 + $0x430] ss:$8 sps:$4 sm:$0xff]  }
 0x288   : > { %4556 = vmatpush1.bf16.msra.mxu1 %v6097_v12  ;;  %v6178_v12 = vld [vmem:[%s7312_s18 + $0xa30] ss:$8 sps:$4 sm:$0xff]  }
 0x289   : > { %4802 = vmatpush1.bf16.msra.mxu0 %v6100_v13  ;;  %4557 = vmatprep.subr.bf16.mxu1 %v6105_v14  ;;  %v6183_v13 = vld [vmem:[%s7312_s18 + $0x444] ss:$8 sps:$4 sm:$0xff]  }
 0x28a   : > { %4803 = vmatprep.subr.bf16.mxu0 %v6108_v15  ;;  %v6186_v14 = vld [vmem:[%s7312_s18 + $0xa44] ss:$8 sps:$4 sm:$0xff]   ;;  %v6181_v15 = vld [vmem:[%s7312_s18 + $0x440] ss:$8 sps:$4 sm:$0xff]  }
 0x28c   : > { %4558 = vmatpush1.bf16.msra.mxu1 %v6103_v16  ;;  %v6184_v16 = vld [vmem:[%s7312_s18 + $0xa40] ss:$8 sps:$4 sm:$0xff]  }
 0x28d   : > { %4804 = vmatpush1.bf16.msra.mxu0 %v6106_v17  ;;  %4559 = vmatprep.subr.bf16.mxu1 %v6111_v18  ;;  %v6189_v17 = vld [vmem:[%s7312_s18 + $0x454] ss:$8 sps:$4 sm:$0xff]  }
 0x28e   : > { %4805 = vmatprep.subr.bf16.mxu0 %v6114_v19  ;;  %v6192_v18 = vld [vmem:[%s7312_s18 + $0xa54] ss:$8 sps:$4 sm:$0xff]   ;;  %v6187_v19 = vld [vmem:[%s7312_s18 + $0x450] ss:$8 sps:$4 sm:$0xff]  }
 0x290   : > { %4560 = vmatpush1.bf16.msra.mxu1 %v6109_v20  ;;  %v6190_v20 = vld [vmem:[%s7312_s18 + $0xa50] ss:$8 sps:$4 sm:$0xff]  }
 0x291   : > { %4806 = vmatpush1.bf16.msra.mxu0 %v6112_v21  ;;  %4561 = vmatprep.subr.bf16.mxu1 %v6117_v22  ;;  %v6195_v21 = vld [vmem:[%s7312_s18 + $0x464] ss:$8 sps:$4 sm:$0xff]  }
 0x292   : > { %4807 = vmatprep.subr.bf16.mxu0 %v6120_v23  ;;  %v6198_v22 = vld [vmem:[%s7312_s18 + $0xa64] ss:$8 sps:$4 sm:$0xff]   ;;  %v6193_v23 = vld [vmem:[%s7312_s18 + $0x460] ss:$8 sps:$4 sm:$0xff]  }
 0x294   : > { %4562 = vmatpush1.bf16.msra.mxu1 %v6115_v24  ;;  %v6196_v24 = vld [vmem:[%s7312_s18 + $0xa60] ss:$8 sps:$4 sm:$0xff]  }
 0x295   : > { %4808 = vmatpush1.bf16.msra.mxu0 %v6118_v25  ;;  %4563 = vmatprep.subr.bf16.mxu1 %v6123_v28  ;;  %v6201_v25 = vld [vmem:[%s7312_s18 + $0x474] ss:$8 sps:$4 sm:$0xff]  }
 0x296   : > { %4809 = vmatprep.subr.bf16.mxu0 %v6126_v29  ;;  %v6204_v28 = vld [vmem:[%s7312_s18 + $0xa74] ss:$8 sps:$4 sm:$0xff]   ;;  %v6199_v29 = vld [vmem:[%s7312_s18 + $0x470] ss:$8 sps:$4 sm:$0xff]  }
 0x298   : > { %4564 = vmatpush1.bf16.msra.mxu1 %v6121_v30  ;;  %v6202_v30 = vld [vmem:[%s7312_s18 + $0xa70] ss:$8 sps:$4 sm:$0xff]  }
 0x299   : > { %4810 = vmatpush1.bf16.msra.mxu0 %v6124_v31  ;;  %4565 = vmatprep.subr.bf16.mxu1 %v6129_v33  ;;  %v6207_v31 = vld [vmem:[%s7312_s18 + $0x484] ss:$8 sps:$4 sm:$0xff]  }
 0x29a   : > { %4811 = vmatprep.subr.bf16.mxu0 %v6132_v61  ;;  %v6210_v33 = vld [vmem:[%s7312_s18 + $0xa84] ss:$8 sps:$4 sm:$0xff]   ;;  %v6205_v61 = vld [vmem:[%s7312_s18 + $0x480] ss:$8 sps:$4 sm:$0xff]  }
 0x29c   : > { %4566 = vmatpush1.bf16.msra.mxu1 %v6127_v34  ;;  %v6208_v34 = vld [vmem:[%s7312_s18 + $0xa80] ss:$8 sps:$4 sm:$0xff]  }
 0x29d   : > { %4812 = vmatpush1.bf16.msra.mxu0 %v6130_v35  ;;  %4567 = vmatprep.subr.bf16.mxu1 %v6135_v36  ;;  %v6213_v35 = vld [vmem:[%s7312_s18 + $0x494] ss:$8 sps:$4 sm:$0xff]  }
 0x29e   : > { %4813 = vmatprep.subr.bf16.mxu0 %v6138_v37  ;;  %v6216_v36 = vld [vmem:[%s7312_s18 + $0xa94] ss:$8 sps:$4 sm:$0xff]   ;;  %v6211_v37 = vld [vmem:[%s7312_s18 + $0x490] ss:$8 sps:$4 sm:$0xff]  }
 0x2a0   : > { %4568 = vmatpush1.bf16.msra.mxu1 %v6133_v38  ;;  %v6214_v38 = vld [vmem:[%s7312_s18 + $0xa90] ss:$8 sps:$4 sm:$0xff]  }
 0x2a1   : > { %4814 = vmatpush1.bf16.msra.mxu0 %v6136_v39  ;;  %4569 = vmatprep.subr.bf16.mxu1 %v6141_v40  ;;  %v6219_v39 = vld [vmem:[%s7312_s18 + $0x4a4] ss:$8 sps:$4 sm:$0xff]  }
 0x2a2   : > { %4815 = vmatprep.subr.bf16.mxu0 %v6144_v41  ;;  %v6222_v40 = vld [vmem:[%s7312_s18 + $0xaa4] ss:$8 sps:$4 sm:$0xff]   ;;  %v6217_v41 = vld [vmem:[%s7312_s18 + $0x4a0] ss:$8 sps:$4 sm:$0xff]  }
 0x2a4   : > { %4570 = vmatpush1.bf16.msra.mxu1 %v6139_v42  ;;  %v6220_v42 = vld [vmem:[%s7312_s18 + $0xaa0] ss:$8 sps:$4 sm:$0xff]  }
 0x2a5   : > { %4816 = vmatpush1.bf16.msra.mxu0 %v6142_v27  ;;  %4571 = vmatprep.subr.bf16.mxu1 %v6147_v45  ;;  %v6225_v27 = vld [vmem:[%s7312_s18 + $0x4b4] ss:$8 sps:$4 sm:$0xff]  }
 0x2a6   : > { %4817 = vmatprep.subr.bf16.mxu0 %v6150_v46  ;;  %v6228_v45 = vld [vmem:[%s7312_s18 + $0xab4] ss:$8 sps:$4 sm:$0xff]   ;;  %v6223_v46 = vld [vmem:[%s7312_s18 + $0x4b0] ss:$8 sps:$4 sm:$0xff]  }
 0x2a8   : > { %4572 = vmatpush1.bf16.msra.mxu1 %v6145_v48  ;;  %v6231_v48 = vld [vmem:[%s7312_s18 + $0x4c4] ss:$8 sps:$4 sm:$0xff]  }
 0x2a9   : > { %4818 = vmatpush1.bf16.msra.mxu0 %v6148_v53  ;;  %4573 = vmatprep.subr.bf16.mxu1 %v6153_v54  ;;  %v6234_v53 = vld [vmem:[%s7312_s18 + $0xac4] ss:$8 sps:$4 sm:$0xff]   ;;  %v6229_v54 = vld [vmem:[%s7312_s18 + $0x4c0] ss:$8 sps:$4 sm:$0xff]  }
 0x2aa   : > { %4819 = vmatprep.subr.bf16.mxu0 %v6156_v55  ;;  %v6232_v55 = vld [vmem:[%s7312_s18 + $0xac0] ss:$8 sps:$4 sm:$0xff]  }
 0x2ac   : > { %4574 = vmatpush1.bf16.msra.mxu1 %v6151_v26  ;;  %v6237_v26 = vld [vmem:[%s7312_s18 + $0x4d4] ss:$8 sps:$4 sm:$0xff]  }
 0x2ad   : > { %4820 = vmatpush1.bf16.msra.mxu0 %v6154_v44  ;;  %4584 = vmatprep.subr.bf16.mxu1 %v6159_v57  ;;  %v6240_v44 = vld [vmem:[%s7312_s18 + $0xad4] ss:$8 sps:$4 sm:$0xff]   ;;  %v6235_v57 = vld [vmem:[%s7312_s18 + $0x4d0] ss:$8 sps:$4 sm:$0xff]  }
 0x2ae   : > { %4830 = vmatprep.subr.bf16.mxu0 %v6162_v59  ;;  %v6238_v59 = vld [vmem:[%s7312_s18 + $0xad0] ss:$8 sps:$4 sm:$0xff]  }
 0x2af   : > { %4576 = vmatmul.mubr.bf16.vlgmr.msra.gmra.mrb[0].mxu1 %v2317_v62  ;;  %v6244_v62 = vld [vmem:[%s7312_s18 + $0xae0] ss:$8 sps:$4 sm:$0xff]  }
 0x2b0   : > { %4822 = vmatmul.mubr.bf16.vlgmr.msra.gmra.mrb[0].mxu0 %v2414_v63  ;;  %4585 = vmatpush1.bf16.msra.mxu1 %v6157_v60  ;;  %v6241_v60 = vld [vmem:[%s7312_s18 + $0x4e0] ss:$8 sps:$4 sm:$0xff]   ;;  %v6249_v63 = vld [vmem:[%s7312_s18 + $0x4f4] ss:$8 sps:$4 sm:$0xff]  }
 0x2b1   : > { %4831 = vmatpush1.bf16.msra.mxu0 %v6160_v0  ;;  %4586 = vmatprep.subr.bf16.mxu1 %v6165_v1  ;;  %v6252_v0 = vld [vmem:[%s7312_s18 + $0xaf4] ss:$8 sps:$4 sm:$0xff]   ;;  %v6247_v1 = vld [vmem:[%s7312_s18 + $0x4f0] ss:$8 sps:$4 sm:$0xff]  }
 0x2b2   : > { %4832 = vmatprep.subr.bf16.mxu0 %v6168_v2  ;;  %4616 = vmatprep.mubr.bf16.mxu1 %v7668_v5  ;;  %v6250_v2 = vld [vmem:[%s7312_s18 + $0xaf0] ss:$8 sps:$4 sm:$0xff]  }
 0x2b3   : > { %4862 = vmatprep.mubr.bf16.mxu0 %v7671_v49 }
 0x2b4   : > { %4587 = vmatpush1.bf16.msra.mxu1 %v6163_v3  ;;  %v6255_v3 = vld [vmem:[%s7312_s18 + $0x504] ss:$8 sps:$4 sm:$0xff]  }
 0x2b5   : > { %4833 = vmatpush1.bf16.msra.mxu0 %v6166_v4  ;;  %4588 = vmatprep.subr.bf16.mxu1 %v6171_v52  ;;  %v6259_v4 = vld [vmem:[%s7312_s18 + $0xb04] ss:$8 sps:$4 sm:$0xff]   ;;  %v7735_v52 = vrot.slane %v7644_v56, %v7362_v58  ;;  %v2367_v56 = vcombine.high %v7668_v5, %v7668_v5 }
 0x2b6   : > { %4834 = vmatprep.subr.bf16.mxu0 %v6174_v6  ;;  %v7739_v6 = vrot.slane %v7647_v32, %v7362_v58  ;;  %v6260_v32 = vld [vmem:[%s7312_s18 + $0x510] ss:$8 sps:$4 sm:$0xff]   ;;  %v6268_v5 = vld [vmem:[%s7312_s18 + $0x524] ss:$8 sps:$4 sm:$0xff]  }
 0x2b8   : > { %4589 = vmatpush1.bf16.msra.mxu1 %v6169_v7  ;;  %v6253_v7 = vld [vmem:[%s7312_s18 + $0x500] ss:$8 sps:$4 sm:$0xff]  }
 0x2b9   : > { %4835 = vmatpush1.bf16.msra.mxu0 %v6172_v8  ;;  %4590 = vmatprep.subr.bf16.mxu1 %v6177_v9  ;;  %v6257_v8 = vld [vmem:[%s7312_s18 + $0xb00] ss:$8 sps:$4 sm:$0xff]   ;;  %v6262_v9 = vld [vmem:[%s7312_s18 + $0x514] ss:$8 sps:$4 sm:$0xff]  }
 0x2ba   : > { %4836 = vmatprep.subr.bf16.mxu0 %v6180_v10  ;;  %v6265_v10 = vld [vmem:[%s7312_s18 + $0xb14] ss:$8 sps:$4 sm:$0xff]  }
 0x2bc   : > { %4591 = vmatpush1.bf16.msra.mxu1 %v6175_v11  ;;  %v2417_v11 = vcombine.high %v7671_v49, %v7671_v49  ;;  %v6266_v49 = vld [vmem:[%s7312_s18 + $0x520] ss:$8 sps:$4 sm:$0xff]  }
 0x2bd   : > { %4837 = vmatpush1.bf16.msra.mxu0 %v6178_v12  ;;  %4592 = vmatprep.subr.bf16.mxu1 %v6183_v13  ;;  %v6263_v12 = vld [vmem:[%s7312_s18 + $0xb10] ss:$8 sps:$4 sm:$0xff]   ;;  %v6271_v13 = vld [vmem:[%s7312_s18 + $0xb24] ss:$8 sps:$4 sm:$0xff]  }
 0x2be   : > { %4838 = vmatprep.subr.bf16.mxu0 %v6186_v14  ;;  %v6269_v14 = vld [vmem:[%s7312_s18 + $0xb20] ss:$8 sps:$4 sm:$0xff]  }
 0x2c0   : > { %4593 = vmatpush1.bf16.msra.mxu1 %v6181_v15  ;;  %v6274_v15 = vld [vmem:[%s7312_s18 + $0x534] ss:$8 sps:$4 sm:$0xff]  }
 0x2c1   : > { %4839 = vmatpush1.bf16.msra.mxu0 %v6184_v16  ;;  %4594 = vmatprep.subr.bf16.mxu1 %v6189_v17  ;;  %v6277_v16 = vld [vmem:[%s7312_s18 + $0xb34] ss:$8 sps:$4 sm:$0xff]   ;;  %v6272_v17 = vld [vmem:[%s7312_s18 + $0x530] ss:$8 sps:$4 sm:$0xff]  }
 0x2c2   : > { %4840 = vmatprep.subr.bf16.mxu0 %v6192_v18  ;;  %v6275_v18 = vld [vmem:[%s7312_s18 + $0xb30] ss:$8 sps:$4 sm:$0xff]  }
 0x2c4   : > { %4595 = vmatpush1.bf16.msra.mxu1 %v6187_v19  ;;  %v6280_v19 = vld [vmem:[%s7312_s18 + $0x544] ss:$8 sps:$4 sm:$0xff]  }
 0x2c5   : > { %4841 = vmatpush1.bf16.msra.mxu0 %v6190_v20  ;;  %4596 = vmatprep.subr.bf16.mxu1 %v6195_v21  ;;  %v6283_v20 = vld [vmem:[%s7312_s18 + $0xb44] ss:$8 sps:$4 sm:$0xff]   ;;  %v6278_v21 = vld [vmem:[%s7312_s18 + $0x540] ss:$8 sps:$4 sm:$0xff]  }
 0x2c6   : > { %4842 = vmatprep.subr.bf16.mxu0 %v6198_v22  ;;  %v6281_v22 = vld [vmem:[%s7312_s18 + $0xb40] ss:$8 sps:$4 sm:$0xff]  }
 0x2c8   : > { %4597 = vmatpush1.bf16.msra.mxu1 %v6193_v23  ;;  %v6286_v23 = vld [vmem:[%s7312_s18 + $0x554] ss:$8 sps:$4 sm:$0xff]  }
 0x2c9   : > { %4843 = vmatpush1.bf16.msra.mxu0 %v6196_v24  ;;  %4598 = vmatprep.subr.bf16.mxu1 %v6201_v25  ;;  %v6289_v24 = vld [vmem:[%s7312_s18 + $0xb54] ss:$8 sps:$4 sm:$0xff]   ;;  %v6284_v25 = vld [vmem:[%s7312_s18 + $0x550] ss:$8 sps:$4 sm:$0xff]  }
 0x2ca   : > { %4844 = vmatprep.subr.bf16.mxu0 %v6204_v28  ;;  %v6287_v28 = vld [vmem:[%s7312_s18 + $0xb50] ss:$8 sps:$4 sm:$0xff]  }
 0x2cc   : > { %4599 = vmatpush1.bf16.msra.mxu1 %v6199_v29  ;;  %v6292_v29 = vld [vmem:[%s7312_s18 + $0x564] ss:$8 sps:$4 sm:$0xff]  }
 0x2cd   : > { %4845 = vmatpush1.bf16.msra.mxu0 %v6202_v30  ;;  %4600 = vmatprep.subr.bf16.mxu1 %v6207_v31  ;;  %v6295_v30 = vld [vmem:[%s7312_s18 + $0xb64] ss:$8 sps:$4 sm:$0xff]   ;;  %v6290_v31 = vld [vmem:[%s7312_s18 + $0x560] ss:$8 sps:$4 sm:$0xff]  }
 0x2ce   : > { %4846 = vmatprep.subr.bf16.mxu0 %v6210_v33  ;;  %v6293_v33 = vld [vmem:[%s7312_s18 + $0xb60] ss:$8 sps:$4 sm:$0xff]  }
 0x2d0   : > { %4601 = vmatpush1.bf16.msra.mxu1 %v6205_v61  ;;  %v6298_v61 = vld [vmem:[%s7312_s18 + $0x574] ss:$8 sps:$4 sm:$0xff]  }
 0x2d1   : > { %4847 = vmatpush1.bf16.msra.mxu0 %v6208_v34  ;;  %4602 = vmatprep.subr.bf16.mxu1 %v6213_v35  ;;  %v6301_v34 = vld [vmem:[%s7312_s18 + $0xb74] ss:$8 sps:$4 sm:$0xff]   ;;  %v6296_v35 = vld [vmem:[%s7312_s18 + $0x570] ss:$8 sps:$4 sm:$0xff]  }
 0x2d2   : > { %4848 = vmatprep.subr.bf16.mxu0 %v6216_v36  ;;  %v6299_v36 = vld [vmem:[%s7312_s18 + $0xb70] ss:$8 sps:$4 sm:$0xff]  }
 0x2d4   : > { %4603 = vmatpush1.bf16.msra.mxu1 %v6211_v37  ;;  %v6304_v37 = vld [vmem:[%s7312_s18 + $0x584] ss:$8 sps:$4 sm:$0xff]  }
 0x2d5   : > { %4849 = vmatpush1.bf16.msra.mxu0 %v6214_v38  ;;  %4604 = vmatprep.subr.bf16.mxu1 %v6219_v39  ;;  %v6307_v38 = vld [vmem:[%s7312_s18 + $0xb84] ss:$8 sps:$4 sm:$0xff]   ;;  %v6302_v39 = vld [vmem:[%s7312_s18 + $0x580] ss:$8 sps:$4 sm:$0xff]  }
 0x2d6   : > { %4850 = vmatprep.subr.bf16.mxu0 %v6222_v40  ;;  %v6305_v40 = vld [vmem:[%s7312_s18 + $0xb80] ss:$8 sps:$4 sm:$0xff]  }
 0x2d8   : > { %4605 = vmatpush1.bf16.msra.mxu1 %v6217_v41  ;;  %v6310_v41 = vld [vmem:[%s7312_s18 + $0x594] ss:$8 sps:$4 sm:$0xff]  }
 0x2d9   : > { %4851 = vmatpush1.bf16.msra.mxu0 %v6220_v42  ;;  %4606 = vmatprep.subr.bf16.mxu1 %v6225_v27  ;;  %v6313_v42 = vld [vmem:[%s7312_s18 + $0xb94] ss:$8 sps:$4 sm:$0xff]   ;;  %v6308_v27 = vld [vmem:[%s7312_s18 + $0x590] ss:$8 sps:$4 sm:$0xff]  }
 0x2da   : > { %4852 = vmatprep.subr.bf16.mxu0 %v6228_v45  ;;  %v6311_v45 = vld [vmem:[%s7312_s18 + $0xb90] ss:$8 sps:$4 sm:$0xff]  }
 0x2dc   : > { %4607 = vmatpush1.bf16.msra.mxu1 %v6223_v46  ;;  %v6316_v46 = vld [vmem:[%s7312_s18 + $0x5a4] ss:$8 sps:$4 sm:$0xff]  }
 0x2dd   : > { %4853 = vmatpush1.bf16.msra.mxu0 %v6226_v47  ;;  %4608 = vmatprep.subr.bf16.mxu1 %v6231_v48  ;;  %v6319_v47 = vld [vmem:[%s7312_s18 + $0xba4] ss:$8 sps:$4 sm:$0xff]   ;;  %v6314_v48 = vld [vmem:[%s7312_s18 + $0x5a0] ss:$8 sps:$4 sm:$0xff]  }
 0x2de   : > { %4854 = vmatprep.subr.bf16.mxu0 %v6234_v53  ;;  %v6317_v53 = vld [vmem:[%s7312_s18 + $0xba0] ss:$8 sps:$4 sm:$0xff]  }
 0x2e0   : > { %4609 = vmatpush1.bf16.msra.mxu1 %v6229_v54  ;;  %v6322_v54 = vld [vmem:[%s7312_s18 + $0x5b4] ss:$8 sps:$4 sm:$0xff]  }
 0x2e1   : > { %4855 = vmatpush1.bf16.msra.mxu0 %v6232_v55  ;;  %4610 = vmatprep.subr.bf16.mxu1 %v6237_v26  ;;  %v6325_v55 = vld [vmem:[%s7312_s18 + $0xbb4] ss:$8 sps:$4 sm:$0xff]   ;;  %v6320_v26 = vld [vmem:[%s7312_s18 + $0x5b0] ss:$8 sps:$4 sm:$0xff]  }
 0x2e2   : > { %4856 = vmatprep.subr.bf16.mxu0 %v6240_v44  ;;  %v6323_v44 = vld [vmem:[%s7312_s18 + $0xbb0] ss:$8 sps:$4 sm:$0xff]  }
 0x2e4   : > { %4611 = vmatpush1.bf16.msra.mxu1 %v6235_v57  ;;  %v6328_v57 = vld [vmem:[%s7312_s18 + $0x5c4] ss:$8 sps:$4 sm:$0xff]  }
 0x2e5   : > { %4857 = vmatpush1.bf16.msra.mxu0 %v6238_v59  ;;  %4612 = vmatprep.subr.bf16.mxu1 %v6243_v43  ;;  %v6331_v59 = vld [vmem:[%s7312_s18 + $0xbc4] ss:$8 sps:$4 sm:$0xff]   ;;  %v6326_v43 = vld [vmem:[%s7312_s18 + $0x5c0] ss:$8 sps:$4 sm:$0xff]  }
 0x2e6   : > { %4858 = vmatprep.subr.bf16.mxu0 %v6246_v50  ;;  %v6329_v50 = vld [vmem:[%s7312_s18 + $0xbc0] ss:$8 sps:$4 sm:$0xff]  }
 0x2e8   : > { %4613 = vmatpush1.bf16.msra.mxu1 %v6241_v60  ;;  %v6334_v60 = vld [vmem:[%s7312_s18 + $0x5d4] ss:$8 sps:$4 sm:$0xff]  }
 0x2e9   : > { %4859 = vmatpush1.bf16.msra.mxu0 %v6244_v62  ;;  %4614 = vmatprep.subr.bf16.mxu1 %v6249_v63  ;;  %v6337_v62 = vld [vmem:[%s7312_s18 + $0xbd4] ss:$8 sps:$4 sm:$0xff]   ;;  %v6332_v63 = vld [vmem:[%s7312_s18 + $0x5d0] ss:$8 sps:$4 sm:$0xff]  }
 0x2ea   : > { %4860 = vmatprep.subr.bf16.mxu0 %v6252_v0  ;;  %v6335_v0 = vld [vmem:[%s7312_s18 + $0xbd0] ss:$8 sps:$4 sm:$0xff]  }
 0x2ec   : > { %4615 = vmatpush1.bf16.msra.mxu1 %v6247_v1  ;;  %v6340_v1 = vld [vmem:[%s7312_s18 + $0x5e4] ss:$8 sps:$4 sm:$0xff]  }
 0x2ed   : > { %4861 = vmatpush1.bf16.msra.mxu0 %v6250_v2  ;;  %4625 = vmatprep.subr.bf16.mxu1 %v6255_v3  ;;  %v6343_v2 = vld [vmem:[%s7312_s18 + $0xbe4] ss:$8 sps:$4 sm:$0xff]   ;;  %v6338_v3 = vld [vmem:[%s7312_s18 + $0x5e0] ss:$8 sps:$4 sm:$0xff]  }
 0x2ee   : > { %4871 = vmatprep.subr.bf16.mxu0 %v6259_v4  ;;  %v6341_v4 = vld [vmem:[%s7312_s18 + $0xbe0] ss:$8 sps:$4 sm:$0xff]  }
 0x2ef   : > { %4617 = vmatmul.mubr.bf16.vlgmr.msra.gmra.mrb[0].mxu1 %v7735_v52 }
 0x2f0   : > { %4863 = vmatmul.mubr.bf16.vlgmr.msra.gmra.mrb[0].mxu0 %v7739_v6  ;;  %4626 = vmatpush1.bf16.msra.mxu1 %v6253_v7  ;;  %v6346_v7 = vld [vmem:[%s7312_s18 + $0x5f4] ss:$8 sps:$4 sm:$0xff]  }
 0x2f1   : > { %4872 = vmatpush1.bf16.msra.mxu0 %v6257_v8  ;;  %4627 = vmatprep.subr.bf16.mxu1 %v6262_v9  ;;  %v6349_v8 = vld [vmem:[%s7312_s18 + $0xbf4] ss:$8 sps:$4 sm:$0xff]   ;;  %v6344_v9 = vld [vmem:[%s7312_s18 + $0x5f0] ss:$8 sps:$4 sm:$0xff]  }
 0x2f2   : > { %4873 = vmatprep.subr.bf16.mxu0 %v6265_v10  ;;  %4657 = vmatprep.mubr.bf16.mxu1 %v2367_v56  ;;  %v6347_v10 = vld [vmem:[%s7312_s18 + $0xbf0] ss:$8 sps:$4 sm:$0xff]   ;;  %v6352_v56 = vld [vmem:[%s7312_s18 + $0xc04] ss:$8 sps:$4 sm:$0xff]  }
 0x2f3   : > { %4903 = vmatprep.mubr.bf16.mxu0 %v2417_v11  ;;  %v6362_v11 = vld [vmem:[%s7310_s20 + $0x40] sm:$0xff]  }
 0x2f4   : > { %4628 = vmatpush1.bf16.msra.mxu1 %v6260_v32  ;;  %v2365_v32 = vcombine.high %v7735_v52, %v7735_v52  ;;  %v6353_v52 = vld [vmem:[%s7312_s18 + $0xc10] ss:$8 sps:$4 sm:$0xff]  }
 0x2f5   : > { %4874 = vmatpush1.bf16.msra.mxu0 %v6263_v12  ;;  %4629 = vmatprep.subr.bf16.mxu1 %v6268_v5  ;;  %v2415_v12 = vcombine.high %v7739_v6, %v7739_v6  ;;  %v6350_v5 = vld [vmem:[%s7312_s18 + $0xc00] ss:$8 sps:$4 sm:$0xff]   ;;  %v6358_v6 = vld [vmem:[%s7312_s18 + $0xc24] ss:$8 sps:$4 sm:$0xff]  }
 0x2f6   : > { %4875 = vmatprep.subr.bf16.mxu0 %v6271_v13  ;;  %v6355_v13 = vld [vmem:[%s7312_s18 + $0xc14] ss:$8 sps:$4 sm:$0xff]  }
 0x2f8   : > { %4630 = vmatpush1.bf16.msra.mxu1 %v6266_v49  ;;  %v6363_v49 = vld [vmem:[%s7310_s20] sm:$0xff]  }
 0x2f9   : > { %4876 = vmatpush1.bf16.msra.mxu0 %v6269_v14  ;;  %4631 = vmatprep.subr.bf16.mxu1 %v6274_v15  ;;  %v6364_v14 = vld [vmem:[%s7310_s20 + $0x48] sm:$0xff]   ;;  %v6438_v15 = vmov 0  }
 0x2fa   : > { %4877 = vmatprep.subr.bf16.mxu0 %v6277_v16  ;;  %v6365_v16 = vld [vmem:[%s7310_s20 + $0x8] sm:$0xff]  }
 0x2fc   : > { %4632 = vmatpush1.bf16.msra.mxu1 %v6272_v17  ;;  %v6356_v17 = vld [vmem:[%s7312_s18 + $0xc20] ss:$8 sps:$4 sm:$0xff]  }
 0x2fd   : > { %4878 = vmatpush1.bf16.msra.mxu0 %v6275_v18  ;;  %4633 = vmatprep.subr.bf16.mxu1 %v6280_v19  ;;  %v6361_v18 = vld [vmem:[%s7312_s18 + $0xc34] ss:$8 sps:$4 sm:$0xff]   ;;  %v6359_v19 = vld [vmem:[%s7312_s18 + $0xc30] ss:$8 sps:$4 sm:$0xff]  }
 0x2fe   : > { %4879 = vmatprep.subr.bf16.mxu0 %v6283_v20  ;;  %v5246_v20 = vld.sshfl [vmem:[%s7885_s0 + $0x18] sm:$0x1 pattern:$0x75316420] }
 0x300   : > { %4634 = vmatpush1.bf16.msra.mxu1 %v6278_v21  ;;  %v2431_v21 = vrot.slane %v5246_v20, %v7362_v58  ;;  %v6372_v58 = vld [vmem:[%s7310_s20 + $0x68] sm:$0xff]  }
 0x301   : > { %4880 = vmatpush1.bf16.msra.mxu0 %v6281_v22  ;;  %4635 = vmatprep.subr.bf16.mxu1 %v6286_v23  ;;  %v6366_v22 = vld [vmem:[%s7310_s20 + $0x50] sm:$0xff]  }
 0x302   : > { %4881 = vmatprep.subr.bf16.mxu0 %v6289_v24  ;;  %v6367_v23 = vld [vmem:[%s7310_s20 + $0x10] sm:$0xff]   ;;  %v6368_v24 = vld [vmem:[%s7310_s20 + $0x58] sm:$0xff]  }
 0x304   : > { %4636 = vmatpush1.bf16.msra.mxu1 %v6284_v25  ;;  %v6369_v25 = vld [vmem:[%s7310_s20 + $0x18] sm:$0xff]  }
 0x305   : > { %4882 = vmatpush1.bf16.msra.mxu0 %v6287_v28  ;;  %4637 = vmatprep.subr.bf16.mxu1 %v6292_v29  ;;  %v6370_v28 = vld [vmem:[%s7310_s20 + $0x60] sm:$0xff]  }
 0x306   : > { %4883 = vmatprep.subr.bf16.mxu0 %v6295_v30  ;;  %v6371_v29 = vld [vmem:[%s7310_s20 + $0x20] sm:$0xff]   ;;  %v6373_v30 = vld [vmem:[%s7310_s20 + $0x28] sm:$0xff]  }
 0x308   : > { %4638 = vmatpush1.bf16.msra.mxu1 %v6290_v31  ;;  %v6374_v31 = vld [vmem:[%s7310_s20 + $0x70] sm:$0xff]  }
 0x309   : > { %4884 = vmatpush1.bf16.msra.mxu0 %v6293_v33  ;;  %4639 = vmatprep.subr.bf16.mxu1 %v6298_v61  ;;  %v6375_v33 = vld [vmem:[%s7310_s20 + $0x30] sm:$0xff]   ;;  %v6376_v61 = vld [vmem:[%s7310_s20 + $0x78] sm:$0xff]  }
 0x30a   : > { %4885 = vmatprep.subr.bf16.mxu0 %v6301_v34  ;;  %v6377_v34 = vld [vmem:[%s7310_s20 + $0x38] sm:$0xff]  }
 0x30c   : > { %4640 = vmatpush1.bf16.msra.mxu1 %v6296_v35 }
 0x30d   : > { %4886 = vmatpush1.bf16.msra.mxu0 %v6299_v36  ;;  %4641 = vmatprep.subr.bf16.mxu1 %v6304_v37 }
 0x30e   : > { %4887 = vmatprep.subr.bf16.mxu0 %v6307_v38 }
 0x310   : > { %4642 = vmatpush1.bf16.msra.mxu1 %v6302_v39  ;;  %v2259_v39 = vsub.s32 0, %v7354_v51 }
 0x311   : > { %4888 = vmatpush1.bf16.msra.mxu0 %v6305_v40  ;;  %4643 = vmatprep.subr.bf16.mxu1 %v6310_v41  ;;  %v2255_v40 = vld [vmem:[%s1844_s14] sm:$0x3]  ;;  %v2263_v41 = vsub.s32 1, %v7354_v51 }
 0x312   : > { %4889 = vmatprep.subr.bf16.mxu0 %v6313_v42  ;;  %v2260_v42 = vrot.slane %v2255_v40, %v2259_v39 }
 0x314   : > { %4644 = vmatpush1.bf16.msra.mxu1 %v6308_v27  ;;  %v2264_v27 = vrot.slane %v2255_v40, %v2263_v41 }
 0x315   : > { %4890 = vmatpush1.bf16.msra.mxu0 %v6311_v45  ;;  %4645 = vmatprep.subr.bf16.mxu1 %v6316_v46 }
 0x316   : > { %4891 = vmatprep.subr.bf16.mxu0 %v6319_v47 }
 0x318   : > { %4646 = vmatpush1.bf16.msra.mxu1 %v6314_v48 }
 0x319   : > { %4892 = vmatpush1.bf16.msra.mxu0 %v6317_v53  ;;  %4647 = vmatprep.subr.bf16.mxu1 %v6322_v54 }
 0x31a   : > { %4893 = vmatprep.subr.bf16.mxu0 %v6325_v55 }
 0x31c   : > { %4648 = vmatpush1.bf16.msra.mxu1 %v6320_v26 }
 0x31d   : > { %4894 = vmatpush1.bf16.msra.mxu0 %v6323_v44  ;;  %4649 = vmatprep.subr.bf16.mxu1 %v6328_v57 }
 0x31e   : > { %4895 = vmatprep.subr.bf16.mxu0 %v6331_v59 }
 0x320   : > { %4650 = vmatpush1.bf16.msra.mxu1 %v6326_v43 }
 0x321   : > { %4896 = vmatpush1.bf16.msra.mxu0 %v6329_v50  ;;  %4651 = vmatprep.subr.bf16.mxu1 %v6334_v60  ;;  %v4957_v60 = vld [vmem:[#allocation2] sm:$0x3] }
 0x322   : > { %4897 = vmatprep.subr.bf16.mxu0 %v6337_v62 }
 0x324   : > { %4652 = vmatpush1.bf16.msra.mxu1 %v6332_v63 }
 0x325   : > { %4898 = vmatpush1.bf16.msra.mxu0 %v6335_v0  ;;  %4653 = vmatprep.subr.bf16.mxu1 %v6340_v1 }
 0x326   : > { %4899 = vmatprep.subr.bf16.mxu0 %v6343_v2 }
 0x328   : > { %4654 = vmatpush1.bf16.msra.mxu1 %v6338_v3  ;;  %v5657_v3 = vld [vmem:[%s7889_s4] ss:$0 sm:$0xff] (!%p5656_p11) }
 0x329   : > { %4900 = vmatpush1.bf16.msra.mxu0 %v6341_v4  ;;  %4655 = vmatprep.subr.bf16.mxu1 %v6346_v7  ;;  %v6439_v7 = vmov (!%p5656_p11), 0  }
 0x32a   : > { %4901 = vmatprep.subr.bf16.mxu0 %v6349_v8  ;;  %6379 = vset.pattern.permute.xlu1 (!%p5656_p11), %v6439_v7 }
 0x32b   : > { %6380 = vset.pattern.permute.xlu0 (!%p5656_p11), %v6439_v7 }
 0x32c   : > { %4656 = vmatpush1.bf16.msra.mxu1 %v6344_v9 }
 0x32d   : > { %4902 = vmatpush1.bf16.msra.mxu0 %v6347_v10  ;;  %5663 = vmatprep.subr.bf16.mxu1 %v6362_v11 }
 0x32e   : > { %4912 = vmatprep.subr.bf16.mxu0 %v6352_v56 }
 0x32f   : > { %4658 = vmatmul.mubr.bf16.vlgmr.msra.gmra.mrb[0].mxu1 %v2365_v32 }
 0x330   : > { %4904 = vmatmul.mubr.bf16.vlgmr.msra.gmra.mrb[0].mxu0 %v2415_v12  ;;  %5664 = vmatpush3.bf16.msra.mxu1 %v6363_v49 }
 0x331   : > { %4913 = vmatpush1.bf16.msra.mxu0 %v6350_v5  ;;  %4944 = vmatprep.mubr.bf16.mxu0 %v6438_v15 }
 0x332   : > { %4914 = vmatprep.subr.bf16.mxu0 %v6355_v13  ;;  %5665 = vmatprep.subr.bf16.mxu1 %v6364_v14 }
 0x334   : > { %5666 = vmatpush3.bf16.msra.mxu1 %v6365_v16 }
 0x335   : > { %4915 = vmatpush1.bf16.msra.mxu0 %v6353_v52  ;;  %5667 = vmatprep.subr.bf16.mxu1 %v6366_v22 }
 0x336   : > { %4916 = vmatprep.subr.bf16.mxu0 %v6358_v6 }
 0x338   : > { %5668 = vmatpush3.bf16.msra.mxu1 %v6367_v23 }
 0x339   : > { %4917 = vmatpush1.bf16.msra.mxu0 %v6356_v17  ;;  %5669 = vmatprep.subr.bf16.mxu1 %v6368_v24 }
 0x33a   : > { %4918 = vmatprep.subr.bf16.mxu0 %v6361_v18 }
 0x33c   : > { %5670 = vmatpush3.bf16.msra.mxu1 %v6369_v25 }
 0x33d   : > { %4919 = vmatpush1.bf16.msra.mxu0 %v6359_v19  ;;  %5671 = vmatprep.subr.bf16.mxu1 %v6370_v28 }
 0x340   : > { %5639 = vmatmul.mubr.msk.bf16.vlgmr.msra.gmra.mrb[0].mxu0 %vm4416_vm1, %v2431_v21  ;;  %5672 = vmatpush3.bf16.msra.mxu1 %v6371_v29 }
 0x341   : > { %5673 = vmatprep.subr.bf16.mxu1 %v6372_v58 }
 0x344   : > { %5674 = vmatpush3.bf16.msra.mxu1 %v6373_v30 }
 0x345   : > { %5675 = vmatprep.subr.bf16.mxu1 %v6374_v31 }
 0x348   : > { %5676 = vmatpush3.bf16.msra.mxu1 %v6375_v33 }
 0x349   : > { %5677 = vmatprep.subr.bf16.mxu1 %v6376_v61 }
 0x34c   : > { %5678 = vmatpush3.bf16.msra.mxu1 %v6377_v34 }
 0x402   : > { %v4659_v35 = vpop.f32.mrb[0].mxu1 }
 0x403   : > { %v4661_v36 = vpop.f32.mrb[1].mxu1  ;;  %v5685_v45 = vadd.f32 %v4659_v35, %v2260_v42 }
 0x404   : > { %v4663_v37 = vpop.f32.mrb[2].mxu1  ;;  %v5687_v46 = vadd.f32 %v4661_v36, %v2264_v27 }
 0x405   : > { %v4664_v38 = vpop.f32.mrb[3].mxu1 }
 0x413   : > { %v4946_v47 = vpop.f32.mrb[0].mxu0 }
 0x414   : > { %v5686_v48 = vadd.f32 %v5685_v45, %v4946_v47  ;;  %v4948_v53 = vpop.f32.mrb[1].mxu0 }
 0x415   : > { %v5688_v54 = vadd.f32 %v5687_v46, %v4948_v53  ;;  %v4950_v55 = vpop.f32.mrb[2].mxu0 }
 0x416   : > { %v4953_v26 = vmax.f32 %v5686_v48, 0.0  ;;  %v4951_v44 = vpop.f32.mrb[3].mxu0 }
 0x417   : > { %v4954_v57 = vmax.f32 %v5688_v54, 0.0 }
 0x418   : > { %v4955_v43 = vpack.c.bf16 %v4953_v26, %v4953_v26 }
 0x419   : > { %v4956_v59 = vpack.c.bf16 %v4954_v57, %v4954_v57 }
 0x41b   : > { %5118 = vmatprep.mubr.bf16.mxu1 %v4956_v59 }
 0x41c   : > { %5119 = vmatmul.mubr.bf16.vlgmr.msra.gmra.mrb[4].mxu1 %v4955_v43 }
 0x4ef   : > { %v5679_v50 = vpop.f32.mrb[4].mxu1  ;;  %5132 = sbr.rel (%p5656_p11) target bundleno = 1659 (0x67b), region = 86 }
 0x4f0   : > { %v5680_v62 = vpop.f32.mrb[5].mxu1 }
 0x4f1   : > { %v5681_v51 = vadd.f32 %v5680_v62, %v5679_v50  ;;  %v5682_v63 = vpop.f32.mrb[6].mxu1 }
 0x4f2   : > { %v5683_v0 = vpop.f32.mrb[7].mxu1 }
 0x4f3   : > { %v5126_v1 = vadd.f32 %v5681_v51, %v4957_v60 }
 0x4f5   : > { %5128 = vst.msk [vmem:[#allocation2] sm:$0x3] %vm5127_vm2, %v5126_v1 }
 0x4fc   : > { %v5133_v2 = vld [vmem:[#allocation2] sm:$0x3] }
 0x4fd   : > { %v5141_v4 = vadd.f32 %v5657_v3, %v5133_v2 }
 0x4ff   : > { %5143 = vrot.lane.b32.xlu0 %v5141_v4, %s6440_s13  ;;  %5154 = vperm.xlu1 %6379, %v5141_v4  }
 0x571   : > { %v5144_v8 = vpop.permute.xlu0 %5143 }
 0x572   : > { %v5147_v9 = vsel %vm5146_vm3, %v5144_v8, 0.0 }
 0x573   : > { %5148 = vadd.xlane.f32.xlu0 %v5147_v9 }
 0x57e   : > { %v5155_v11 = vpop.permute.xlu1 %5154 }
 0x600   : > { %v5149_v10 = vpop.xlane.xlu0 %5148 }
 0x601   : > { %v5151_v56 = vmul.f32 0.16666667, %v5149_v10 }
 0x603   : > { %v5152_v32 = vsub.f32 %v5141_v4, %v5151_v56 }
 0x605   : > { %v5157_v12 = vadd.f32 %v5155_v11, %v5152_v32 }
 0x607   : > { %5159 = vrot.lane.b32.xlu1 %v5157_v12, %s6440_s13 }
 0x679   : > { %v5160_v5 = vpop.permute.xlu1 %5159 }
 0x67a   : > { %5162 = vst.msk [vmem:[#allocation4] sm:$0x3] %vm5146_vm3, %v5160_v5 }
 0x67b PF: > { %p5739_p12 = scmp.eq.s32.totalorder %s6488_s21, 3  ;;  %s6441_s14 = smov [#allocation4]  }
 0x67c   : > { %s5170_s15 = sshll.u32 %s6441_s14, 4  ;;  %s5171_s15 = int_to_ptr.vmem [resolvable:$true] %s5170_s15 }
 0x67d   : > { %s6382_s16 = scalar_lea.vmem %s5171_s15, 32  ;;  %p6389_p2 = scmp.lt.s32.totalorder %s5171_s15, %s5171_s15 }
 0x67e   : > { %p6383_p13 = scmp.ne.s32.totalorder %s5171_s15, %s6382_s16  ;;  %p6390_p3 = scmp.lt.s32.totalorder %s6382_s16, %s6382_s16 }
 0x680   : > { %p6384_p0 = pnand %p6383_p13, %p5739_p12  ;;  %p6391_p4 = por %p6390_p3, %p6389_p2 }
 0x682   : > { %p6385_p1 = pneg %p6384_p0 }
 0x684   : > { %p6392_p5 = pnand %p6391_p4, %p6385_p1 }
 0x686   : > { %6395 = shalt.err (!%p6392_p5)
}
 0x687   : > { %s6396_s18 = scalar_lea.hbm %s7890_s5, 32 }
 0x688   : > { %p6397_p6 = scmp.ne.s32.totalorder %s7890_s5, %s6396_s18  ;;  %p6402_p9 = scmp.lt.u32.totalorder %s6396_s18, %s7890_s5 }
 0x68a   : > { %p6398_p7 = pnand %p6397_p6, %p5739_p12 }
 0x68c   : > { %p6399_p8 = pneg %p6398_p7 }
 0x68e   : > { %p6404_p10 = pnand %p6402_p9, %p6399_p8 }
 0x690   : > { %6407 = shalt.err (!%p6404_p10)
}
 0x691   : > { %5736 = dma.vmem_to_hbm [thread:$0]  (%p5739_p12), %s5171_s15, 32, %s7890_s5, [#allocation5]  }
 0x692   : > { %6421 = dma.done.wait (%p5739_p12), [#allocation5], 32  }
 0x693   : > { %6423 = vsyncadd (%p5739_p12), [#allocation5], 4294967264 }
 0x694 PF: > { %p13_p11 = scmp.ge.s32.totalorder %s6491_s22, 6   ;;  %s7891_s18 = smov %s6430_s19 }
 0x695   : > { %s7892_s19 = smov %s6500_s25  ;;  %s7893_s20 = smov %s6491_s22 }
 0x696   :  { %15 = sbr.rel (!%p13_p11) target bundleno = 2 (0x2), region = 124 }
 0x69d   :  { %5183 = vsyncpa [#allocation5], 1 }
 0x69e   :  { %5185 = vsyncpa [#allocation5 + $0x1], 1 }

</bundles_post_ra>
